<compile_context>
chip_gen: v7x
topology: tpu7x:2x2x1
jax: 0.10.0
libtpu: 0.0.40
codegen_flags: <defaults>
</compile_context>

<pallas_src>
import functools

import jax
import jax.numpy as jnp
from jax.experimental import pallas as pl
from jax.experimental.pallas import tpu as pltpu


def _round_up(x, m):
    return -(-x // m) * m


# -----------------------------------------------------------------------------
# Kernel
# -----------------------------------------------------------------------------
def _luong_decoder_kernel(emb_ref, hprev_ref, enc_ref,
                          wih_ref, whh_ref, bih_ref, bhh_ref,
                          wc_ref, bc_ref, wout_ref, bout_ref,
                          probs_ref, hnew_ref,
                          cat_sc, *, v_valid):
    vt = pl.program_id(0)                 # vocab tile index (single grid axis)
    nvt = pl.num_programs(0)
    Hp = hnew_ref.shape[-1]
    TV = wout_ref.shape[-1]

    # ---- runs once: GRU cell + 'dot' attention + fused concat projection ----
    @pl.when(vt == 0)
    def _():
        x = emb_ref[...]                                    # (B, Hp)
        h = hprev_ref[...]                                  # (B, Hp)

        # GRU single step (PyTorch gate order r, z, n); weights pre-transposed.
        gi = jnp.dot(x, wih_ref[...], preferred_element_type=jnp.float32) + bih_ref[...]
        gh = jnp.dot(h, whh_ref[...], preferred_element_type=jnp.float32) + bhh_ref[...]
        r = jax.nn.sigmoid(gi[:, :Hp] + gh[:, :Hp])
        z = jax.nn.sigmoid(gi[:, Hp:2 * Hp] + gh[:, Hp:2 * Hp])
        n = jnp.tanh(gi[:, 2 * Hp:] + r * gh[:, 2 * Hp:])
        h_new = (1.0 - z) * n + z * h                       # (B, Hp)
        hnew_ref[...] = h_new

        # 'dot' attention on the MXU (batched einsums; no (B,L,H) VPU temporaries).
        enc = enc_ref[...]                                  # (B, L, Hp)
        scores = jnp.einsum('bqh,bkh->bqk', h_new[:, None, :], enc,
                            preferred_element_type=jnp.float32)        # (B, 1, L)
        scores = scores - jnp.max(scores, axis=-1, keepdims=True)
        e = jnp.exp(scores)
        denom = jnp.sum(e, axis=-1, keepdims=True)
        inv = pl.reciprocal(denom, approx=True)
        inv = inv * (2.0 - denom * inv)                     # Newton refine (f32 accurate)
        attn = e * inv                                      # (B, 1, L)
        context = jnp.einsum('bqk,bkh->bqh', attn, enc,
                             preferred_element_type=jnp.float32)[:, 0, :]   # (B, Hp)

        # concat Linear fused into ONE matmul on [h_new, context].
        cat = jnp.concatenate([h_new, context], axis=1)                 # (B, 2*Hp)
        cat_sc[...] = jnp.tanh(
            jnp.dot(cat, wc_ref[...], preferred_element_type=jnp.float32) + bc_ref[...])

    # ---- every step: stream one bf16 W_out tile, write logits into the resident
    #      output block (no separate logits cache, no placeholder writes) ----
    logits = jnp.dot(cat_sc[...].astype(wout_ref.dtype), wout_ref[...],
                     preferred_element_type=jnp.float32) + bout_ref[...]    # (B, TV)
    lane = jax.lax.broadcasted_iota(jnp.int32, logits.shape, 1) + vt * TV
    logits = jnp.where(lane < v_valid, logits, -1e30)       # mask padded vocab lanes
    off = pl.multiple_of(vt * TV, TV)
    probs_ref[:, pl.ds(off, TV)] = logits

    # ---- last step: normalize in place over the fully-resident logits block ----
    @pl.when(vt == nvt - 1)
    def _():
        lg = probs_ref[...]                                 # (B, Vp)
        m = jnp.max(lg, axis=1, keepdims=True)
        e = jnp.exp(lg - m)
        s = jnp.sum(e, axis=1, keepdims=True)
        inv = pl.reciprocal(s, approx=True)
        inv = inv * (2.0 - s * inv)                         # Newton refine
        probs_ref[...] = e * inv


# -----------------------------------------------------------------------------
# One-time weight layout plumbing (transpose + pad to (8,128) tiles, bf16 W_out)
# -----------------------------------------------------------------------------
def prepare_decoder_params(params, *, tile_v=None, wout_dtype=jnp.bfloat16):
    f32 = jnp.float32
    emb = jnp.asarray(params['embedding'], f32)
    H = emb.shape[1]
    V = params['W_out'].shape[0]
    Hp = _round_up(H, 128)
    # Large lane-dense vocab tiles so each grid step moves >= ~1 MiB of W_out.
    TV = int(tile_v) if tile_v is not None else min(4096, _round_up(V, 128))
    Vp = _round_up(V, TV)

    def gate_w(w):                     # (3H,H) -> (Hp, 3*Hp), transposed, per-gate padded
        w = jnp.asarray(w, f32)
        cols = [jnp.zeros((Hp, Hp), f32).at[:H, :H].set(w[g * H:(g + 1) * H, :].T)
                for g in range(3)]
        return jnp.concatenate(cols, axis=1)

    def gate_b(b):                     # (3H,) -> (1, 3*Hp)
        b = jnp.asarray(b, f32)
        segs = [jnp.zeros((Hp,), f32).at[:H].set(b[g * H:(g + 1) * H]) for g in range(3)]
        return jnp.concatenate(segs)[None, :]

    wc = jnp.asarray(params['W_concat'], f32)          # (H, 2H) == nn.Linear(2H,H).weight
    wc_t = jnp.zeros((2 * Hp, Hp), f32)
    wc_t = wc_t.at[:H, :H].set(wc[:, :H].T)            # half acting on rnn_output
    wc_t = wc_t.at[Hp:Hp + H, :H].set(wc[:, H:].T)     # half acting on context

    wout_t = (jnp.zeros((Hp, Vp), f32)
              .at[:H, :V].set(jnp.asarray(params['W_out'], f32).T)
              .astype(wout_dtype))                     # bf16 stream, f32 MXU accumulate
    bout_p = jnp.zeros((1, Vp), f32).at[0, :V].set(jnp.asarray(params['b_out'], f32))
    # (padded vocab lanes are masked in-kernel, so the padded bias is plain zero)

    return {
        'H': H, 'V': V, 'Hp': Hp, 'TV': TV, 'Vp': Vp,
        'embedding': emb,
        'W_ih_T': gate_w(params['W_ih']), 'W_hh_T': gate_w(params['W_hh']),
        'b_ih': gate_b(params['b_ih']), 'b_hh': gate_b(params['b_hh']),
        'Wc_T': wc_t,
        'b_concat': jnp.zeros((1, Hp), f32).at[0, :H].set(jnp.asarray(params['b_concat'], f32)),
        'W_out_T': wout_t, 'b_out': bout_p,
    }


# -----------------------------------------------------------------------------
# Single decode step wrapper
# -----------------------------------------------------------------------------
def luong_attn_decoder_step(input_step, last_hidden, encoder_outputs, prep):
    """input_step (1,B) int32; last_hidden (1,B,H); encoder_outputs (L,B,H)."""
    f32 = jnp.float32
    H, V, Hp, TV, Vp = prep['H'], prep['V'], prep['Hp'], prep['TV'], prep['Vp']
    B = input_step.shape[1]
    L = encoder_outputs.shape[0]
    Bp = _round_up(B, 8)
    nvt = Vp // TV

    embedded = prep['embedding'][input_step[0]]                           # (B,H) gather glue
    h_prev = jnp.asarray(last_hidden, f32)[0]                             # (B,H)
    # TODO(synk): emit encoder outputs batch-major & pre-padded upstream so this
    # per-step transpose/pad (an extra HBM pass) folds into the producer.
    enc_blh = jnp.transpose(jnp.asarray(encoder_outputs, f32), (1, 0, 2))  # (B,L,H)

    emb_p = jnp.zeros((Bp, Hp), f32).at[:B, :H].set(embedded)
    h_p = jnp.zeros((Bp, Hp), f32).at[:B, :H].set(h_prev)
    enc_p = jnp.zeros((Bp, L, Hp), f32).at[:B, :, :H].set(enc_blh)

    wout_itemsize = jnp.dtype(prep['W_out_T'].dtype).itemsize

    # Explicit VMEM budget: single-buffered residents + double-buffered streamed
    # W_out tiles + resident output blocks + scratch, with headroom; capped at
    # 7/8 of physical per-core VMEM (64 MiB on v7x, 128 MiB on v5e/v6e).
    resident = 4 * (2 * Bp * Hp + Bp * L * Hp
                    + 2 * Hp * 3 * Hp + 2 * 3 * Hp + 2 * Hp * Hp + Hp)
    streamed = 2 * (Hp * TV * wout_itemsize + 4 * TV)
    outputs = 2 * 4 * (Bp * Vp + Bp * Hp)
    scratch = 4 * Bp * Hp
    try:
        phys_vmem = pltpu.get_tpu_info().vmem_capacity_bytes
    except Exception:
        phys_vmem = 64 << 20
    cap = int(phys_vmem) * 7 // 8
    vmem_limit = int(min(max(int((resident + streamed + outputs + scratch) * 1.5),
                             4 << 20), cap))

    kernel = functools.partial(_luong_decoder_kernel, v_valid=V)
    out_shape = (jax.ShapeDtypeStruct((Bp, Vp), f32),
                 jax.ShapeDtypeStruct((Bp, Hp), f32))

    def build_call(resident_kwargs):
        def res2(shape):
            return pl.BlockSpec(shape, lambda v: (0, 0), **resident_kwargs)

        in_specs = [
            res2((Bp, Hp)),                                               # embedded
            res2((Bp, Hp)),                                               # h_prev
            pl.BlockSpec((Bp, L, Hp), lambda v: (0, 0, 0), **resident_kwargs),  # enc
            res2((Hp, 3 * Hp)),                                           # W_ih^T
            res2((Hp, 3 * Hp)),                                           # W_hh^T
            res2((1, 3 * Hp)),                                            # b_ih
            res2((1, 3 * Hp)),                                            # b_hh
            res2((2 * Hp, Hp)),                                           # W_concat^T
            res2((1, Hp)),                                                # b_concat
            pl.BlockSpec((Hp, TV), lambda v: (0, v)),   # W_out^T streamed (double-buffered)
            pl.BlockSpec((1, TV), lambda v: (0, v)),    # b_out streamed
        ]
        out_specs = (
            pl.BlockSpec((Bp, Vp), lambda v: (0, 0)),   # resident logits->probs block
            pl.BlockSpec((Bp, Hp), lambda v: (0, 0)),   # h_new (resident)
        )
        grid_spec = pltpu.PrefetchScalarGridSpec(
            num_scalar_prefetch=0,
            grid=(nvt,),
            in_specs=in_specs,
            out_specs=out_specs,
            scratch_shapes=[pltpu.VMEM((Bp, Hp), f32)],   # tanh(concat) cache
        )
        return pl.pallas_call(
            kernel,
            out_shape=out_shape,
            grid_spec=grid_spec,
            compiler_params=pltpu.CompilerParams(
                dimension_semantics=("arbitrary",),
                vmem_limit_bytes=vmem_limit),
        )

    args = (emb_p, h_p, enc_p,
            prep['W_ih_T'], prep['W_hh_T'], prep['b_ih'], prep['b_hh'],
            prep['Wc_T'], prep['b_concat'],
            prep['W_out_T'], prep['b_out'])

    try:
        # Single-buffer the constant-index resident inputs (halves resident VMEM).
        probs_p, hnew_p = build_call({'pipeline_mode': pl.Buffered(1)})(*args)
    except Exception:
        # Fallback: default (double-buffered) residents — functionally identical.
        probs_p, hnew_p = build_call({})(*args)

    return probs_p[:B, :V], hnew_p[:B, :H][None]           # (B,V), (1,B,H)


# -----------------------------------------------------------------------------
# Pure-JAX reference (mirror of the PyTorch forward, dot attention, eval mode)
# -----------------------------------------------------------------------------
def _reference(input_step, last_hidden, encoder_outputs, p):
    x = p['embedding'][input_step[0]]
    h = last_hidden[0]
    H = h.shape[-1]
    gi = x @ p['W_ih'].T + p['b_ih']
    gh = h @ p['W_hh'].T + p['b_hh']
    r = jax.nn.sigmoid(gi[:, :H] + gh[:, :H])
    z = jax.nn.sigmoid(gi[:, H:2 * H] + gh[:, H:2 * H])
    n = jnp.tanh(gi[:, 2 * H:] + r * gh[:, 2 * H:])
    h_new = (1 - z) * n + z * h                                       # (B, H)
    scores = jnp.sum(h_new[None, :, :] * encoder_outputs, axis=2).T   # (B, L)
    attn = jax.nn.softmax(scores, axis=1)
    context = jnp.einsum('bl,lbh->bh', attn, encoder_outputs)
    concat_in = jnp.concatenate([h_new, context], axis=1)
    concat_out = jnp.tanh(concat_in @ p['W_concat'].T + p['b_concat'])
    out = jax.nn.softmax(concat_out @ p['W_out'].T + p['b_out'], axis=1)
    return out, h_new[None]


if __name__ == "__main__":
    B, H, L, V = 2, 32, 8, 64          # batch, hidden_size, enc seq len, output_size
    key = jax.random.PRNGKey(0)
    ks = jax.random.split(key, 12)
    s = 0.1
    params = {
        'embedding': jax.random.normal(ks[0], (V, H), jnp.float32) * s,
        'W_ih':      jax.random.normal(ks[1], (3 * H, H), jnp.float32) * s,
        'W_hh':      jax.random.normal(ks[2], (3 * H, H), jnp.float32) * s,
        'b_ih':      jax.random.normal(ks[3], (3 * H,), jnp.float32) * s,
        'b_hh':      jax.random.normal(ks[4], (3 * H,), jnp.float32) * s,
        'W_concat':  jax.random.normal(ks[5], (H, 2 * H), jnp.float32) * s,
        'b_concat':  jax.random.normal(ks[6], (H,), jnp.float32) * s,
        'W_out':     jax.random.normal(ks[7], (V, H), jnp.float32) * s,
        'b_out':     jax.random.normal(ks[8], (V,), jnp.float32) * s,
    }
    input_step = jax.random.randint(ks[9], (1, B), 0, V, dtype=jnp.int32)
    last_hidden = jax.random.normal(ks[10], (1, B, H), jnp.float32)
    encoder_outputs = jax.random.normal(ks[11], (L, B, H), jnp.float32)

    prep = prepare_decoder_params(params)                 # one-time layout plumbing
    probs, hidden = luong_attn_decoder_step(input_step, last_hidden, encoder_outputs, prep)
    jax.block_until_ready((probs, hidden))

    ref_probs, ref_hidden = _reference(input_step, last_hidden, encoder_outputs, params)
    assert probs.shape == (B, V) and hidden.shape == (1, B, H)
    assert bool(jnp.all(jnp.isfinite(probs))) and bool(jnp.all(jnp.isfinite(hidden)))
    assert jnp.allclose(jnp.sum(probs, axis=1), 1.0, atol=1e-4)
    assert jnp.allclose(probs, ref_probs, atol=5e-4, rtol=1e-3), \
        float(jnp.max(jnp.abs(probs - ref_probs)))
    assert jnp.allclose(hidden, ref_hidden, atol=5e-4, rtol=1e-3), \
        float(jnp.max(jnp.abs(hidden - ref_hidden)))
    print("KERNEL_OK")
</pallas_src>

<mosaic_0001>
module attributes {stable_mosaic.version = 11 : i64} {
  func.func @_luong_decoder_kernel(%arg0: i32, %arg1: memref<8x128xf32, #tpu.memory_space<vmem>>, %arg2: memref<8x128xf32, #tpu.memory_space<vmem>>, %arg3: memref<8x8x128xf32, #tpu.memory_space<vmem>>, %arg4: memref<128x384xf32, #tpu.memory_space<vmem>>, %arg5: memref<128x384xf32, #tpu.memory_space<vmem>>, %arg6: memref<1x384xf32, #tpu.memory_space<vmem>>, %arg7: memref<1x384xf32, #tpu.memory_space<vmem>>, %arg8: memref<256x128xf32, #tpu.memory_space<vmem>>, %arg9: memref<1x128xf32, #tpu.memory_space<vmem>>, %arg10: memref<128x128xbf16, #tpu.memory_space<vmem>>, %arg11: memref<1x128xf32, #tpu.memory_space<vmem>>, %arg12: memref<8x128xf32, #tpu.memory_space<vmem>>, %arg13: memref<8x128xf32, #tpu.memory_space<vmem>>, %arg14: memref<8x128xf32, #tpu.memory_space<vmem>>) attributes {dimension_semantics = [#tpu.dimension_semantics<arbitrary>], iteration_bounds = array<i64: 1>, scalar_prefetch = 0 : i64, scratch_operands = 1 : i64, tpu.core_type = #tpu.core_type<tc>, window_params = [{pipeline_mode = #tpu.pipeline_mode<synchronous>, transform_indices = @transform_0, window_bounds = array<i64: 8, 128>}, {pipeline_mode = #tpu.pipeline_mode<synchronous>, transform_indices = @transform_1, window_bounds = array<i64: 8, 128>}, {pipeline_mode = #tpu.pipeline_mode<synchronous>, transform_indices = @transform_2, window_bounds = array<i64: 8, 8, 128>}, {pipeline_mode = #tpu.pipeline_mode<synchronous>, transform_indices = @transform_3, window_bounds = array<i64: 128, 384>}, {pipeline_mode = #tpu.pipeline_mode<synchronous>, transform_indices = @transform_4, window_bounds = array<i64: 128, 384>}, {pipeline_mode = #tpu.pipeline_mode<synchronous>, transform_indices = @transform_5, window_bounds = array<i64: 1, 384>}, {pipeline_mode = #tpu.pipeline_mode<synchronous>, transform_indices = @transform_6, window_bounds = array<i64: 1, 384>}, {pipeline_mode = #tpu.pipeline_mode<synchronous>, transform_indices = @transform_7, window_bounds = array<i64: 256, 128>}, {pipeline_mode = #tpu.pipeline_mode<synchronous>, transform_indices = @transform_8, window_bounds = array<i64: 1, 128>}, {transform_indices = @transform_9, window_bounds = array<i64: 128, 128>}, {transform_indices = @transform_10, window_bounds = array<i64: 1, 128>}, {pipeline_mode = #tpu.pipeline_mode<synchronous>, transform_indices = @transform_11, window_bounds = array<i64: 8, 128>}, {pipeline_mode = #tpu.pipeline_mode<synchronous>, transform_indices = @transform_12, window_bounds = array<i64: 8, 128>}]} {
    %c0_i32 = arith.constant 0 : i32
    %0 = arith.cmpi eq, %arg0, %c0_i32 : i32
    %1 = arith.extui %0 : i1 to i32
    %c0_i32_0 = arith.constant 0 : i32
    %2 = arith.cmpi ne, %1, %c0_i32_0 : i32
    scf.if %2 {
      %c0_11 = arith.constant 0 : index
      %c0_12 = arith.constant 0 : index
      %25 = vector.load %arg1[%c0_11, %c0_12] : memref<8x128xf32, #tpu.memory_space<vmem>>, vector<8x128xf32>
      %c0_13 = arith.constant 0 : index
      %c0_14 = arith.constant 0 : index
      %26 = vector.load %arg2[%c0_13, %c0_14] : memref<8x128xf32, #tpu.memory_space<vmem>>, vector<8x128xf32>
      %c0_15 = arith.constant 0 : index
      %c0_16 = arith.constant 0 : index
      %27 = vector.load %arg4[%c0_15, %c0_16] : memref<128x384xf32, #tpu.memory_space<vmem>>, vector<128x384xf32>
      %cst_17 = arith.constant dense<0.000000e+00> : vector<8x384xf32>
      %28 = tpu.matmul %25, %27, %cst_17 {dimension_numbers = #tpu.dot_dimension_numbers<[1], [0], [0], [1], [0, 0, 1, 1], [], []>} : vector<8x128xf32>, vector<128x384xf32>, vector<8x384xf32> -> vector<8x384xf32>
      %c0_18 = arith.constant 0 : index
      %c0_19 = arith.constant 0 : index
      %29 = vector.load %arg6[%c0_18, %c0_19] : memref<1x384xf32, #tpu.memory_space<vmem>>, vector<1x384xf32>
      %30 = vector.broadcast %29 : vector<1x384xf32> to vector<8x384xf32>
      %31 = arith.addf %28, %30 : vector<8x384xf32>
      %c0_20 = arith.constant 0 : index
      %c0_21 = arith.constant 0 : index
      %32 = vector.load %arg5[%c0_20, %c0_21] : memref<128x384xf32, #tpu.memory_space<vmem>>, vector<128x384xf32>
      %cst_22 = arith.constant dense<0.000000e+00> : vector<8x384xf32>
      %33 = tpu.matmul %26, %32, %cst_22 {dimension_numbers = #tpu.dot_dimension_numbers<[1], [0], [0], [1], [0, 0, 1, 1], [], []>} : vector<8x128xf32>, vector<128x384xf32>, vector<8x384xf32> -> vector<8x384xf32>
      %c0_23 = arith.constant 0 : index
      %c0_24 = arith.constant 0 : index
      %34 = vector.load %arg7[%c0_23, %c0_24] : memref<1x384xf32, #tpu.memory_space<vmem>>, vector<1x384xf32>
      %35 = vector.broadcast %34 : vector<1x384xf32> to vector<8x384xf32>
      %36 = arith.addf %33, %35 : vector<8x384xf32>
      %37 = vector.extract_strided_slice %31 {offsets = [0, 0], sizes = [8, 128], strides = [1, 1]} : vector<8x384xf32> to vector<8x128xf32>
      %38 = vector.extract_strided_slice %36 {offsets = [0, 0], sizes = [8, 128], strides = [1, 1]} : vector<8x384xf32> to vector<8x128xf32>
      %39 = arith.addf %37, %38 : vector<8x128xf32>
      %40 = arith.negf %39 : vector<8x128xf32>
      %41 = math.exp %40 : vector<8x128xf32>
      %cst_25 = arith.constant 1.000000e+00 : f32
      %42 = vector.broadcast %cst_25 : f32 to vector<8x128xf32>
      %43 = arith.addf %42, %41 : vector<8x128xf32>
      %44 = arith.divf %42, %43 : vector<8x128xf32>
      %45 = vector.extract_strided_slice %31 {offsets = [0, 128], sizes = [8, 128], strides = [1, 1]} : vector<8x384xf32> to vector<8x128xf32>
      %46 = vector.extract_strided_slice %36 {offsets = [0, 128], sizes = [8, 128], strides = [1, 1]} : vector<8x384xf32> to vector<8x128xf32>
      %47 = arith.addf %45, %46 : vector<8x128xf32>
      %48 = arith.negf %47 : vector<8x128xf32>
      %49 = math.exp %48 : vector<8x128xf32>
      %cst_26 = arith.constant 1.000000e+00 : f32
      %50 = vector.broadcast %cst_26 : f32 to vector<8x128xf32>
      %51 = arith.addf %50, %49 : vector<8x128xf32>
      %52 = arith.divf %50, %51 : vector<8x128xf32>
      %53 = vector.extract_strided_slice %31 {offsets = [0, 256], sizes = [8, 128], strides = [1, 1]} : vector<8x384xf32> to vector<8x128xf32>
      %54 = vector.extract_strided_slice %36 {offsets = [0, 256], sizes = [8, 128], strides = [1, 1]} : vector<8x384xf32> to vector<8x128xf32>
      %55 = arith.mulf %44, %54 : vector<8x128xf32>
      %56 = arith.addf %53, %55 : vector<8x128xf32>
      %57 = math.tanh %56 : vector<8x128xf32>
      %cst_27 = arith.constant 1.000000e+00 : f32
      %58 = vector.broadcast %cst_27 : f32 to vector<8x128xf32>
      %59 = arith.subf %58, %52 : vector<8x128xf32>
      %60 = arith.mulf %59, %57 : vector<8x128xf32>
      %61 = arith.mulf %52, %26 : vector<8x128xf32>
      %62 = arith.addf %60, %61 : vector<8x128xf32>
      %c0_28 = arith.constant 0 : index
      %c0_29 = arith.constant 0 : index
      %63 = vector.load %arg13[%c0_28, %c0_29] : memref<8x128xf32, #tpu.memory_space<vmem>>, vector<8x128xf32>
      tpu.vector_store %arg13[%c0_28, %c0_29], %62 {strides = array<i32>} : memref<8x128xf32, #tpu.memory_space<vmem>>, vector<8x128xf32>,
      %c0_30 = arith.constant 0 : index
      %c0_31 = arith.constant 0 : index
      %c0_32 = arith.constant 0 : index
      %64 = vector.load %arg3[%c0_30, %c0_31, %c0_32] : memref<8x8x128xf32, #tpu.memory_space<vmem>>, vector<8x8x128xf32>
      %65 = vector.shape_cast %62 : vector<8x128xf32> to vector<8x1x128xf32>
      "tpu.trace_start"() <{level = 10 : i32, message = "bqh,bkh->bqk"}> : () -> ()
      %cst_33 = arith.constant dense<0.000000e+00> : vector<8x1x8xf32>
      %66 = tpu.matmul %65, %64, %cst_33 {dimension_numbers = #tpu.dot_dimension_numbers<[2], [2], [1], [1], [0, 0, 0, 1, 1, 1], [0], [0]>} : vector<8x1x128xf32>, vector<8x8x128xf32>, vector<8x1x8xf32> -> vector<8x1x8xf32>
      "tpu.trace_stop"() : () -> ()
      %cst_34 = arith.constant dense<0xFF800000> : vector<8x1xf32>
      %67 = vector.multi_reduction <maximumf>, %66, %cst_34 [2] : vector<8x1x8xf32> to vector<8x1xf32>
      %68 = vector.shape_cast %67 : vector<8x1xf32> to vector<8x1x1xf32>
      %69 = vector.broadcast %68 : vector<8x1x1xf32> to vector<8x1x8xf32>
      %70 = arith.subf %66, %69 : vector<8x1x8xf32>
      %71 = math.exp %70 : vector<8x1x8xf32>
      %cst_35 = arith.constant dense<0.000000e+00> : vector<8x1xf32>
      %72 = vector.multi_reduction <add>, %71, %cst_35 [2] : vector<8x1x8xf32> to vector<8x1xf32>
      %73 = vector.shape_cast %72 : vector<8x1xf32> to vector<8x1x1xf32>
      %74 = tpu.reciprocal %73 {approx = true} : vector<8x1x1xf32> -> vector<8x1x1xf32>
      %75 = arith.mulf %73, %74 : vector<8x1x1xf32>
      %cst_36 = arith.constant 2.000000e+00 : f32
      %76 = vector.broadcast %cst_36 : f32 to vector<8x1x1xf32>
      %77 = arith.subf %76, %75 : vector<8x1x1xf32>
      %78 = arith.mulf %74, %77 : vector<8x1x1xf32>
      %79 = vector.broadcast %78 : vector<8x1x1xf32> to vector<8x1x8xf32>
      %80 = arith.mulf %71, %79 : vector<8x1x8xf32>
      "tpu.trace_start"() <{level = 10 : i32, message = "bqk,bkh->bqh"}> : () -> ()
      %cst_37 = arith.constant dense<0.000000e+00> : vector<8x1x128xf32>
      %81 = tpu.matmul %80, %64, %cst_37 {dimension_numbers = #tpu.dot_dimension_numbers<[2], [1], [1], [2], [0, 0, 0, 1, 1, 2], [0], [0]>} : vector<8x1x8xf32>, vector<8x8x128xf32>, vector<8x1x128xf32> -> vector<8x1x128xf32>
      "tpu.trace_stop"() : () -> ()
      %82 = vector.shape_cast %81 : vector<8x1x128xf32> to vector<8x128xf32>
      %83 = tpu.concatenate %62, %82 in 1 : vector<8x128xf32>, vector<8x128xf32> -> vector<8x256xf32>
      %c0_38 = arith.constant 0 : index
      %c0_39 = arith.constant 0 : index
      %84 = vector.load %arg8[%c0_38, %c0_39] : memref<256x128xf32, #tpu.memory_space<vmem>>, vector<256x128xf32>
      %cst_40 = arith.constant dense<0.000000e+00> : vector<8x128xf32>
      %85 = tpu.matmul %83, %84, %cst_40 {dimension_numbers = #tpu.dot_dimension_numbers<[1], [0], [0], [1], [0, 0, 1, 1], [], []>} : vector<8x256xf32>, vector<256x128xf32>, vector<8x128xf32> -> vector<8x128xf32>
      %c0_41 = arith.constant 0 : index
      %c0_42 = arith.constant 0 : index
      %86 = vector.load %arg9[%c0_41, %c0_42] : memref<1x128xf32, #tpu.memory_space<vmem>>, vector<1x128xf32>
      %87 = vector.broadcast %86 : vector<1x128xf32> to vector<8x128xf32>
      %88 = arith.addf %85, %87 : vector<8x128xf32>
      %89 = math.tanh %88 : vector<8x128xf32>
      %c0_43 = arith.constant 0 : index
      %c0_44 = arith.constant 0 : index
      %90 = vector.load %arg14[%c0_43, %c0_44] : memref<8x128xf32, #tpu.memory_space<vmem>>, vector<8x128xf32>
      tpu.vector_store %arg14[%c0_43, %c0_44], %89 {strides = array<i32>} : memref<8x128xf32, #tpu.memory_space<vmem>>, vector<8x128xf32>,
    } else {
    }
    %c0 = arith.constant 0 : index
    %c0_1 = arith.constant 0 : index
    %3 = vector.load %arg14[%c0, %c0_1] : memref<8x128xf32, #tpu.memory_space<vmem>>, vector<8x128xf32>
    %4 = arith.truncf %3 : vector<8x128xf32> to vector<8x128xbf16>
    %c0_2 = arith.constant 0 : index
    %c0_3 = arith.constant 0 : index
    %5 = vector.load %arg10[%c0_2, %c0_3] : memref<128x128xbf16, #tpu.memory_space<vmem>>, vector<128x128xbf16>
    %cst = arith.constant dense<0.000000e+00> : vector<8x128xf32>
    %6 = tpu.matmul %4, %5, %cst {dimension_numbers = #tpu.dot_dimension_numbers<[1], [0], [0], [1], [0, 0, 1, 1], [], []>} : vector<8x128xbf16>, vector<128x128xbf16>, vector<8x128xf32> -> vector<8x128xf32>
    %c0_4 = arith.constant 0 : index
    %c0_5 = arith.constant 0 : index
    %7 = vector.load %arg11[%c0_4, %c0_5] : memref<1x128xf32, #tpu.memory_space<vmem>>, vector<1x128xf32>
    %8 = vector.broadcast %7 : vector<1x128xf32> to vector<8x128xf32>
    %9 = arith.addf %6, %8 : vector<8x128xf32>
    %10 = tpu.iota {dimensions = array<i32: 1>} : vector<8x128xi32>
    %c128_i32 = arith.constant 128 : i32
    %11 = arith.muli %arg0, %c128_i32 : i32
    %12 = vector.broadcast %11 : i32 to vector<8x128xi32>
    %13 = arith.addi %10, %12 : vector<8x128xi32>
    %c64_i32 = arith.constant 64 : i32
    %14 = vector.broadcast %c64_i32 : i32 to vector<8x128xi32>
    %15 = arith.cmpi slt, %13, %14 : vector<8x128xi32>
    %cst_6 = arith.constant -1.000000e+30 : f32
    %16 = vector.broadcast %cst_6 : f32 to vector<8x128xf32>
    %17 = arith.select %15, %9, %16 : vector<8x128xi1>, vector<8x128xf32>
    %c128_i32_7 = arith.constant 128 : i32
    %18 = arith.muli %arg0, %c128_i32_7 : i32
    %19 = tpu.assume_multiple %18, 128 : i32
    %c0_8 = arith.constant 0 : index
    %20 = arith.index_cast %19 : i32 to index
    %21 = vector.load %arg12[%c0_8, %20] : memref<8x128xf32, #tpu.memory_space<vmem>>, vector<8x128xf32>
    tpu.vector_store %arg12[%c0_8, %20], %17 {strides = array<i32>} : memref<8x128xf32, #tpu.memory_space<vmem>>, vector<8x128xf32>,
    %c0_i32_9 = arith.constant 0 : i32
    %22 = arith.cmpi eq, %arg0, %c0_i32_9 : i32
    %23 = arith.extui %22 : i1 to i32
    %c0_i32_10 = arith.constant 0 : i32
    %24 = arith.cmpi ne, %23, %c0_i32_10 : i32
    scf.if %24 {
      %c0_11 = arith.constant 0 : index
      %c0_12 = arith.constant 0 : index
      %25 = vector.load %arg12[%c0_11, %c0_12] : memref<8x128xf32, #tpu.memory_space<vmem>>, vector<8x128xf32>
      %cst_13 = arith.constant dense<0xFF800000> : vector<8xf32>
      %26 = vector.multi_reduction <maximumf>, %25, %cst_13 [1] : vector<8x128xf32> to vector<8xf32>
      %27 = vector.shape_cast %26 : vector<8xf32> to vector<8x1xf32>
      %28 = vector.broadcast %27 : vector<8x1xf32> to vector<8x128xf32>
      %29 = arith.subf %25, %28 : vector<8x128xf32>
      %30 = math.exp %29 : vector<8x128xf32>
      %cst_14 = arith.constant dense<0.000000e+00> : vector<8xf32>
      %31 = vector.multi_reduction <add>, %30, %cst_14 [1] : vector<8x128xf32> to vector<8xf32>
      %32 = vector.shape_cast %31 : vector<8xf32> to vector<8x1xf32>
      %33 = tpu.reciprocal %32 {approx = true} : vector<8x1xf32> -> vector<8x1xf32>
      %34 = arith.mulf %32, %33 : vector<8x1xf32>
      %cst_15 = arith.constant 2.000000e+00 : f32
      %35 = vector.broadcast %cst_15 : f32 to vector<8x1xf32>
      %36 = arith.subf %35, %34 : vector<8x1xf32>
      %37 = arith.mulf %33, %36 : vector<8x1xf32>
      %38 = vector.broadcast %37 : vector<8x1xf32> to vector<8x128xf32>
      %39 = arith.mulf %30, %38 : vector<8x128xf32>
      %c0_16 = arith.constant 0 : index
      %c0_17 = arith.constant 0 : index
      %40 = vector.load %arg12[%c0_16, %c0_17] : memref<8x128xf32, #tpu.memory_space<vmem>>, vector<8x128xf32>
      tpu.vector_store %arg12[%c0_16, %c0_17], %39 {strides = array<i32>} : memref<8x128xf32, #tpu.memory_space<vmem>>, vector<8x128xf32>,
    } else {
    }
    return
  }
  func.func @transform_0(%arg0: i32) -> (i32, i32) {
    %c0_i32 = arith.constant 0 : i32
    %c0_i32_0 = arith.constant 0 : i32
    %c0_i32_1 = arith.constant 0 : i32
    return %c0_i32, %c0_i32_0 : i32, i32
  }
  func.func @transform_1(%arg0: i32) -> (i32, i32) {
    %c0_i32 = arith.constant 0 : i32
    %c0_i32_0 = arith.constant 0 : i32
    %c0_i32_1 = arith.constant 0 : i32
    return %c0_i32, %c0_i32_0 : i32, i32
  }
  func.func @transform_2(%arg0: i32) -> (i32, i32, i32) {
    %c0_i32 = arith.constant 0 : i32
    %c0_i32_0 = arith.constant 0 : i32
    %c0_i32_1 = arith.constant 0 : i32
    %c0_i32_2 = arith.constant 0 : i32
    return %c0_i32, %c0_i32_0, %c0_i32_1 : i32, i32, i32
  }
  func.func @transform_3(%arg0: i32) -> (i32, i32) {
    %c0_i32 = arith.constant 0 : i32
    %c0_i32_0 = arith.constant 0 : i32
    %c0_i32_1 = arith.constant 0 : i32
    return %c0_i32, %c0_i32_0 : i32, i32
  }
  func.func @transform_4(%arg0: i32) -> (i32, i32) {
    %c0_i32 = arith.constant 0 : i32
    %c0_i32_0 = arith.constant 0 : i32
    %c0_i32_1 = arith.constant 0 : i32
    return %c0_i32, %c0_i32_0 : i32, i32
  }
  func.func @transform_5(%arg0: i32) -> (i32, i32) {
    %c0_i32 = arith.constant 0 : i32
    %c0_i32_0 = arith.constant 0 : i32
    %c0_i32_1 = arith.constant 0 : i32
    return %c0_i32, %c0_i32_0 : i32, i32
  }
  func.func @transform_6(%arg0: i32) -> (i32, i32) {
    %c0_i32 = arith.constant 0 : i32
    %c0_i32_0 = arith.constant 0 : i32
    %c0_i32_1 = arith.constant 0 : i32
    return %c0_i32, %c0_i32_0 : i32, i32
  }
  func.func @transform_7(%arg0: i32) -> (i32, i32) {
    %c0_i32 = arith.constant 0 : i32
    %c0_i32_0 = arith.constant 0 : i32
    %c0_i32_1 = arith.constant 0 : i32
    return %c0_i32, %c0_i32_0 : i32, i32
  }
  func.func @transform_8(%arg0: i32) -> (i32, i32) {
    %c0_i32 = arith.constant 0 : i32
    %c0_i32_0 = arith.constant 0 : i32
    %c0_i32_1 = arith.constant 0 : i32
    return %c0_i32, %c0_i32_0 : i32, i32
  }
  func.func @transform_9(%arg0: i32) -> (i32, i32) {
    %c0_i32 = arith.constant 0 : i32
    %c0_i32_0 = arith.constant 0 : i32
    return %c0_i32, %arg0 : i32, i32
  }
  func.func @transform_10(%arg0: i32) -> (i32, i32) {
    %c0_i32 = arith.constant 0 : i32
    %c0_i32_0 = arith.constant 0 : i32
    return %c0_i32, %arg0 : i32, i32
  }
  func.func @transform_11(%arg0: i32) -> (i32, i32) {
    %c0_i32 = arith.constant 0 : i32
    %c0_i32_0 = arith.constant 0 : i32
    %c0_i32_1 = arith.constant 0 : i32
    return %c0_i32, %c0_i32_0 : i32, i32
  }
  func.func @transform_12(%arg0: i32) -> (i32, i32) {
    %c0_i32 = arith.constant 0 : i32
    %c0_i32_0 = arith.constant 0 : i32
    %c0_i32_1 = arith.constant 0 : i32
    return %c0_i32, %c0_i32_0 : i32, i32
  }
}

module attributes {stable_mosaic.version = 11 : i64} {
  func.func @_luong_decoder_kernel(%arg0: i32, %arg1: memref<8x128xf32, #tpu.memory_space<vmem>>, %arg2: memref<8x128xf32, #tpu.memory_space<vmem>>, %arg3: memref<8x8x128xf32, #tpu.memory_space<vmem>>, %arg4: memref<128x384xf32, #tpu.memory_space<vmem>>, %arg5: memref<128x384xf32, #tpu.memory_space<vmem>>, %arg6: memref<1x384xf32, #tpu.memory_space<vmem>>, %arg7: memref<1x384xf32, #tpu.memory_space<vmem>>, %arg8: memref<256x128xf32, #tpu.memory_space<vmem>>, %arg9: memref<1x128xf32, #tpu.memory_space<vmem>>, %arg10: memref<128x128xbf16, #tpu.memory_space<vmem>>, %arg11: memref<1x128xf32, #tpu.memory_space<vmem>>, %arg12: memref<8x128xf32, #tpu.memory_space<vmem>>, %arg13: memref<8x128xf32, #tpu.memory_space<vmem>>, %arg14: memref<8x128xf32, #tpu.memory_space<vmem>>) attributes {dimension_semantics = [#tpu.dimension_semantics<arbitrary>], iteration_bounds = array<i64: 1>, scalar_prefetch = 0 : i64, scratch_operands = 1 : i64, tpu.core_type = #tpu.core_type<tc>, window_params = [{pipeline_mode = #tpu.pipeline_mode<synchronous>, transform_indices = @transform_0, window_bounds = array<i64: 8, 128>}, {pipeline_mode = #tpu.pipeline_mode<synchronous>, transform_indices = @transform_1, window_bounds = array<i64: 8, 128>}, {pipeline_mode = #tpu.pipeline_mode<synchronous>, transform_indices = @transform_2, window_bounds = array<i64: 8, 8, 128>}, {pipeline_mode = #tpu.pipeline_mode<synchronous>, transform_indices = @transform_3, window_bounds = array<i64: 128, 384>}, {pipeline_mode = #tpu.pipeline_mode<synchronous>, transform_indices = @transform_4, window_bounds = array<i64: 128, 384>}, {pipeline_mode = #tpu.pipeline_mode<synchronous>, transform_indices = @transform_5, window_bounds = array<i64: 1, 384>}, {pipeline_mode = #tpu.pipeline_mode<synchronous>, transform_indices = @transform_6, window_bounds = array<i64: 1, 384>}, {pipeline_mode = #tpu.pipeline_mode<synchronous>, transform_indices = @transform_7, window_bounds = array<i64: 256, 128>}, {pipeline_mode = #tpu.pipeline_mode<synchronous>, transform_indices = @transform_8, window_bounds = array<i64: 1, 128>}, {transform_indices = @transform_9, window_bounds = array<i64: 128, 128>}, {transform_indices = @transform_10, window_bounds = array<i64: 1, 128>}, {pipeline_mode = #tpu.pipeline_mode<synchronous>, transform_indices = @transform_11, window_bounds = array<i64: 8, 128>}, {pipeline_mode = #tpu.pipeline_mode<synchronous>, transform_indices = @transform_12, window_bounds = array<i64: 8, 128>}]} {
    %c0_i32 = arith.constant 0 : i32
    %0 = arith.cmpi eq, %arg0, %c0_i32 : i32
    %1 = arith.extui %0 : i1 to i32
    %c0_i32_0 = arith.constant 0 : i32
    %2 = arith.cmpi ne, %1, %c0_i32_0 : i32
    scf.if %2 {
      %c0_11 = arith.constant 0 : index
      %c0_12 = arith.constant 0 : index
      %25 = vector.load %arg1[%c0_11, %c0_12] : memref<8x128xf32, #tpu.memory_space<vmem>>, vector<8x128xf32>
      %c0_13 = arith.constant 0 : index
      %c0_14 = arith.constant 0 : index
      %26 = vector.load %arg2[%c0_13, %c0_14] : memref<8x128xf32, #tpu.memory_space<vmem>>, vector<8x128xf32>
      %c0_15 = arith.constant 0 : index
      %c0_16 = arith.constant 0 : index
      %27 = vector.load %arg4[%c0_15, %c0_16] : memref<128x384xf32, #tpu.memory_space<vmem>>, vector<128x384xf32>
      %cst_17 = arith.constant dense<0.000000e+00> : vector<8x384xf32>
      %28 = tpu.matmul %25, %27, %cst_17 {dimension_numbers = #tpu.dot_dimension_numbers<[1], [0], [0], [1], [0, 0, 1, 1], [], []>} : vector<8x128xf32>, vector<128x384xf32>, vector<8x384xf32> -> vector<8x384xf32>
      %c0_18 = arith.constant 0 : index
      %c0_19 = arith.constant 0 : index
      %29 = vector.load %arg6[%c0_18, %c0_19] : memref<1x384xf32, #tpu.memory_space<vmem>>, vector<1x384xf32>
      %30 = vector.broadcast %29 : vector<1x384xf32> to vector<8x384xf32>
      %31 = arith.addf %28, %30 : vector<8x384xf32>
      %c0_20 = arith.constant 0 : index
      %c0_21 = arith.constant 0 : index
      %32 = vector.load %arg5[%c0_20, %c0_21] : memref<128x384xf32, #tpu.memory_space<vmem>>, vector<128x384xf32>
      %cst_22 = arith.constant dense<0.000000e+00> : vector<8x384xf32>
      %33 = tpu.matmul %26, %32, %cst_22 {dimension_numbers = #tpu.dot_dimension_numbers<[1], [0], [0], [1], [0, 0, 1, 1], [], []>} : vector<8x128xf32>, vector<128x384xf32>, vector<8x384xf32> -> vector<8x384xf32>
      %c0_23 = arith.constant 0 : index
      %c0_24 = arith.constant 0 : index
      %34 = vector.load %arg7[%c0_23, %c0_24] : memref<1x384xf32, #tpu.memory_space<vmem>>, vector<1x384xf32>
      %35 = vector.broadcast %34 : vector<1x384xf32> to vector<8x384xf32>
      %36 = arith.addf %33, %35 : vector<8x384xf32>
      %37 = vector.extract_strided_slice %31 {offsets = [0, 0], sizes = [8, 128], strides = [1, 1]} : vector<8x384xf32> to vector<8x128xf32>
      %38 = vector.extract_strided_slice %36 {offsets = [0, 0], sizes = [8, 128], strides = [1, 1]} : vector<8x384xf32> to vector<8x128xf32>
      %39 = arith.addf %37, %38 : vector<8x128xf32>
      %40 = arith.negf %39 : vector<8x128xf32>
      %41 = math.exp %40 : vector<8x128xf32>
      %cst_25 = arith.constant 1.000000e+00 : f32
      %42 = vector.broadcast %cst_25 : f32 to vector<8x128xf32>
      %43 = arith.addf %42, %41 : vector<8x128xf32>
      %44 = arith.divf %42, %43 : vector<8x128xf32>
      %45 = vector.extract_strided_slice %31 {offsets = [0, 128], sizes = [8, 128], strides = [1, 1]} : vector<8x384xf32> to vector<8x128xf32>
      %46 = vector.extract_strided_slice %36 {offsets = [0, 128], sizes = [8, 128], strides = [1, 1]} : vector<8x384xf32> to vector<8x128xf32>
      %47 = arith.addf %45, %46 : vector<8x128xf32>
      %48 = arith.negf %47 : vector<8x128xf32>
      %49 = math.exp %48 : vector<8x128xf32>
      %cst_26 = arith.constant 1.000000e+00 : f32
      %50 = vector.broadcast %cst_26 : f32 to vector<8x128xf32>
      %51 = arith.addf %50, %49 : vector<8x128xf32>
      %52 = arith.divf %50, %51 : vector<8x128xf32>
      %53 = vector.extract_strided_slice %31 {offsets = [0, 256], sizes = [8, 128], strides = [1, 1]} : vector<8x384xf32> to vector<8x128xf32>
      %54 = vector.extract_strided_slice %36 {offsets = [0, 256], sizes = [8, 128], strides = [1, 1]} : vector<8x384xf32> to vector<8x128xf32>
      %55 = arith.mulf %44, %54 : vector<8x128xf32>
      %56 = arith.addf %53, %55 : vector<8x128xf32>
      %57 = math.tanh %56 : vector<8x128xf32>
      %cst_27 = arith.constant 1.000000e+00 : f32
      %58 = vector.broadcast %cst_27 : f32 to vector<8x128xf32>
      %59 = arith.subf %58, %52 : vector<8x128xf32>
      %60 = arith.mulf %59, %57 : vector<8x128xf32>
      %61 = arith.mulf %52, %26 : vector<8x128xf32>
      %62 = arith.addf %60, %61 : vector<8x128xf32>
      %c0_28 = arith.constant 0 : index
      %c0_29 = arith.constant 0 : index
      %63 = vector.load %arg13[%c0_28, %c0_29] : memref<8x128xf32, #tpu.memory_space<vmem>>, vector<8x128xf32>
      tpu.vector_store %arg13[%c0_28, %c0_29], %62 {strides = array<i32>} : memref<8x128xf32, #tpu.memory_space<vmem>>, vector<8x128xf32>,
      %c0_30 = arith.constant 0 : index
      %c0_31 = arith.constant 0 : index
      %c0_32 = arith.constant 0 : index
      %64 = vector.load %arg3[%c0_30, %c0_31, %c0_32] : memref<8x8x128xf32, #tpu.memory_space<vmem>>, vector<8x8x128xf32>
      %65 = vector.shape_cast %62 : vector<8x128xf32> to vector<8x1x128xf32>
      "tpu.trace_start"() <{level = 10 : i32, message = "bqh,bkh->bqk"}> : () -> ()
      %cst_33 = arith.constant dense<0.000000e+00> : vector<8x1x8xf32>
      %66 = tpu.matmul %65, %64, %cst_33 {dimension_numbers = #tpu.dot_dimension_numbers<[2], [2], [1], [1], [0, 0, 0, 1, 1, 1], [0], [0]>} : vector<8x1x128xf32>, vector<8x8x128xf32>, vector<8x1x8xf32> -> vector<8x1x8xf32>
      "tpu.trace_stop"() : () -> ()
      %cst_34 = arith.constant dense<0xFF800000> : vector<8x1xf32>
      %67 = vector.multi_reduction <maximumf>, %66, %cst_34 [2] : vector<8x1x8xf32> to vector<8x1xf32>
      %68 = vector.shape_cast %67 : vector<8x1xf32> to vector<8x1x1xf32>
      %69 = vector.broadcast %68 : vector<8x1x1xf32> to vector<8x1x8xf32>
      %70 = arith.subf %66, %69 : vector<8x1x8xf32>
      %71 = math.exp %70 : vector<8x1x8xf32>
      %cst_35 = arith.constant dense<0.000000e+00> : vector<8x1xf32>
      %72 = vector.multi_reduction <add>, %71, %cst_35 [2] : vector<8x1x8xf32> to vector<8x1xf32>
      %73 = vector.shape_cast %72 : vector<8x1xf32> to vector<8x1x1xf32>
      %74 = tpu.reciprocal %73 {approx = true} : vector<8x1x1xf32> -> vector<8x1x1xf32>
      %75 = arith.mulf %73, %74 : vector<8x1x1xf32>
      %cst_36 = arith.constant 2.000000e+00 : f32
      %76 = vector.broadcast %cst_36 : f32 to vector<8x1x1xf32>
      %77 = arith.subf %76, %75 : vector<8x1x1xf32>
      %78 = arith.mulf %74, %77 : vector<8x1x1xf32>
      %79 = vector.broadcast %78 : vector<8x1x1xf32> to vector<8x1x8xf32>
      %80 = arith.mulf %71, %79 : vector<8x1x8xf32>
      "tpu.trace_start"() <{level = 10 : i32, message = "bqk,bkh->bqh"}> : () -> ()
      %cst_37 = arith.constant dense<0.000000e+00> : vector<8x1x128xf32>
      %81 = tpu.matmul %80, %64, %cst_37 {dimension_numbers = #tpu.dot_dimension_numbers<[2], [1], [1], [2], [0, 0, 0, 1, 1, 2], [0], [0]>} : vector<8x1x8xf32>, vector<8x8x128xf32>, vector<8x1x128xf32> -> vector<8x1x128xf32>
      "tpu.trace_stop"() : () -> ()
      %82 = vector.shape_cast %81 : vector<8x1x128xf32> to vector<8x128xf32>
      %83 = tpu.concatenate %62, %82 in 1 : vector<8x128xf32>, vector<8x128xf32> -> vector<8x256xf32>
      %c0_38 = arith.constant 0 : index
      %c0_39 = arith.constant 0 : index
      %84 = vector.load %arg8[%c0_38, %c0_39] : memref<256x128xf32, #tpu.memory_space<vmem>>, vector<256x128xf32>
      %cst_40 = arith.constant dense<0.000000e+00> : vector<8x128xf32>
      %85 = tpu.matmul %83, %84, %cst_40 {dimension_numbers = #tpu.dot_dimension_numbers<[1], [0], [0], [1], [0, 0, 1, 1], [], []>} : vector<8x256xf32>, vector<256x128xf32>, vector<8x128xf32> -> vector<8x128xf32>
      %c0_41 = arith.constant 0 : index
      %c0_42 = arith.constant 0 : index
      %86 = vector.load %arg9[%c0_41, %c0_42] : memref<1x128xf32, #tpu.memory_space<vmem>>, vector<1x128xf32>
      %87 = vector.broadcast %86 : vector<1x128xf32> to vector<8x128xf32>
      %88 = arith.addf %85, %87 : vector<8x128xf32>
      %89 = math.tanh %88 : vector<8x128xf32>
      %c0_43 = arith.constant 0 : index
      %c0_44 = arith.constant 0 : index
      %90 = vector.load %arg14[%c0_43, %c0_44] : memref<8x128xf32, #tpu.memory_space<vmem>>, vector<8x128xf32>
      tpu.vector_store %arg14[%c0_43, %c0_44], %89 {strides = array<i32>} : memref<8x128xf32, #tpu.memory_space<vmem>>, vector<8x128xf32>,
    } else {
    }
    %c0 = arith.constant 0 : index
    %c0_1 = arith.constant 0 : index
    %3 = vector.load %arg14[%c0, %c0_1] : memref<8x128xf32, #tpu.memory_space<vmem>>, vector<8x128xf32>
    %4 = arith.truncf %3 : vector<8x128xf32> to vector<8x128xbf16>
    %c0_2 = arith.constant 0 : index
    %c0_3 = arith.constant 0 : index
    %5 = vector.load %arg10[%c0_2, %c0_3] : memref<128x128xbf16, #tpu.memory_space<vmem>>, vector<128x128xbf16>
    %cst = arith.constant dense<0.000000e+00> : vector<8x128xf32>
    %6 = tpu.matmul %4, %5, %cst {dimension_numbers = #tpu.dot_dimension_numbers<[1], [0], [0], [1], [0, 0, 1, 1], [], []>} : vector<8x128xbf16>, vector<128x128xbf16>, vector<8x128xf32> -> vector<8x128xf32>
    %c0_4 = arith.constant 0 : index
    %c0_5 = arith.constant 0 : index
    %7 = vector.load %arg11[%c0_4, %c0_5] : memref<1x128xf32, #tpu.memory_space<vmem>>, vector<1x128xf32>
    %8 = vector.broadcast %7 : vector<1x128xf32> to vector<8x128xf32>
    %9 = arith.addf %6, %8 : vector<8x128xf32>
    %10 = tpu.iota {dimensions = array<i32: 1>} : vector<8x128xi32>
    %c128_i32 = arith.constant 128 : i32
    %11 = arith.muli %arg0, %c128_i32 : i32
    %12 = vector.broadcast %11 : i32 to vector<8x128xi32>
    %13 = arith.addi %10, %12 : vector<8x128xi32>
    %c64_i32 = arith.constant 64 : i32
    %14 = vector.broadcast %c64_i32 : i32 to vector<8x128xi32>
    %15 = arith.cmpi slt, %13, %14 : vector<8x128xi32>
    %cst_6 = arith.constant -1.000000e+30 : f32
    %16 = vector.broadcast %cst_6 : f32 to vector<8x128xf32>
    %17 = arith.select %15, %9, %16 : vector<8x128xi1>, vector<8x128xf32>
    %c128_i32_7 = arith.constant 128 : i32
    %18 = arith.muli %arg0, %c128_i32_7 : i32
    %19 = tpu.assume_multiple %18, 128 : i32
    %c0_8 = arith.constant 0 : index
    %20 = arith.index_cast %19 : i32 to index
    %21 = vector.load %arg12[%c0_8, %20] : memref<8x128xf32, #tpu.memory_space<vmem>>, vector<8x128xf32>
    tpu.vector_store %arg12[%c0_8, %20], %17 {strides = array<i32>} : memref<8x128xf32, #tpu.memory_space<vmem>>, vector<8x128xf32>,
    %c0_i32_9 = arith.constant 0 : i32
    %22 = arith.cmpi eq, %arg0, %c0_i32_9 : i32
    %23 = arith.extui %22 : i1 to i32
    %c0_i32_10 = arith.constant 0 : i32
    %24 = arith.cmpi ne, %23, %c0_i32_10 : i32
    scf.if %24 {
      %c0_11 = arith.constant 0 : index
      %c0_12 = arith.constant 0 : index
      %25 = vector.load %arg12[%c0_11, %c0_12] : memref<8x128xf32, #tpu.memory_space<vmem>>, vector<8x128xf32>
      %cst_13 = arith.constant dense<0xFF800000> : vector<8xf32>
      %26 = vector.multi_reduction <maximumf>, %25, %cst_13 [1] : vector<8x128xf32> to vector<8xf32>
      %27 = vector.shape_cast %26 : vector<8xf32> to vector<8x1xf32>
      %28 = vector.broadcast %27 : vector<8x1xf32> to vector<8x128xf32>
      %29 = arith.subf %25, %28 : vector<8x128xf32>
      %30 = math.exp %29 : vector<8x128xf32>
      %cst_14 = arith.constant dense<0.000000e+00> : vector<8xf32>
      %31 = vector.multi_reduction <add>, %30, %cst_14 [1] : vector<8x128xf32> to vector<8xf32>
      %32 = vector.shape_cast %31 : vector<8xf32> to vector<8x1xf32>
      %33 = tpu.reciprocal %32 {approx = true} : vector<8x1xf32> -> vector<8x1xf32>
      %34 = arith.mulf %32, %33 : vector<8x1xf32>
      %cst_15 = arith.constant 2.000000e+00 : f32
      %35 = vector.broadcast %cst_15 : f32 to vector<8x1xf32>
      %36 = arith.subf %35, %34 : vector<8x1xf32>
      %37 = arith.mulf %33, %36 : vector<8x1xf32>
      %38 = vector.broadcast %37 : vector<8x1xf32> to vector<8x128xf32>
      %39 = arith.mulf %30, %38 : vector<8x128xf32>
      %c0_16 = arith.constant 0 : index
      %c0_17 = arith.constant 0 : index
      %40 = vector.load %arg12[%c0_16, %c0_17] : memref<8x128xf32, #tpu.memory_space<vmem>>, vector<8x128xf32>
      tpu.vector_store %arg12[%c0_16, %c0_17], %39 {strides = array<i32>} : memref<8x128xf32, #tpu.memory_space<vmem>>, vector<8x128xf32>,
    } else {
    }
    return
  }
  func.func @transform_0(%arg0: i32) -> (i32, i32) {
    %c0_i32 = arith.constant 0 : i32
    %c0_i32_0 = arith.constant 0 : i32
    %c0_i32_1 = arith.constant 0 : i32
    return %c0_i32, %c0_i32_0 : i32, i32
  }
  func.func @transform_1(%arg0: i32) -> (i32, i32) {
    %c0_i32 = arith.constant 0 : i32
    %c0_i32_0 = arith.constant 0 : i32
    %c0_i32_1 = arith.constant 0 : i32
    return %c0_i32, %c0_i32_0 : i32, i32
  }
  func.func @transform_2(%arg0: i32) -> (i32, i32, i32) {
    %c0_i32 = arith.constant 0 : i32
    %c0_i32_0 = arith.constant 0 : i32
    %c0_i32_1 = arith.constant 0 : i32
    %c0_i32_2 = arith.constant 0 : i32
    return %c0_i32, %c0_i32_0, %c0_i32_1 : i32, i32, i32
  }
  func.func @transform_3(%arg0: i32) -> (i32, i32) {
    %c0_i32 = arith.constant 0 : i32
    %c0_i32_0 = arith.constant 0 : i32
    %c0_i32_1 = arith.constant 0 : i32
    return %c0_i32, %c0_i32_0 : i32, i32
  }
  func.func @transform_4(%arg0: i32) -> (i32, i32) {
    %c0_i32 = arith.constant 0 : i32
    %c0_i32_0 = arith.constant 0 : i32
    %c0_i32_1 = arith.constant 0 : i32
    return %c0_i32, %c0_i32_0 : i32, i32
  }
  func.func @transform_5(%arg0: i32) -> (i32, i32) {
    %c0_i32 = arith.constant 0 : i32
    %c0_i32_0 = arith.constant 0 : i32
    %c0_i32_1 = arith.constant 0 : i32
    return %c0_i32, %c0_i32_0 : i32, i32
  }
  func.func @transform_6(%arg0: i32) -> (i32, i32) {
    %c0_i32 = arith.constant 0 : i32
    %c0_i32_0 = arith.constant 0 : i32
    %c0_i32_1 = arith.constant 0 : i32
    return %c0_i32, %c0_i32_0 : i32, i32
  }
  func.func @transform_7(%arg0: i32) -> (i32, i32) {
    %c0_i32 = arith.constant 0 : i32
    %c0_i32_0 = arith.constant 0 : i32
    %c0_i32_1 = arith.constant 0 : i32
    return %c0_i32, %c0_i32_0 : i32, i32
  }
  func.func @transform_8(%arg0: i32) -> (i32, i32) {
    %c0_i32 = arith.constant 0 : i32
    %c0_i32_0 = arith.constant 0 : i32
    %c0_i32_1 = arith.constant 0 : i32
    return %c0_i32, %c0_i32_0 : i32, i32
  }
  func.func @transform_9(%arg0: i32) -> (i32, i32) {
    %c0_i32 = arith.constant 0 : i32
    %c0_i32_0 = arith.constant 0 : i32
    return %c0_i32, %arg0 : i32, i32
  }
  func.func @transform_10(%arg0: i32) -> (i32, i32) {
    %c0_i32 = arith.constant 0 : i32
    %c0_i32_0 = arith.constant 0 : i32
    return %c0_i32, %arg0 : i32, i32
  }
  func.func @transform_11(%arg0: i32) -> (i32, i32) {
    %c0_i32 = arith.constant 0 : i32
    %c0_i32_0 = arith.constant 0 : i32
    %c0_i32_1 = arith.constant 0 : i32
    return %c0_i32, %c0_i32_0 : i32, i32
  }
  func.func @transform_12(%arg0: i32) -> (i32, i32) {
    %c0_i32 = arith.constant 0 : i32
    %c0_i32_0 = arith.constant 0 : i32
    %c0_i32_1 = arith.constant 0 : i32
    return %c0_i32, %c0_i32_0 : i32, i32
  }
}

</mosaic_0001>

<bundles_post_ra>
// kernel: tpu_custom_call.1
= control target key start
LH: loop header
LB: loop body
LE: loop exit
PB: predicated region body
PF: predicated region fallthrough
CT: control target
= control target key end

     0   :  { %18 = vsyncpa [#allocation4], 0  ;;  %s3348_s0 = inlined_call_operand.hbm [shape: f32[8,128], index: 0, kind: input, shape index: {}]   ;;  %s3349_s1 = inlined_call_operand.hbm [shape: f32[8,128], index: 1, kind: input, shape index: {}]   ;;  %s3350_s2 = inlined_call_operand.hbm [shape: f32[8,8,128], index: 2, kind: input, shape index: {}]   ;;  %s3351_s3 = inlined_call_operand.hbm [shape: f32[128,384], index: 3, kind: input, shape index: {}]   ;;  %s3352_s4 = inlined_call_operand.hbm [shape: f32[128,384], index: 4, kind: input, shape index: {}]   ;;  %s3353_s5 = inlined_call_operand.vmem [shape: f32[1,384], index: 5, kind: input, shape index: {}]   ;;  %s3354_s6 = inlined_call_operand.vmem [shape: f32[1,384], index: 6, kind: input, shape index: {}]   ;;  %s3355_s7 = inlined_call_operand.hbm [shape: f32[256,128], index: 7, kind: input, shape index: {}]   ;;  %s3356_s8 = inlined_call_operand.vmem [shape: f32[1,128], index: 8, kind: input, shape index: {}]   ;;  %s3357_s9 = inlined_call_operand.hbm [shape: bf16[128,128], index: 9, kind: input, shape index: {}]   ;;  %s3358_s10 = inlined_call_operand.vmem [shape: f32[1,128], index: 10, kind: input, shape index: {}]   ;;  %s3359_s11 = inlined_call_operand.hbm [shape: f32[8,128], index: 11, kind: output, shape index: {0}]   ;;  %s3360_s12 = inlined_call_operand.hbm [shape: f32[8,128], index: 12, kind: output, shape index: {1}]  }
   0x1   :  { %19 = vsyncpa [#allocation7], 0 }
   0x2   :  { %20 = vsyncpa [#allocation10], 0 }
   0x3   :  { %21 = vsyncpa [#allocation13], 0 }
   0x4   :  { %22 = vsyncpa [#allocation5], 0 }
   0x5   :  { %23 = vsyncpa [#allocation17], 0  ;;  %s2948_s21 = smov [#allocation6]   ;;  %s2949_s23 = smov [#allocation9]  }
   0x6   :  { %s40_s22 = sshll.u32 %s2948_s21, 4  ;;  %s61_s24 = sshll.u32 %s2949_s23, 4  ;;  %s41_s22 = int_to_ptr.vmem [resolvable:$true] %s40_s22  ;;  %s3032_s24 = int_to_ptr.vmem [resolvable:$true] %s61_s24 }
   0x7   :  { %s2738_s27 = scalar_lea.hbm %s3349_s1, 128 }
   0x8   :  { %p2739_p0 = scmp.ne.s32.totalorder %s3349_s1, %s2738_s27  ;;  %p2742_p1 = scmp.lt.u32.totalorder %s2738_s27, %s3349_s1 }
   0xa   :  { %p2744_p2 = pnand %p2742_p1, %p2739_p0 }
   0xc   :  { %2747 = shalt.err (!%p2744_p2)
}
   0xd   :  { %s2748_s14 = scalar_lea.vmem %s41_s22, 128  ;;  %p2753_p4 = scmp.lt.s32.totalorder %s41_s22, %s41_s22 }
   0xe   :  { %p2749_p3 = scmp.ne.s32.totalorder %s41_s22, %s2748_s14  ;;  %p2754_p5 = scmp.lt.s32.totalorder %s2748_s14, %s2748_s14 }
  0x10   :  { %p2755_p6 = por %p2754_p5, %p2753_p4 }
  0x12   :  { %p2756_p7 = pnand %p2755_p6, %p2749_p3 }
  0x14   :  { %2759 = shalt.err (!%p2756_p7)
}
  0x15   :  { %43 = dma.hbm_to_vmem [thread:$0]  %s3349_s1, 128, %s41_s22, [#allocation7]  }
  0x16   :  { %s2760_s19 = scalar_lea.hbm %s3351_s3, 6144 }
  0x17   :  { %p2761_p8 = scmp.ne.s32.totalorder %s3351_s3, %s2760_s19  ;;  %p2764_p9 = scmp.lt.u32.totalorder %s2760_s19, %s3351_s3 }
  0x19   :  { %p2766_p10 = pnand %p2764_p9, %p2761_p8 }
  0x1b   :  { %2769 = shalt.err (!%p2766_p10)
}
  0x1c   :  { %s2770_s26 = scalar_lea.vmem %s3032_s24, 6144  ;;  %p2775_p12 = scmp.lt.s32.totalorder %s3032_s24, %s3032_s24 }
  0x1d   :  { %p2771_p11 = scmp.ne.s32.totalorder %s3032_s24, %s2770_s26  ;;  %p2776_p13 = scmp.lt.s32.totalorder %s2770_s26, %s2770_s26 }
  0x1f   :  { %p2777_p0 = por %p2776_p13, %p2775_p12 }
  0x21   :  { %p2778_p1 = pnand %p2777_p0, %p2771_p11 }
  0x23   :  { %2781 = shalt.err (!%p2778_p1)
}
  0x24   :  { %s2950_s1 = smov 384   ;;  %s2951_s22 = smov 24  }
  0x25   :  { %67 = dma.hbm_to_vmem [thread:$0]  %s3351_s3, 6144, %s3032_s24, [#allocation10], %s2950_s1, %s2950_s1, %s2951_s22  }
  0x26   :  { %s2952_s29 = smov [#allocation12]   ;;  %s2953_s13 = smov [#allocation3]  }
  0x27   :  { %s89_s30 = sshll.u32 %s2952_s29, 4  ;;  %s30_s14 = sshll.u32 %s2953_s13, 4  ;;  %s90_s30 = int_to_ptr.vmem [resolvable:$true] %s89_s30  ;;  %s31_s14 = int_to_ptr.vmem [resolvable:$true] %s30_s14 }
  0x28   :  { %s2782_s17 = scalar_lea.hbm %s3355_s7, 4096 }
  0x29   :  { %p2783_p2 = scmp.ne.s32.totalorder %s3355_s7, %s2782_s17  ;;  %p2786_p3 = scmp.lt.u32.totalorder %s2782_s17, %s3355_s7 }
  0x2b   :  { %p2788_p4 = pnand %p2786_p3, %p2783_p2 }
  0x2d   :  { %2791 = shalt.err (!%p2788_p4)
}
  0x2e   :  { %s2792_s3 = scalar_lea.vmem %s90_s30, 4096  ;;  %p2797_p6 = scmp.lt.s32.totalorder %s90_s30, %s90_s30 }
  0x2f   :  { %p2793_p5 = scmp.ne.s32.totalorder %s90_s30, %s2792_s3  ;;  %p2798_p7 = scmp.lt.s32.totalorder %s2792_s3, %s2792_s3 }
  0x31   :  { %p2799_p8 = por %p2798_p7, %p2797_p6 }
  0x33   :  { %p2800_p9 = pnand %p2799_p8, %p2793_p5 }
  0x35   :  { %2803 = shalt.err (!%p2800_p9)
}
  0x36   :  { %s2954_s24 = smov 128   ;;  %s2955_s23 = smov 8  }
  0x37   :  { %95 = dma.hbm_to_vmem [thread:$0]  %s3355_s7, 4096, %s90_s30, [#allocation13], %s2954_s24, %s2954_s24, %s2955_s23  }
  0x38   :  { %s2804_s29 = scalar_lea.hbm %s3348_s0, 128 }
  0x39   :  { %p2805_p10 = scmp.ne.s32.totalorder %s3348_s0, %s2804_s29  ;;  %p2808_p11 = scmp.lt.u32.totalorder %s2804_s29, %s3348_s0 }
  0x3b   :  { %p2810_p12 = pnand %p2808_p11, %p2805_p10 }
  0x3d   :  { %2813 = shalt.err (!%p2810_p12)
}
  0x3e   :  { %s2814_s18 = scalar_lea.vmem %s31_s14, 128  ;;  %p2819_p0 = scmp.lt.s32.totalorder %s31_s14, %s31_s14 }
  0x3f   :  { %p2815_p13 = scmp.ne.s32.totalorder %s31_s14, %s2814_s18  ;;  %p2820_p1 = scmp.lt.s32.totalorder %s2814_s18, %s2814_s18 }
  0x41   :  { %p2821_p2 = por %p2820_p1, %p2819_p0 }
  0x43   :  { %p2822_p3 = pnand %p2821_p2, %p2815_p13 }
  0x45   :  { %2825 = shalt.err (!%p2822_p3)
}
  0x46   :  { %33 = dma.hbm_to_vmem [thread:$0]  %s3348_s0, 128, %s31_s14, [#allocation4]  }
  0x47   :  { %s2956_s19 = smov [#allocation8]   ;;  %s2957_s21 = smov [#allocation11]  }
  0x48   :  { %s49_s20 = sshll.u32 %s2956_s19, 4  ;;  %s73_s3 = sshll.u32 %s2957_s21, 4  ;;  %s50_s20 = int_to_ptr.vmem [resolvable:$true] %s49_s20  ;;  %s3093_s3 = int_to_ptr.vmem [resolvable:$true] %s73_s3 }
  0x49   :  { %s2826_s27 = scalar_lea.hbm %s3350_s2, 1024 }
  0x4a   :  { %p2827_p4 = scmp.ne.s32.totalorder %s3350_s2, %s2826_s27  ;;  %p2830_p5 = scmp.lt.u32.totalorder %s2826_s27, %s3350_s2 }
  0x4c   :  { %p2832_p6 = pnand %p2830_p5, %p2827_p4 }
  0x4e   :  { %2835 = shalt.err (!%p2832_p6)
}
  0x4f   :  { %s2836_s0 = scalar_lea.vmem %s50_s20, 1024  ;;  %p2841_p8 = scmp.lt.s32.totalorder %s50_s20, %s50_s20 }
  0x50   :  { %p2837_p7 = scmp.ne.s32.totalorder %s50_s20, %s2836_s0  ;;  %p2842_p9 = scmp.lt.s32.totalorder %s2836_s0, %s2836_s0 }
  0x52   :  { %p2843_p10 = por %p2842_p9, %p2841_p8 }
  0x54   :  { %p2844_p11 = pnand %p2843_p10, %p2837_p7 }
  0x56   :  { %2847 = shalt.err (!%p2844_p11)
}
  0x57   :  { %55 = dma.hbm_to_vmem [thread:$0]  %s3350_s2, 1024, %s50_s20, [#allocation7], %s2954_s24, %s2954_s24, %s2955_s23  }
  0x58   :  { %s2848_s7 = scalar_lea.hbm %s3352_s4, 6144 }
  0x59   :  { %p2849_p12 = scmp.ne.s32.totalorder %s3352_s4, %s2848_s7  ;;  %p2852_p13 = scmp.lt.u32.totalorder %s2848_s7, %s3352_s4 }
  0x5b   :  { %p2854_p0 = pnand %p2852_p13, %p2849_p12 }
  0x5d   :  { %2857 = shalt.err (!%p2854_p0)
}
  0x5e   :  { %s2858_s26 = scalar_lea.vmem %s3093_s3, 6144  ;;  %p2863_p2 = scmp.lt.s32.totalorder %s3093_s3, %s3093_s3 }
  0x5f   :  { %p2859_p1 = scmp.ne.s32.totalorder %s3093_s3, %s2858_s26  ;;  %p2864_p3 = scmp.lt.s32.totalorder %s2858_s26, %s2858_s26 }
  0x61   :  { %p2865_p4 = por %p2864_p3, %p2863_p2 }
  0x63   :  { %p2866_p5 = pnand %p2865_p4, %p2859_p1 }
  0x65   :  { %2869 = shalt.err (!%p2866_p5)
}
  0x66   :  { %79 = dma.hbm_to_vmem [thread:$0]  %s3352_s4, 6144, %s3093_s3, [#allocation10], %s2950_s1, %s2950_s1, %s2951_s22  }
  0x67   :  { %s2958_s23 = smov [#allocation14]   ;;  %s2870_s29 = scalar_lea.hbm %s3357_s9, 1024 }
  0x68   :  { %s103_s20 = sshll.u32 %s2958_s23, 4  ;;  %p2871_p6 = scmp.ne.s32.totalorder %s3357_s9, %s2870_s29  ;;  %s104_s20 = int_to_ptr.vmem [resolvable:$true] %s103_s20 }
  0x69   :  { %p2874_p7 = scmp.lt.u32.totalorder %s2870_s29, %s3357_s9 }
  0x6b   :  { %p2876_p8 = pnand %p2874_p7, %p2871_p6 }
  0x6d   :  { %2879 = shalt.err (!%p2876_p8)
}
  0x6e   :  { %s2880_s16 = scalar_lea.vmem %s104_s20, 1024  ;;  %p2885_p10 = scmp.lt.s32.totalorder %s104_s20, %s104_s20 }
  0x6f   :  { %p2881_p9 = scmp.ne.s32.totalorder %s104_s20, %s2880_s16  ;;  %p2886_p11 = scmp.lt.s32.totalorder %s2880_s16, %s2880_s16 }
  0x71   :  { %p2887_p12 = por %p2886_p11, %p2885_p10 }
  0x73   :  { %p2888_p13 = pnand %p2887_p12, %p2881_p9 }
  0x75   :  { %2891 = shalt.err (!%p2888_p13)
}
  0x76   :  { %s2959_s4 = smov 64   ;;  %s2960_s1 = smov 4  }
  0x77   :  { %109 = dma.hbm_to_vmem [thread:$0]  %s3357_s9, 1024, %s104_s20, [#allocation13], %s2959_s4, %s2959_s4, %s2960_s1  }
  0x78   :  { %2936 = dma.done.wait [#allocation4], 128  }
  0x79   :  { %2937 = vsyncadd [#allocation4], 4294967168 }
  0x7a   :  { %2938 = dma.done.wait [#allocation7], 1152  }
  0x7b   :  { %2939 = vsyncadd [#allocation7], 4294966144 }
  0x7c   :  { %2940 = dma.done.wait [#allocation10], 12288  }
  0x7d   :  { %2941 = vsyncadd [#allocation10], 4294955008 }
  0x7e   :  { %2942 = dma.done.wait [#allocation13], 5120  }
  0x7f   :  { %2943 = vsyncadd [#allocation13], 4294962176  ;;  %v2961_v0 = vmov 0.0|0.0   ;;  %v2962_v1 = vmov 0.0   ;;  %vm2963_vm0 = vmmov 0   ;;  %v141_v2 = vld [vmem:[#allocation9 + $0x8] sm:$0xff] }
  0x80   :  { %2545 = vmatprep.subr.bf16.mxu1 %v2961_v0  ;;  %269 = vmatprep.mubr.f32.mxu0 %v2962_v1  ;;  %v144_v3 = vld [vmem:[#allocation9 + $0x20] sm:$0xff]  ;;  %v143_v6 = vld [vmem:[#allocation9 + $0x18] sm:$0xff]  ;;  %v150_v8 = vld [vmem:[#allocation9 + $0x50] sm:$0xff]  ;;  %vm1200_vm1 = vcmask 57344   ;;  %vm1313_vm2 = vcmask 64512   ;;  %vm1907_vm3 = vcmask 1041409  }
  0x81   :  { %2375 = vmatprep.mubr.msk.f32.mxu1 %vm2963_vm0, %v2962_v1  ;;  %v140_v4 = vld [vmem:[#allocation9] sm:$0xff]  ;;  %v2513_v5 = vpack.c.bf16 %v144_v3, %v141_v2  ;;  %v147_v7 = vld [vmem:[#allocation9 + $0x38] sm:$0xff]  ;;  %v146_v11 = vld [vmem:[#allocation9 + $0x30] sm:$0xff]  ;;  %vm1910_vm4 = vcmask 1042434   ;;  %vm1913_vm5 = vcmask 1043459   ;;  %vm1916_vm6 = vcmask 1044484  }
  0x82   :  { %v2515_v9 = vpack.c.bf16 %v143_v6, %v140_v4  ;;  %v2517_v10 = vpack.c.bf16 %v150_v8, %v147_v7  ;;  %v149_v12 = vld [vmem:[#allocation9 + $0x48] sm:$0xff]  ;;  %v156_v14 = vld [vmem:[#allocation9 + $0x80] sm:$0xff]  ;;  %v155_v18 = vld [vmem:[#allocation9 + $0x78] sm:$0xff]  ;;  %vm1919_vm7 = vcmask 1045509   ;;  %vm1922_vm8 = vcmask 1046534  }
  0x83   :  { %v153_v13 = vld [vmem:[#allocation9 + $0x68] sm:$0xff]  ;;  %2514 = vmatprep.subr.bf16.mxu0 %v2513_v5  ;;  %v2519_v15 = vpack.c.bf16 %v149_v12, %v146_v11  ;;  %v152_v17 = vld [vmem:[#allocation9 + $0x60] sm:$0xff]  ;;  %v159_v19 = vld [vmem:[#allocation9 + $0x98] sm:$0xff]  ;;  %vm1925_vm9 = vcmask 1047559  }
  0x84   :  { %2516 = vmatpush1.bf16.msra.mxu0 %v2515_v9  ;;  %v2521_v16 = vpack.c.bf16 %v156_v14, %v153_v13  ;;  %v162_v20 = vld [vmem:[#allocation9 + $0xb0] sm:$0xff]  ;;  %v2523_v21 = vpack.c.bf16 %v155_v18, %v152_v17  ;;  %v161_v24 = vld [vmem:[#allocation9 + $0xa8] sm:$0xff]  ;;  %v168_v28 = vld [vmem:[#allocation9 + $0xe0] sm:$0xff] }
  0x85   :  { %2518 = vmatprep.subr.bf16.mxu0 %v2517_v10  ;;  %v158_v22 = vld [vmem:[#allocation9 + $0x90] sm:$0xff]  ;;  %v2525_v23 = vpack.c.bf16 %v162_v20, %v159_v19  ;;  %v145_v26 = vld [vmem:[#allocation9 + $0x28] sm:$0xff]  ;;  %v148_v30 = vld [vmem:[#allocation9 + $0x40] sm:$0xff] }
  0x86   :  { %v142_v25 = vld [vmem:[#allocation9 + $0x10] sm:$0xff]  ;;  %v165_v27 = vld [vmem:[#allocation9 + $0xc8] sm:$0xff]  ;;  %v151_v31 = vld [vmem:[#allocation9 + $0x58] sm:$0xff]  ;;  %v2527_v32 = vpack.c.bf16 %v161_v24, %v158_v22 }
  0x87   :  { %v2546_v29 = vpack.c.bf16 %v145_v26, %v142_v25  ;;  %v2549_v33 = vpack.c.bf16 %v151_v31, %v148_v30  ;;  %v2529_v34 = vpack.c.bf16 %v168_v28, %v165_v27  ;;  %v164_v35 = vld [vmem:[#allocation9 + $0xc0] sm:$0xff]  ;;  %v167_v36 = vld [vmem:[#allocation9 + $0xd8] sm:$0xff]  ;;  %v154_v37 = vld [vmem:[#allocation9 + $0x70] sm:$0xff] }
  0x88   :  { %2520 = vmatpush1.bf16.msra.mxu0 %v2519_v15  ;;  %v171_v38 = vld [vmem:[#allocation9 + $0xf8] sm:$0xff]  ;;  %v174_v39 = vld [vmem:[#allocation9 + $0x110] sm:$0xff]  ;;  %v157_v40 = vld [vmem:[#allocation9 + $0x88] sm:$0xff]  ;;  %v2531_v41 = vpack.c.bf16 %v167_v36, %v164_v35 }
  0x89   :  { %2522 = vmatprep.subr.bf16.mxu0 %v2521_v16  ;;  %2547 = vmatpush3.bf16.msra.mxu1 %v2546_v29  ;;  %v170_v42 = vld [vmem:[#allocation9 + $0xf0] sm:$0xff]  ;;  %v2552_v43 = vpack.c.bf16 %v157_v40, %v154_v37  ;;  %v2533_v44 = vpack.c.bf16 %v174_v39, %v171_v38  ;;  %v173_v45 = vld [vmem:[#allocation9 + $0x108] sm:$0xff]  ;;  %v160_v46 = vld [vmem:[#allocation9 + $0xa0] sm:$0xff] }
  0x8a   :  { %2548 = vmatprep.subr.bf16.mxu1 %v2961_v0  ;;  %v163_v47 = vld [vmem:[#allocation9 + $0xb8] sm:$0xff]  ;;  %v177_v48 = vld [vmem:[#allocation9 + $0x128] sm:$0xff]  ;;  %v180_v49 = vld [vmem:[#allocation9 + $0x140] sm:$0xff]  ;;  %v2535_v50 = vpack.c.bf16 %v173_v45, %v170_v42 }
  0x8b   :  { %v176_v51 = vld [vmem:[#allocation9 + $0x120] sm:$0xff]  ;;  %v2555_v52 = vpack.c.bf16 %v163_v47, %v160_v46  ;;  %v2537_v53 = vpack.c.bf16 %v180_v49, %v177_v48  ;;  %v179_v54 = vld [vmem:[#allocation9 + $0x138] sm:$0xff]  ;;  %v166_v55 = vld [vmem:[#allocation9 + $0xd0] sm:$0xff] }
  0x8c   :  { %2524 = vmatpush1.bf16.msra.mxu0 %v2523_v21  ;;  %v169_v56 = vld [vmem:[#allocation9 + $0xe8] sm:$0xff]  ;;  %v183_v57 = vld [vmem:[#allocation9 + $0x158] sm:$0xff]  ;;  %v186_v58 = vld [vmem:[#allocation9 + $0x170] sm:$0xff]  ;;  %v2539_v59 = vpack.c.bf16 %v179_v54, %v176_v51 }
  0x8d   :  { %2526 = vmatprep.subr.bf16.mxu0 %v2525_v23  ;;  %2550 = vmatpush3.bf16.msra.mxu1 %v2549_v33  ;;  %v182_v60 = vld [vmem:[#allocation9 + $0x150] sm:$0xff]  ;;  %v2558_v61 = vpack.c.bf16 %v169_v56, %v166_v55  ;;  %v2541_v62 = vpack.c.bf16 %v186_v58, %v183_v57  ;;  %v185_v63 = vld [vmem:[#allocation9 + $0x168] sm:$0xff]  ;;  %v172_v2 = vld [vmem:[#allocation9 + $0x100] sm:$0xff] }
  0x8e   :  { %2551 = vmatprep.subr.bf16.mxu1 %v2961_v0  ;;  %v175_v3 = vld [vmem:[#allocation9 + $0x118] sm:$0xff]  ;;  %v347_v4 = vld [vmem:[#allocation11 + $0x8] sm:$0xff]  ;;  %v350_v5 = vld [vmem:[#allocation11 + $0x20] sm:$0xff]  ;;  %v2543_v6 = vpack.c.bf16 %v185_v63, %v182_v60 }
  0x8f   :  { %v346_v7 = vld [vmem:[#allocation11] sm:$0xff]  ;;  %v2561_v8 = vpack.c.bf16 %v175_v3, %v172_v2  ;;  %v2569_v9 = vpack.c.bf16 %v350_v5, %v347_v4  ;;  %v349_v10 = vld [vmem:[#allocation11 + $0x18] sm:$0xff]  ;;  %v178_v11 = vld [vmem:[#allocation9 + $0x130] sm:$0xff] }
  0x90   :  { %2528 = vmatpush1.bf16.msra.mxu0 %v2527_v32  ;;  %v181_v12 = vld [vmem:[#allocation9 + $0x148] sm:$0xff]  ;;  %v353_v13 = vld [vmem:[#allocation11 + $0x38] sm:$0xff]  ;;  %v356_v14 = vld [vmem:[#allocation11 + $0x50] sm:$0xff]  ;;  %v2571_v18 = vpack.c.bf16 %v349_v10, %v346_v7 }
  0x91   :  { %2530 = vmatprep.subr.bf16.mxu0 %v2529_v34  ;;  %2553 = vmatpush3.bf16.msra.mxu1 %v2552_v43  ;;  %v138_v15 = vld [vmem:[#allocation3] sm:$0xff]  ;;  %v355_v17 = vld [vmem:[#allocation11 + $0x48] sm:$0xff]  ;;  %v362_v20 = vld [vmem:[#allocation11 + $0x80] sm:$0xff]  ;;  %v2564_v21 = vpack.c.bf16 %v181_v12, %v178_v11  ;;  %v2573_v24 = vpack.c.bf16 %v356_v14, %v353_v13 }
  0x92   :  { %2554 = vmatprep.subr.bf16.mxu1 %v2961_v0  ;;  %v352_v16 = vld [vmem:[#allocation11 + $0x30] sm:$0xff]  ;;  %v359_v19 = vld [vmem:[#allocation11 + $0x68] sm:$0xff]  ;;  %v184_v22 = vld [vmem:[#allocation9 + $0x160] sm:$0xff] }
  0x93   :  { %v187_v23 = vld [vmem:[#allocation9 + $0x178] sm:$0xff]  ;;  %v358_v25 = vld [vmem:[#allocation11 + $0x60] sm:$0xff]  ;;  %v348_v27 = vld [vmem:[#allocation11 + $0x10] sm:$0xff]  ;;  %v2575_v29 = vpack.c.bf16 %v355_v17, %v352_v16  ;;  %v2577_v31 = vpack.c.bf16 %v362_v20, %v359_v19 }
  0x94   :  { %2532 = vmatpush1.bf16.msra.mxu0 %v2531_v41  ;;  %v361_v26 = vld [vmem:[#allocation11 + $0x78] sm:$0xff]  ;;  %v351_v28 = vld [vmem:[#allocation11 + $0x28] sm:$0xff]  ;;  %v2567_v30 = vpack.c.bf16 %v187_v23, %v184_v22  ;;  %v368_v33 = vld [vmem:[#allocation11 + $0xb0] sm:$0xff] }
  0x95   :  { %2534 = vmatprep.subr.bf16.mxu0 %v2533_v44  ;;  %2556 = vmatpush3.bf16.msra.mxu1 %v2555_v52  ;;  %v365_v32 = vld [vmem:[#allocation11 + $0x98] sm:$0xff]  ;;  %v2579_v34 = vpack.c.bf16 %v361_v26, %v358_v25  ;;  %v364_v35 = vld [vmem:[#allocation11 + $0x90] sm:$0xff]  ;;  %v2602_v36 = vpack.c.bf16 %v351_v28, %v348_v27  ;;  %v367_v38 = vld [vmem:[#allocation11 + $0xa8] sm:$0xff]  ;;  %v190_v27 = vlaneseq }
  0x96   :  { %2557 = vmatprep.subr.bf16.mxu1 %v2961_v0  ;;  %v2581_v37 = vpack.c.bf16 %v368_v33, %v365_v32  ;;  %v354_v39 = vld [vmem:[#allocation11 + $0x40] sm:$0xff]  ;;  %v357_v40 = vld [vmem:[#allocation11 + $0x58] sm:$0xff]  ;;  %v371_v41 = vld [vmem:[#allocation11 + $0xc8] sm:$0xff]  ;;  %v2583_v43 = vpack.c.bf16 %v367_v38, %v364_v35 }
  0x97   :  { %v374_v42 = vld [vmem:[#allocation11 + $0xe0] sm:$0xff]  ;;  %v2605_v45 = vpack.c.bf16 %v357_v40, %v354_v39  ;;  %v373_v47 = vld [vmem:[#allocation11 + $0xd8] sm:$0xff]  ;;  %v360_v48 = vld [vmem:[#allocation11 + $0x70] sm:$0xff]  ;;  %v191_v28 = vshrl.u32 %v190_v27, 7 }
  0x98   :  { %2536 = vmatpush1.bf16.msra.mxu0 %v2535_v50  ;;  %v370_v44 = vld [vmem:[#allocation11 + $0xc0] sm:$0xff]  ;;  %v2585_v46 = vpack.c.bf16 %v374_v42, %v371_v41  ;;  %v363_v49 = vld [vmem:[#allocation11 + $0x88] sm:$0xff]  ;;  %v377_v50 = vld [vmem:[#allocation11 + $0xf8] sm:$0xff] }
  0x99   :  { %2538 = vmatprep.subr.bf16.mxu0 %v2537_v53  ;;  %2559 = vmatpush3.bf16.msra.mxu1 %v2558_v61  ;;  %v380_v51 = vld [vmem:[#allocation11 + $0x110] sm:$0xff]  ;;  %v2587_v52 = vpack.c.bf16 %v373_v47, %v370_v44  ;;  %v2608_v54 = vpack.c.bf16 %v363_v49, %v360_v48  ;;  %v379_v56 = vld [vmem:[#allocation11 + $0x108] sm:$0xff]  ;;  %v366_v57 = vld [vmem:[#allocation11 + $0xa0] sm:$0xff]  ;;  %v196_v32 = vsub.s32 1, %v191_v28  ;;  %v200_v49 = vsub.s32 2, %v191_v28 }
  0x9a   :  { %2560 = vmatprep.subr.bf16.mxu1 %v2961_v0  ;;  %v376_v53 = vld [vmem:[#allocation11 + $0xf0] sm:$0xff]  ;;  %v2589_v55 = vpack.c.bf16 %v380_v51, %v377_v50  ;;  %v369_v58 = vld [vmem:[#allocation11 + $0xb8] sm:$0xff]  ;;  %v386_v60 = vld [vmem:[#allocation11 + $0x140] sm:$0xff] }
  0x9b   :  { %v2591_v61 = vpack.c.bf16 %v379_v56, %v376_v53  ;;  %v2611_v63 = vpack.c.bf16 %v369_v58, %v366_v57  ;;  %v385_v3 = vld [vmem:[#allocation11 + $0x138] sm:$0xff]  ;;  %v372_v4 = vld [vmem:[#allocation11 + $0xd0] sm:$0xff]  ;;  %v375_v5 = vld [vmem:[#allocation11 + $0xe8] sm:$0xff] }
  0x9c   :  { %2540 = vmatpush1.bf16.msra.mxu0 %v2539_v59  ;;  %v383_v59 = vld [vmem:[#allocation11 + $0x128] sm:$0xff]  ;;  %v392_v7 = vld [vmem:[#allocation11 + $0x170] sm:$0xff]  ;;  %v2614_v10 = vpack.c.bf16 %v375_v5, %v372_v4  ;;  %v378_v13 = vld [vmem:[#allocation11 + $0x100] sm:$0xff] }
  0x9d   :  { %2542 = vmatprep.subr.bf16.mxu0 %v2541_v62  ;;  %2562 = vmatpush3.bf16.msra.mxu1 %v2561_v8  ;;  %v382_v62 = vld [vmem:[#allocation11 + $0x120] sm:$0xff]  ;;  %v2593_v2 = vpack.c.bf16 %v386_v60, %v383_v59  ;;  %v391_v12 = vld [vmem:[#allocation11 + $0x168] sm:$0xff]  ;;  %v381_v14 = vld [vmem:[#allocation11 + $0x118] sm:$0xff]  ;;  %v2964_v59 = vmov 1966171168  }
  0x9e   :  { %2563 = vmatprep.subr.bf16.mxu1 %v2961_v0  ;;  %v2595_v8 = vpack.c.bf16 %v385_v3, %v382_v62  ;;  %v2617_v16 = vpack.c.bf16 %v381_v14, %v378_v13  ;;  %v384_v17 = vld [vmem:[#allocation11 + $0x130] sm:$0xff]  ;;  %v3162_v19 = vld [vmem:[#allocation6] sm:$0xff]  ;;  %v3176_v25 = vld [vmem:[#allocation8 + $0x8] sm:$0xff]  ;;  %v585_v60 = vunpack.c.l.s4 %v2964_v59 }
  0x9f   :  { %v393_v22 = vld [vmem:[#allocation11 + $0x178] sm:$0xff] }
  0xa0   :  { %2544 = vmatpush1.bf16.msra.mxu0 %v2543_v6  ;;  %v389_v6 = vld [vmem:[#allocation11 + $0x158] sm:$0xff]  ;;  %v586_v62 = vunpack.c.0.s8 %v585_v60 }
  0xa1   :  { %2570 = vmatprep.subr.bf16.mxu0 %v2569_v9  ;;  %2565 = vmatpush3.bf16.msra.mxu1 %v2564_v21  ;;  %v388_v9 = vld [vmem:[#allocation11 + $0x150] sm:$0xff]  ;;  %v2597_v11 = vpack.c.bf16 %v392_v7, %v389_v6  ;;  %v390_v21 = vld [vmem:[#allocation11 + $0x160] sm:$0xff]  ;;  %v3198_v13 = vld [vmem:[#allocation8 + $0x18] sm:$0xff] }
  0xa2   :  { %2566 = vmatprep.subr.bf16.mxu1 %v2961_v0  ;;  %v2623_v23 = vpack.c.bf16 %v393_v22, %v390_v21  ;;  %v589_v3 = vsub.s32 %v586_v62, %v191_v28  ;;  %v3216_v21 = vld [vmem:[#allocation8 + $0x30] sm:$0xff] }
  0xa3   :  { %270 = vmatmul.mubr.f32.vlgmr.msra.gmra.mrb[0].mxu0 %v138_v15 }
  0xa4   :  { %2572 = vmatpush1.bf16.msra.mxu0 %v2571_v18  ;;  %475 = vmatprep.mubr.f32.mxu0 %v2962_v1  ;;  %v387_v18 = vld [vmem:[#allocation11 + $0x148] sm:$0xff] }
  0xa5   :  { %2574 = vmatprep.subr.bf16.mxu0 %v2573_v24  ;;  %2568 = vmatpush3.bf16.msra.mxu1 %v2567_v30  ;;  %v2620_v20 = vpack.c.bf16 %v387_v18, %v384_v17  ;;  %v3174_v24 = vld [vmem:[#allocation8] sm:$0xff]  ;;  %v394_v30 = vld [vmem:[%s3354_s6] sm:$0x7]  ;;  %v3210_v18 = vld [vmem:[#allocation8 + $0x28] sm:$0xff] }
  0xa6   :  { %2601 = vmatprep.subr.bf16.mxu1 %v2961_v0  ;;  %v407_v50 = vrot.slane %v394_v30, %v200_v49 }
  0xa8   :  { %2576 = vmatpush1.bf16.msra.mxu0 %v2575_v29  ;;  %2376 = vmatmul.mubr.f32.vlgmr.msra.gmra.mrb[0].mxu1 %v138_v15  ;;  %v2599_v15 = vpack.c.bf16 %v391_v12, %v388_v9  ;;  %v192_v29 = vsub.s32 0, %v191_v28 }
  0xa9   :  { %2578 = vmatprep.subr.bf16.mxu0 %v2577_v31  ;;  %2603 = vmatpush3.bf16.msra.mxu1 %v2602_v36  ;;  %v188_v31 = vld [vmem:[%s3353_s5] sm:$0x7]  ;;  %v403_v36 = vrot.slane %v394_v30, %v196_v32 }
  0xaa   :  { %2604 = vmatprep.subr.bf16.mxu1 %v2961_v0  ;;  %2410 = vmatprep.mubr.msk.f32.mxu1 %vm2963_vm0, %v2962_v1  ;;  %v193_v33 = vrot.slane %v188_v31, %v192_v29  ;;  %v197_v35 = vrot.slane %v188_v31, %v196_v32 }
  0xac   :  { %2580 = vmatpush1.bf16.msra.mxu0 %v2579_v34  ;;  %v399_v34 = vrot.slane %v394_v30, %v192_v29  ;;  %v2659_v39 = vadd.f32 %v403_v36, %v197_v35 }
  0xad   :  { %2582 = vmatprep.subr.bf16.mxu0 %v2581_v37  ;;  %2606 = vmatpush3.bf16.msra.mxu1 %v2605_v45 }
  0xae   :  { %2607 = vmatprep.subr.bf16.mxu1 %v2961_v0  ;;  %v2657_v37 = vadd.f32 %v399_v34, %v193_v33 }
  0xb0   :  { %2584 = vmatpush1.bf16.msra.mxu0 %v2583_v43 }
  0xb1   :  { %2586 = vmatprep.subr.bf16.mxu0 %v2585_v46  ;;  %2609 = vmatpush3.bf16.msra.mxu1 %v2608_v54 }
  0xb2   :  { %2610 = vmatprep.subr.bf16.mxu1 %v2961_v0 }
  0xb4   :  { %2588 = vmatpush1.bf16.msra.mxu0 %v2587_v52  ;;  %v201_v52 = vrot.slane %v188_v31, %v200_v49 }
  0xb5   :  { %2590 = vmatprep.subr.bf16.mxu0 %v2589_v55  ;;  %2612 = vmatpush3.bf16.msra.mxu1 %v2611_v63 }
  0xb6   :  { %2613 = vmatprep.subr.bf16.mxu1 %v2961_v0 }
  0xb8   :  { %2592 = vmatpush1.bf16.msra.mxu0 %v2591_v61 }
  0xb9   :  { %2594 = vmatprep.subr.bf16.mxu0 %v2593_v2  ;;  %2615 = vmatpush3.bf16.msra.mxu1 %v2614_v10  ;;  %v3196_v10 = vld [vmem:[#allocation8 + $0x10] sm:$0xff] }
  0xba   :  { %2616 = vmatprep.subr.bf16.mxu1 %v2961_v0 }
  0xbc   :  { %2596 = vmatpush1.bf16.msra.mxu0 %v2595_v8 }
  0xbd   :  { %2598 = vmatprep.subr.bf16.mxu0 %v2597_v11  ;;  %2618 = vmatpush3.bf16.msra.mxu1 %v2617_v16  ;;  %v3204_v16 = vld [vmem:[#allocation8 + $0x20] sm:$0xff] }
  0xbe   :  { %2619 = vmatprep.subr.bf16.mxu1 %v2961_v0 }
  0xc0   :  { %2600 = vmatpush1.bf16.msra.mxu0 %v2599_v15 }
  0xc1   :  { %2413 = vmatprep.subr.mxu0 %v2962_v1  ;;  %2621 = vmatpush3.bf16.msra.mxu1 %v2620_v20 }
  0xc2   :  { %2622 = vmatprep.subr.bf16.mxu1 %v2961_v0 }
  0xc3   :  { %476 = vmatmul.mubr.f32.vlgmr.msra.gmra.mrb[0].mxu0 %v3162_v19 }
  0xc4   :  { %2415 = vmatprep.mubr.msk.f32.mxu0 %vm2963_vm0, %v2962_v1 }
  0xc5   :  { %2624 = vmatpush3.bf16.msra.mxu1 %v2623_v23  ;;  %v3222_v23 = vld [vmem:[#allocation8 + $0x38] sm:$0xff] }
  0xc6   :  { %2418 = vmatprep.subr.mxu1 %v2962_v1 }
  0xc8   :  { %2411 = vmatmul.mubr.f32.vlgmr.msra.gmra.mrb[2].mxu1 %v3162_v19 }
  0xc9   :  { %2420 = vmatprep.mubr.msk.f32.mxu1 %vm2963_vm0, %v2962_v1  ;;  %2414 = vmatpush3.xpose.msra.mxu0 %v3174_v24 }
  0xca   :  { %2423 = vmatprep.subr.mxu0 %v2962_v1 }
  0xce   :  { %2419 = vmatpush3.xpose.msra.mxu1 %v3176_v25 }
  0xcf   :  { %2428 = vmatprep.subr.mxu1 %v2962_v1 }
 0x17b   :  { %v342_v0 = vpop.f32.mrb[0].mxu1 }
 0x17c   :  { %v2377_v26 = vpop.f32.mrb[1].mxu1  ;;  %v343_v56 = vadd.f32 %v342_v0, %v201_v52 }
 0x196   :  { %v477_v38 = vpop.f32.mrb[0].mxu0 }
 0x197   :  { %v2658_v40 = vadd.f32 %v2657_v37, %v477_v38  ;;  %v479_v41 = vpop.f32.mrb[1].mxu0 }
 0x198   :  { %v2660_v43 = vadd.f32 %v2659_v39, %v479_v41 }
 0x199   :  { %v2213_v42 = vmul.f32 -1.442695, %v2658_v40 }
 0x19a   :  { %v2214_v44 = vmul.f32 -1.442695, %v2660_v43 }
 0x19b   :  { %2690 = vpow2.f32 %v2213_v42  ;;  %v548_v45 = vpop.f32.mrb[2].mxu1 }
 0x19c   :  { %v2412_v46 = vpop.f32.mrb[3].mxu1  ;;  %2692 = vpow2.f32 %v2214_v44  ;;  %v549_v54 = vadd.f32 %v548_v45, %v407_v50 }
 0x1a5   :  { %v2691_v47 = vpop.eup %2690 }
 0x1a6   :  { %v556_v48 = vadd.f32 1.0, %v2691_v47  ;;  %v2693_v51 = vpop.eup %2692 }
 0x1a7   :  { %v563_v53 = vadd.f32 1.0, %v2693_v51 }
 0x1a8   :  { %2694 = vrcp.f32 %v556_v48 }
 0x1a9   :  { %2696 = vrcp.f32 %v563_v53 }
 0x1b2   :  { %v2695_v55 = vpop.eup %2694 }
 0x1b3   :  { %v566_v57 = vmul.f32 %v2695_v55, %v549_v54  ;;  %v2697_v61 = vpop.eup %2696 }
 0x1b4   :  { %v569_v63 = vsub.f32 1.0, %v2697_v61  ;;  %v571_v4 = vmul.f32 %v2697_v61, %v3162_v19 }
 0x1b5   :  { %v567_v58 = vadd.f32 %v566_v57, %v343_v56 }
 0x1b7   :  { %2698 = vtanh.f32 %v567_v58 }
 0x1c1   :  { %v2699_v2 = vpop.eup %2698 }
 0x1c2   :  { %v570_v5 = vmul.f32 %v2699_v2, %v569_v63 }
 0x1c4   :  { %v3190_v6 = vadd.f32 %v571_v4, %v570_v5 }
 0x1c6   :  { %v590_v7 = vrot.slane %v3190_v6, %v589_v3  ;;  %573 = vst [vmem:[#allocation16] sm:$0xff] %v3190_v6  ;;  %v583_v8 = vcombine.high %v3190_v6, %v3190_v6 }
 0x1c8   :  { %v606_v9 = vrot.slane %v590_v7, %v589_v3  ;;  %v598_v11 = vcombine.high %v590_v7, %v590_v7  ;;  %v597_v14 = vrot.slane %v583_v8, %v589_v3 }
 0x1ca   :  { %2416 = vmatmul.mubr.f32.vlgmr.msra.gmra.mrb[2].mxu0 %v606_v9  ;;  %v620_v12 = vrot.slane %v598_v11, %v589_v3  ;;  %v628_v15 = vcombine.high %v606_v9, %v606_v9  ;;  %v599_v19 = vcombine.high %v597_v14, %v597_v14  ;;  %v613_v20 = vrot.slane %v597_v14, %v589_v3 }
 0x1cb   :  { %2424 = vmatpush3.xpose.msra.mxu0 %v3196_v10  ;;  %2425 = vmatprep.mubr.msk.f32.mxu0 %vm2963_vm0, %v2962_v1 }
 0x1cc   :  { %2421 = vmatmul.mubr.f32.vlgmr.msra.gmra.mrb[4].mxu1 %v620_v12  ;;  %2433 = vmatprep.subr.mxu0 %v2962_v1  ;;  %v630_v17 = vcombine.high %v620_v12, %v620_v12  ;;  %v627_v22 = vrot.slane %v599_v19, %v589_v3  ;;  %v629_v0 = vcombine.high %v613_v20, %v613_v20 }
 0x1cd   :  { %2429 = vmatpush3.xpose.msra.mxu1 %v3198_v13  ;;  %2430 = vmatprep.mubr.msk.f32.mxu1 %vm2963_vm0, %v2962_v1 }
 0x1ce   :  { %2426 = vmatmul.mubr.f32.vlgmr.msra.gmra.mrb[4].mxu0 %v628_v15  ;;  %2438 = vmatprep.subr.mxu1 %v2962_v1  ;;  %v631_v26 = vcombine.high %v627_v22, %v627_v22 }
 0x1cf   :  { %2434 = vmatpush3.xpose.msra.mxu0 %v3204_v16  ;;  %2435 = vmatprep.mubr.msk.f32.mxu0 %vm2963_vm0, %v2962_v1 }
 0x1d0   :  { %2431 = vmatmul.mubr.f32.vlgmr.msra.gmra.mrb[6].mxu1 %v630_v17  ;;  %2443 = vmatprep.subr.mxu0 %v2962_v1 }
 0x1d1   :  { %2439 = vmatpush3.xpose.msra.mxu1 %v3210_v18  ;;  %2440 = vmatprep.mubr.msk.f32.mxu1 %vm2963_vm0, %v2962_v1 }
 0x1d2   :  { %2436 = vmatmul.mubr.f32.vlgmr.msra.gmra.mrb[6].mxu0 %v613_v20  ;;  %2448 = vmatprep.subr.mxu1 %v2962_v1 }
 0x1d3   :  { %2444 = vmatpush3.xpose.msra.mxu0 %v3216_v21  ;;  %2445 = vmatprep.mubr.msk.f32.mxu0 %vm2963_vm0, %v2962_v1 }
 0x1d4   :  { %2441 = vmatmul.mubr.f32.vlgmr.msra.gmra.mrb[8].mxu1 %v627_v22  ;;  %2453 = vmatprep.subr.mxu0 %v2962_v1 }
 0x1d5   :  { %2449 = vmatpush3.xpose.msra.mxu1 %v3222_v23  ;;  %2450 = vmatprep.mubr.msk.f32.mxu1 %vm2963_vm0, %v2962_v1 }
 0x1d6   :  { %2446 = vmatmul.mubr.f32.vlgmr.msra.gmra.mrb[8].mxu0 %v629_v0  ;;  %2458 = vmatprep.subr.mxu1 %v2962_v1 }
 0x1d7   :  { %2454 = vmatpush3.msra.mxu0 %v3174_v24  ;;  %2455 = vmatprep.mubr.msk.f32.mxu0 %vm2963_vm0, %v2962_v1 }
 0x1d8   :  { %2451 = vmatmul.mubr.f32.vlgmr.msra.gmra.mrb[10].mxu1 %v631_v26  ;;  %2463 = vmatprep.subr.mxu0 %v2962_v1 }
 0x1d9   :  { %2459 = vmatpush3.msra.mxu1 %v3176_v25  ;;  %2460 = vmatprep.mubr.msk.f32.mxu1 %vm2963_vm0, %v2962_v1 }
 0x1da   :  { %2468 = vmatprep.subr.mxu1 %v2962_v1 }
 0x29d   :  { %v706_v28 = vpop.f32.mrb[2].mxu0 }
 0x29e   :  { %v2417_v29 = vpop.f32.mrb[3].mxu0  ;;  %v1201_v30 = vsel %vm1200_vm1, %v706_v28, -inf }
 0x29f   :  { %1202 = vmax.xlane.f32.xlu0 %v1201_v30  ;;  %v776_v24 = vpop.f32.mrb[4].mxu1 }
 0x2a0   :  { %v2422_v31 = vpop.f32.mrb[5].mxu1  ;;  %v1204_v35 = vsel %vm1200_vm1, %v776_v24, -inf }
 0x2a1   :  { %v846_v32 = vpop.f32.mrb[4].mxu0 }
 0x2a2   :  { %v2427_v33 = vpop.f32.mrb[5].mxu0  ;;  %v1207_v34 = vsel %vm1200_vm1, %v846_v32, -inf }
 0x2a3   :  { %1208 = vmax.xlane.f32.xlu1 %v1207_v34  ;;  %1205 = vmax.xlane.f32.xlu0 %v1204_v35  ;;  %v916_v25 = vpop.f32.mrb[6].mxu1 }
 0x2a4   :  { %v2432_v36 = vpop.f32.mrb[7].mxu1  ;;  %v1210_v39 = vsel %vm1200_vm1, %v916_v25, -inf }
 0x2a5   :  { %v986_v37 = vpop.f32.mrb[6].mxu0 }
 0x2a6   :  { %v2437_v38 = vpop.f32.mrb[7].mxu0  ;;  %v1213_v40 = vsel %vm1200_vm1, %v986_v37, -inf }
 0x2a7   :  { %1211 = vmax.xlane.f32.xlu1 %v1210_v39  ;;  %1214 = vmax.xlane.f32.xlu0 %v1213_v40  ;;  %v1056_v41 = vpop.f32.mrb[8].mxu1 }
 0x2a8   :  { %v2442_v42 = vpop.f32.mrb[9].mxu1  ;;  %v1216_v46 = vsel %vm1200_vm1, %v1056_v41, -inf }
 0x2a9   :  { %v1126_v43 = vpop.f32.mrb[8].mxu0 }
 0x2aa   :  { %v2447_v44 = vpop.f32.mrb[9].mxu0  ;;  %v1219_v45 = vsel %vm1200_vm1, %v1126_v43, -inf }
 0x2ab   :  { %1220 = vmax.xlane.f32.xlu0 %v1219_v45  ;;  %1217 = vmax.xlane.f32.xlu1 %v1216_v46  ;;  %v1196_v47 = vpop.f32.mrb[10].mxu1 }
 0x2ac   :  { %v2452_v48 = vpop.f32.mrb[11].mxu1  ;;  %v1222_v49 = vsel %vm1200_vm1, %v1196_v47, -inf }
 0x2af   :  { %1223 = vmax.xlane.f32.xlu1 %v1222_v49 }
 0x32c   :  { %v1203_v50 = vpop.xlane.xlu0 %1202 }
 0x32d   :  { %v1225_v51 = vsub.f32 %v706_v28, %v1203_v50 }
 0x32f   :  { %v1233_v52 = vmul.f32 1.442695, %v1225_v51 }
 0x330   :  { %v1209_v53 = vpop.xlane.xlu1 %1208  ;;  %v1206_v54 = vpop.xlane.xlu0 %1205 }
 0x331   :  { %2700 = vpow2.f32 %v1233_v52  ;;  %v1227_v55 = vsub.f32 %v846_v32, %v1209_v53  ;;  %v1226_v56 = vsub.f32 %v776_v24, %v1206_v54 }
 0x333   :  { %v1237_v57 = vmul.f32 1.442695, %v1227_v55  ;;  %v1235_v58 = vmul.f32 1.442695, %v1226_v56 }
 0x334   :  { %v1212_v59 = vpop.xlane.xlu1 %1211  ;;  %v1215_v60 = vpop.xlane.xlu0 %1214 }
 0x335   :  { %2702 = vpow2.f32 %v1237_v57  ;;  %v1228_v61 = vsub.f32 %v916_v25, %v1212_v59  ;;  %v1229_v62 = vsub.f32 %v986_v37, %v1215_v60 }
 0x336   :  { %2704 = vpow2.f32 %v1235_v58 }
 0x337   :  { %v1239_v63 = vmul.f32 1.442695, %v1228_v61  ;;  %v1241_v2 = vmul.f32 1.442695, %v1229_v62 }
 0x338   :  { %v1221_v3 = vpop.xlane.xlu0 %1220  ;;  %v1218_v4 = vpop.xlane.xlu1 %1217 }
 0x339   :  { %2706 = vpow2.f32 %v1239_v63  ;;  %v1231_v5 = vsub.f32 %v1126_v43, %v1221_v3  ;;  %v1230_v7 = vsub.f32 %v1056_v41, %v1218_v4 }
 0x33a   :  { %2708 = vpow2.f32 %v1241_v2 }
 0x33b   :  { %v2701_v8 = vpop.eup %2700  ;;  %v1245_v9 = vmul.f32 1.442695, %v1231_v5  ;;  %v1243_v11 = vmul.f32 1.442695, %v1230_v7 }
 0x33c   :  { %v1224_v12 = vpop.xlane.xlu1 %1223  ;;  %v1249_v14 = vsel %vm1200_vm1, %v2701_v8, 0.0 }
 0x33d   :  { %2710 = vpow2.f32 %v1245_v9  ;;  %v1232_v15 = vsub.f32 %v1196_v47, %v1224_v12  ;;  %1250 = vadd.xlane.f32.xlu0 %v1249_v14  ;;  %v1945_v9 = vld [vmem:[#allocation12 + $0x88] sm:$0xff]  ;;  %v1928_v14 = vld [vmem:[#allocation12] sm:$0xff] }
 0x33e   :  { %2712 = vpow2.f32 %v1243_v11 }
 0x33f   :  { %v2703_v17 = vpop.eup %2702  ;;  %v1247_v19 = vmul.f32 1.442695, %v1232_v15  ;;  %v1929_v15 = vld [vmem:[#allocation12 + $0x8] sm:$0xff] }
 0x340   :  { %v2705_v20 = vpop.eup %2704  ;;  %v1255_v22 = vsel %vm1200_vm1, %v2703_v17, 0.0 }
 0x341   :  { %2714 = vpow2.f32 %v1247_v19  ;;  %1256 = vadd.xlane.f32.xlu0 %v1255_v22  ;;  %v1252_v0 = vsel %vm1200_vm1, %v2705_v20, 0.0 }
 0x342   :  { %1253 = vadd.xlane.f32.xlu1 %v1252_v0  ;;  %v1946_v0 = vld [vmem:[#allocation12 + $0x90] sm:$0xff] }
 0x343   :  { %v3251_v26 = vpop.eup %2706 }
 0x344   :  { %v3253_v28 = vpop.eup %2708  ;;  %v1258_v29 = vsel %vm1200_vm1, %v3251_v26, 0.0 }
 0x345   :  { %v1261_v30 = vsel %vm1200_vm1, %v3253_v28, 0.0 }
 0x346   :  { %1262 = vadd.xlane.f32.xlu0 %v1261_v30  ;;  %1259 = vadd.xlane.f32.xlu1 %v1258_v29  ;;  %v2627_v30 = vpack.c.bf16 %v1929_v15, %v1928_v14 }
 0x347   :  { %v3259_v24 = vpop.eup %2710 }
 0x348   :  { %v3261_v31 = vpop.eup %2712  ;;  %v1267_v32 = vsel %vm1200_vm1, %v3259_v24, 0.0 }
 0x349   :  { %v1264_v33 = vsel %vm1200_vm1, %v3261_v31, 0.0 }
 0x34a   :  { %1268 = vadd.xlane.f32.xlu0 %v1267_v32  ;;  %1265 = vadd.xlane.f32.xlu1 %v1264_v33 }
 0x34b   :  { %v3267_v34 = vpop.eup %2714 }
 0x34c   :  { %v1270_v35 = vsel %vm1200_vm1, %v3267_v34, 0.0 }
 0x34e   :  { %1271 = vadd.xlane.f32.xlu1 %v1270_v35  ;;  %v1931_v35 = vld [vmem:[#allocation12 + $0x18] sm:$0xff] }
 0x3ca   :  { %v1251_v25 = vpop.xlane.xlu0 %1250 }
 0x3cb   :  { %2716 = vrcp.f32 %v1251_v25 }
 0x3ce   :  { %v1257_v36 = vpop.xlane.xlu0 %1256 }
 0x3cf   :  { %2718 = vrcp.f32 %v1257_v36  ;;  %v1254_v37 = vpop.xlane.xlu1 %1253 }
 0x3d0   :  { %2720 = vrcp.f32 %v1254_v37 }
 0x3d3   :  { %v1263_v38 = vpop.xlane.xlu0 %1262  ;;  %v1260_v39 = vpop.xlane.xlu1 %1259 }
 0x3d4   :  { %2722 = vrcp.f32 %v1263_v38 }
 0x3d5   :  { %v2717_v40 = vpop.eup %2716  ;;  %2724 = vrcp.f32 %v1260_v39 }
 0x3d6   :  { %v1281_v41 = vmul.f32 %v2717_v40, %v1251_v25 }
 0x3d7   :  { %v1269_v42 = vpop.xlane.xlu0 %1268  ;;  %v1266_v43 = vpop.xlane.xlu1 %1265 }
 0x3d8   :  { %v1289_v44 = vsub.f32 2.0, %v1281_v41  ;;  %2726 = vrcp.f32 %v1269_v42 }
 0x3d9   :  { %v2719_v45 = vpop.eup %2718  ;;  %2728 = vrcp.f32 %v1266_v43 }
 0x3da   :  { %v2721_v46 = vpop.eup %2720  ;;  %v1297_v47 = vmul.f32 %v2717_v40, %v1289_v44  ;;  %v1283_v48 = vmul.f32 %v2719_v45, %v1257_v36  ;;  %v1933_v40 = vld [vmem:[#allocation12 + $0x28] sm:$0xff]  ;;  %v1935_v44 = vld [vmem:[#allocation12 + $0x38] sm:$0xff] }
 0x3db   :  { %v1282_v49 = vmul.f32 %v2721_v46, %v1254_v37  ;;  %v1272_v50 = vpop.xlane.xlu1 %1271  ;;  %v1949_v37 = vld [vmem:[#allocation12 + $0xa8] sm:$0xff] }
 0x3dc   :  { %v1305_v51 = vmul.f32 %v2701_v8, %v1297_v47  ;;  %v1291_v52 = vsub.f32 2.0, %v1283_v48  ;;  %2730 = vrcp.f32 %v1272_v50  ;;  %v1944_v8 = vld [vmem:[#allocation12 + $0x80] sm:$0xff]  ;;  %v1953_v47 = vld [vmem:[#allocation12 + $0xc8] sm:$0xff] }
 0x3dd   :  { %v1290_v53 = vsub.f32 2.0, %v1282_v49  ;;  %v2625_v22 = vpack.c.bf16 %v1945_v9, %v1944_v8  ;;  %v1936_v49 = vld [vmem:[#allocation12 + $0x40] sm:$0xff]  ;;  %v2683_v9 = vld [vmem:[#allocation14 + $0x8] sm:$0xff]  }
 0x3de   :  { %v2723_v54 = vpop.eup %2722  ;;  %v1299_v55 = vmul.f32 %v2719_v45, %v1291_v52  ;;  %2456 = vmatmul.mubr.msk.f32.vlgmr.msra.gmra.mrb[10].mxu0 %vm1313_vm2, %v1305_v51  ;;  %v1954_v52 = vld [vmem:[#allocation12 + $0xd0] sm:$0xff]  ;;  %v2682_v8 = vld [vmem:[#allocation14] sm:$0xff]  }
 0x3df   :  { %v2725_v56 = vpop.eup %2724  ;;  %v1298_v57 = vmul.f32 %v2721_v46, %v1290_v53  ;;  %v1285_v58 = vmul.f32 %v2723_v54, %v1263_v38  ;;  %2464 = vmatpush3.msra.mxu0 %v3196_v10  ;;  %2465 = vmatprep.mubr.msk.f32.mxu0 %vm2963_vm0, %v2962_v1  ;;  %v1952_v46 = vld [vmem:[#allocation12 + $0xc0] sm:$0xff]  ;;  %v1955_v53 = vld [vmem:[#allocation12 + $0xd8] sm:$0xff] }
 0x3e0   :  { %v1307_v59 = vmul.f32 %v2703_v17, %v1299_v55  ;;  %v1284_v60 = vmul.f32 %v2725_v56, %v1260_v39  ;;  %2473 = vmatprep.subr.mxu0 %v2962_v1  ;;  %v1932_v39 = vld [vmem:[#allocation12 + $0x20] sm:$0xff]  ;;  %v2641_v48 = vpack.c.bf16 %v1953_v47, %v1952_v46  ;;  %v1938_v55 = vld [vmem:[#allocation12 + $0x50] sm:$0xff]  ;;  %v2689_v46 = vld [vmem:[#allocation14 + $0x38] sm:$0xff]  }
 0x3e1   :  { %v1306_v61 = vmul.f32 %v2705_v20, %v1298_v57  ;;  %v1293_v62 = vsub.f32 2.0, %v1285_v58  ;;  %v2635_v41 = vpack.c.bf16 %v1933_v40, %v1932_v39  ;;  %v1956_v58 = vld [vmem:[#allocation12 + $0xe0] sm:$0xff] }
 0x3e2   :  { %v2727_v63 = vpop.eup %2726  ;;  %v1292_v2 = vsub.f32 2.0, %v1284_v60  ;;  %2466 = vmatmul.mubr.msk.f32.vlgmr.msra.gmra.mrb[12].mxu0 %vm1313_vm2, %v1307_v59  ;;  %v1957_v59 = vld [vmem:[#allocation12 + $0xe8] sm:$0xff] }
 0x3e3   :  { %v2729_v3 = vpop.eup %2728  ;;  %v1301_v4 = vmul.f32 %v2723_v54, %v1293_v62  ;;  %v1287_v5 = vmul.f32 %v2727_v63, %v1269_v42  ;;  %2461 = vmatmul.mubr.msk.f32.vlgmr.msra.gmra.mrb[12].mxu1 %vm1313_vm2, %v1306_v61  ;;  %2474 = vmatpush3.msra.mxu0 %v3204_v16  ;;  %v2645_v54 = vpack.c.bf16 %v1955_v53, %v1954_v52  ;;  %v1940_v61 = vld [vmem:[#allocation12 + $0x60] sm:$0xff]  ;;  %v1941_v62 = vld [vmem:[#allocation12 + $0x68] sm:$0xff]  ;;  %v2153_v53 = vand.u32 127, %v190_v27 }
 0x3e4   :  { %v1300_v10 = vmul.f32 %v2725_v56, %v1292_v2  ;;  %v1286_v7 = vmul.f32 %v2729_v3, %v1266_v43  ;;  %2469 = vmatpush3.msra.mxu1 %v3198_v13  ;;  %2470 = vmatprep.mubr.msk.f32.mxu1 %vm2963_vm0, %v2962_v1  ;;  %v1934_v43 = vld [vmem:[#allocation12 + $0x30] sm:$0xff]  ;;  %v1939_v56 = vld [vmem:[#allocation12 + $0x58] sm:$0xff]  ;;  %v2649_v60 = vpack.c.bf16 %v1957_v59, %v1956_v58 }
 0x3e5   :  { %v1309_v11 = vmul.f32 %v3253_v28, %v1301_v4  ;;  %v1295_v12 = vsub.f32 2.0, %v1287_v5  ;;  %2475 = vmatprep.mubr.msk.f32.mxu0 %vm2963_vm0, %v2962_v1  ;;  %2478 = vmatprep.subr.mxu1 %v2962_v1  ;;  %v1947_v28 = vld [vmem:[#allocation12 + $0x98] sm:$0xff]  ;;  %v2639_v45 = vpack.c.bf16 %v1935_v44, %v1934_v43  ;;  %v2647_v57 = vpack.c.bf16 %v1939_v56, %v1938_v55  ;;  %v1958_v2 = vld [vmem:[#allocation12 + $0xf0] sm:$0xff]  ;;  %v2686_v43 = vld [vmem:[#allocation14 + $0x20] sm:$0xff]  }
 0x3e6   :  { %v2731_v16 = vpop.eup %2730  ;;  %v1308_v17 = vmul.f32 %v3251_v26, %v1300_v10  ;;  %v1294_v19 = vsub.f32 2.0, %v1286_v7  ;;  %2483 = vmatprep.subr.mxu0 %v2962_v1  ;;  %v1930_v26 = vld [vmem:[#allocation12 + $0x10] sm:$0xff]  ;;  %v2629_v36 = vpack.c.bf16 %v1947_v28, %v1946_v0  ;;  %v1943_v10 = vld [vmem:[#allocation12 + $0x78] sm:$0xff]  ;;  %v2687_v44 = vld [vmem:[#allocation14 + $0x28] sm:$0xff]   ;;  %vm2157_vm10 = vcmp.lt.s32.totalorder %v2153_v53, 64 }
 0x3e7   :  { %v1303_v13 = vmul.f32 %v2727_v63, %v1295_v12  ;;  %v1288_v20 = vmul.f32 %v2731_v16, %v1272_v50  ;;  %2476 = vmatmul.mubr.msk.f32.vlgmr.msra.gmra.mrb[14].mxu0 %vm1313_vm2, %v1309_v11  ;;  %v1937_v50 = vld [vmem:[#allocation12 + $0x48] sm:$0xff]  ;;  %v2651_v63 = vpack.c.bf16 %v1941_v62, %v1940_v61  ;;  %v1942_v5 = vld [vmem:[#allocation12 + $0x70] sm:$0xff] }
 0x3e8   :  { %v1302_v29 = vmul.f32 %v2729_v3, %v1294_v19  ;;  %2471 = vmatmul.mubr.msk.f32.vlgmr.msra.gmra.mrb[14].mxu1 %vm1313_vm2, %v1308_v17  ;;  %2484 = vmatpush3.msra.mxu0 %v3216_v21  ;;  %v1948_v21 = vld [vmem:[#allocation12 + $0xa0] sm:$0xff]  ;;  %v2643_v51 = vpack.c.bf16 %v1937_v50, %v1936_v49  ;;  %v1959_v3 = vld [vmem:[#allocation12 + $0xf8] sm:$0xff]  ;;  %v2655_v7 = vpack.c.bf16 %v1943_v10, %v1942_v5  ;;  %v2684_v11 = vld [vmem:[#allocation14 + $0x10] sm:$0xff]  }
 0x3e9   :  { %v1311_v32 = vmul.f32 %v3259_v24, %v1303_v13  ;;  %v1296_v33 = vsub.f32 2.0, %v1288_v20  ;;  %2479 = vmatpush3.msra.mxu1 %v3210_v18  ;;  %2480 = vmatprep.mubr.msk.f32.mxu1 %vm2963_vm0, %v2962_v1  ;;  %v2631_v18 = vpack.c.bf16 %v1931_v35, %v1930_v26  ;;  %v2653_v4 = vpack.c.bf16 %v1959_v3, %v1958_v2 }
 0x3ea   :  { %v1310_v25 = vmul.f32 %v3261_v31, %v1302_v29  ;;  %2485 = vmatprep.mubr.msk.f32.mxu0 %vm2963_vm0, %v2962_v1  ;;  %2488 = vmatprep.subr.mxu1 %v2962_v1  ;;  %v2633_v31 = vpack.c.bf16 %v1949_v37, %v1948_v21 }
 0x3eb   :  { %v1304_v38 = vmul.f32 %v2731_v16, %v1296_v33  ;;  %2486 = vmatmul.mubr.msk.f32.vlgmr.msra.gmra.mrb[16].mxu0 %vm1313_vm2, %v1311_v32  ;;  %2626 = vmatprep.subr.bf16.mxu0 %v2625_v22 }
 0x3ec   :  { %2481 = vmatmul.mubr.msk.f32.vlgmr.msra.gmra.mrb[16].mxu1 %vm1313_vm2, %v1310_v25  ;;  %2628 = vmatpush3.bf16.msra.mxu0 %v2627_v30 }
 0x3ed   :  { %v1312_v24 = vmul.f32 %v3267_v34, %v1304_v38  ;;  %2489 = vmatpush3.msra.mxu1 %v3222_v23  ;;  %2490 = vmatprep.mubr.msk.f32.mxu1 %vm2963_vm0, %v2962_v1  ;;  %v1950_v34 = vld [vmem:[#allocation12 + $0xb0] sm:$0xff]  ;;  %v1951_v23 = vld [vmem:[#allocation12 + $0xb8] sm:$0xff] }
 0x3ee   :  { %2630 = vmatprep.subr.bf16.mxu0 %v2629_v36  ;;  %2493 = vmatprep.subr.bf16.mxu1 %v2962_v1  ;;  %v2637_v42 = vpack.c.bf16 %v1951_v23, %v1950_v34 }
 0x3f0   :  { %2491 = vmatmul.mubr.msk.f32.vlgmr.msra.gmra.mrb[18].mxu1 %vm1313_vm2, %v1312_v24  ;;  %2632 = vmatpush3.bf16.msra.mxu0 %v2631_v18 }
 0x3f1   :  { %2634 = vmatprep.subr.bf16.mxu0 %v2633_v31  ;;  %2509 = vmatprep.mubr.msk.bf16.mxu1 %vm2963_vm0, %v2962_v1 }
 0x3f2   :  { %2494 = vmatpush3.bf16.msra.mxu1 %v2682_v8 }
 0x3f3   :  { %2495 = vmatprep.subr.bf16.mxu1 %v2962_v1 }
 0x3f4   :  { %2636 = vmatpush3.bf16.msra.mxu0 %v2635_v41 }
 0x3f5   :  { %2638 = vmatprep.subr.bf16.mxu0 %v2637_v42  ;;  %v2685_v42 = vld [vmem:[#allocation14 + $0x18] sm:$0xff]  }
 0x3f6   :  { %2496 = vmatpush3.bf16.msra.mxu1 %v2683_v9 }
 0x3f7   :  { %2497 = vmatprep.subr.bf16.mxu1 %v2962_v1 }
 0x3f8   :  { %2640 = vmatpush3.bf16.msra.mxu0 %v2639_v45  ;;  %v2688_v45 = vld [vmem:[#allocation14 + $0x30] sm:$0xff]  }
 0x3f9   :  { %2642 = vmatprep.subr.bf16.mxu0 %v2641_v48 }
 0x3fa   :  { %2498 = vmatpush3.bf16.msra.mxu1 %v2684_v11 }
 0x3fb   :  { %2499 = vmatprep.subr.bf16.mxu1 %v2962_v1 }
 0x3fc   :  { %2644 = vmatpush3.bf16.msra.mxu0 %v2643_v51 }
 0x3fd   :  { %2646 = vmatprep.subr.bf16.mxu0 %v2645_v54 }
 0x3fe   :  { %2500 = vmatpush3.bf16.msra.mxu1 %v2685_v42 }
 0x3ff   :  { %2501 = vmatprep.subr.bf16.mxu1 %v2962_v1 }
 0x400   :  { %2648 = vmatpush3.bf16.msra.mxu0 %v2647_v57 }
 0x401   :  { %2650 = vmatprep.subr.bf16.mxu0 %v2649_v60 }
 0x402   :  { %2502 = vmatpush3.bf16.msra.mxu1 %v2686_v43 }
 0x403   :  { %2503 = vmatprep.subr.bf16.mxu1 %v2962_v1 }
 0x404   :  { %2652 = vmatpush3.bf16.msra.mxu0 %v2651_v63 }
 0x405   :  { %2654 = vmatprep.subr.bf16.mxu0 %v2653_v4 }
 0x406   :  { %2504 = vmatpush3.bf16.msra.mxu1 %v2687_v44 }
 0x407   :  { %2505 = vmatprep.subr.bf16.mxu1 %v2962_v1 }
 0x408   :  { %2656 = vmatpush3.bf16.msra.mxu0 %v2655_v7 }
 0x40a   :  { %2506 = vmatpush3.bf16.msra.mxu1 %v2688_v45 }
 0x40b   :  { %2507 = vmatprep.subr.bf16.mxu1 %v2962_v1  ;;  %v2224_v1 = vld [vmem:[%s3358_s10] ss:$0 sm:$0xff] }
 0x40e   :  { %2508 = vmatpush3.bf16.msra.mxu1 %v2689_v46 }
 0x4b1   :  { %v1383_v12 = vpop.f32.mrb[10].mxu0 }
 0x4b2   :  { %v2457_v14 = vpop.f32.mrb[11].mxu0 }
 0x4b5   :  { %v1529_v15 = vpop.f32.mrb[12].mxu0 }
 0x4b6   :  { %v1456_v16 = vpop.f32.mrb[12].mxu1  ;;  %v1909_v17 = vrot.slane %v1529_v15, 6  ;;  %v2467_v19 = vpop.f32.mrb[13].mxu0 }
 0x4b7   :  { %v1906_v13 = vrot.slane %v1456_v16, 7  ;;  %v2462_v20 = vpop.f32.mrb[13].mxu1 }
 0x4b9   :  { %v1908_v22 = vsel %vm1907_vm3, %v1906_v13, %v1383_v12 }
 0x4ba   :  { %v1911_v0 = vsel %vm1910_vm4, %v1909_v17, %v1908_v22  ;;  %v1675_v28 = vpop.f32.mrb[14].mxu0 }
 0x4bb   :  { %v1602_v29 = vpop.f32.mrb[14].mxu1  ;;  %v1915_v30 = vrot.slane %v1675_v28, 4  ;;  %v2477_v32 = vpop.f32.mrb[15].mxu0 }
 0x4bc   :  { %v1912_v33 = vrot.slane %v1602_v29, 5  ;;  %v2472_v26 = vpop.f32.mrb[15].mxu1 }
 0x4be   :  { %v1914_v35 = vsel %vm1913_vm5, %v1912_v33, %v1911_v0  ;;  %v1821_v25 = vpop.f32.mrb[16].mxu0 }
 0x4bf   :  { %v1917_v36 = vsel %vm1916_vm6, %v1915_v30, %v1914_v35  ;;  %v1748_v21 = vpop.f32.mrb[16].mxu1  ;;  %v1921_v37 = vrot.slane %v1821_v25, 2  ;;  %v2487_v38 = vpop.f32.mrb[17].mxu0 }
 0x4c0   :  { %v1918_v18 = vrot.slane %v1748_v21, 3  ;;  %v2482_v24 = vpop.f32.mrb[17].mxu1 }
 0x4c2   :  { %v1920_v31 = vsel %vm1919_vm7, %v1918_v18, %v1917_v36 }
 0x4c3   :  { %v1894_v39 = vpop.f32.mrb[18].mxu1  ;;  %v1923_v40 = vsel %vm1922_vm8, %v1921_v37, %v1920_v31 }
 0x4c4   :  { %v1924_v41 = vrot.slane %v1894_v39, 1  ;;  %v2492_v34 = vpop.f32.mrb[19].mxu1 }
 0x4c6   :  { %v1926_v23 = vsel %vm1925_vm9, %v1924_v41, %v1923_v40 }
 0x4c7   :  { %2031 = vmatprep.mubr.f32.mxu0 %v1926_v23 }
 0x4c8   :  { %2032 = vmatmul.mubr.f32.vlgmr.msra.gmra.mrb[18].mxu0 %v3190_v6  ;;  %v2223_v6 = vld [vmem:[%s3356_s8] ss:$0 sm:$0xff]  ;;  %s2965_s8 = smov [#allocation16]  }
 0x4c9   :  { %s2196_s21 = sshll.u32 %s2965_s8, 4  ;;  %s2197_s21 = int_to_ptr.vmem [resolvable:$true] %s2196_s21 }
 0x4ca   :  { %s2892_s25 = scalar_lea.vmem %s2197_s21, 128  ;;  %p2897_p1 = scmp.lt.s32.totalorder %s2197_s21, %s2197_s21 }
 0x4cb   :  { %p2893_p0 = scmp.ne.s32.totalorder %s2197_s21, %s2892_s25  ;;  %p2898_p2 = scmp.lt.s32.totalorder %s2892_s25, %s2892_s25 }
 0x4cd   :  { %p2899_p3 = por %p2898_p2, %p2897_p1 }
 0x4cf   :  { %p2900_p4 = pnand %p2899_p3, %p2893_p0 }
 0x59b   :  { %v2331_v47 = vpop.f32.mrb[18].mxu0 }
 0x59c   :  { %v2332_v48 = vpop.f32.mrb[19].mxu0 }
 0x59d   :  { %v2333_v49 = vadd.f32 %v2332_v48, %v2331_v47 }
 0x59f   :  { %v2034_v50 = vadd.f32 %v2333_v49, %v2223_v6 }
 0x5a1   :  { %2732 = vtanh.f32 %v2034_v50 }
 0x5ab   :  { %v2733_v51 = vpop.eup %2732 }
 0x5ac   :  { %v2040_v52 = vpack.c.bf16 %v2733_v51, %v2733_v51 }
 0x5ae   :  { %2510 = vmatmul.mubr.bf16.vlgmr.msra.gmra.mrb[20].mxu1 %v2040_v52 }
 0x681   :  { %v2146_v54 = vpop.f32.mrb[20].mxu1 }
 0x682   :  { %v2147_v55 = vadd.f32 %v2224_v1, %v2146_v54  ;;  %v2511_v56 = vpop.f32.mrb[21].mxu1 }
 0x683   :  { %v2149_v57 = vpop.f32.mrb[22].mxu1 }
 0x684   :  { %v2158_v58 = vsel %vm2157_vm10, %v2147_v55, -1e+30  ;;  %v2512_v59 = vpop.f32.mrb[23].mxu1 }
 0x685   :  { %2167 = vmax.xlane.f32.xlu0 %v2158_v58 }
 0x712   :  { %v2168_v60 = vpop.xlane.xlu0 %2167 }
 0x713   :  { %v2169_v61 = vsub.f32 %v2158_v58, %v2168_v60 }
 0x715   :  { %v2170_v62 = vmul.f32 1.442695, %v2169_v61 }
 0x717   :  { %2734 = vpow2.f32 %v2170_v62 }
 0x721   :  { %v2735_v63 = vpop.eup %2734 }
 0x722   :  { %2172 = vadd.xlane.f32.xlu1 %v2735_v63 }
 0x723   :  { %2903 = shalt.err (!%p2900_p4)
}
 0x724   :  { %s2904_s2 = scalar_lea.hbm %s3360_s12, 128 }
 0x725   :  { %p2905_p5 = scmp.ne.s32.totalorder %s3360_s12, %s2904_s2  ;;  %p2908_p6 = scmp.lt.u32.totalorder %s2904_s2, %s3360_s12 }
 0x727   :  { %p2910_p7 = pnand %p2908_p6, %p2905_p5 }
 0x729   :  { %2913 = shalt.err (!%p2910_p7)
}
 0x72a   :  { %2199 = dma.vmem_to_hbm [thread:$0]  %s2197_s21, 128, %s3360_s12, [#allocation17]  }
 0x72b   :  { %s2966_s13 = smov [#allocation15]  }
 0x72c   :  { %s2186_s15 = sshll.u32 %s2966_s13, 4  ;;  %s2187_s15 = int_to_ptr.vmem [resolvable:$true] %s2186_s15 }
 0x72d   :  { %s2914_s0 = scalar_lea.vmem %s2187_s15, 128  ;;  %p2919_p9 = scmp.lt.s32.totalorder %s2187_s15, %s2187_s15 }
 0x72e   :  { %p2915_p8 = scmp.ne.s32.totalorder %s2187_s15, %s2914_s0  ;;  %p2920_p10 = scmp.lt.s32.totalorder %s2914_s0, %s2914_s0 }
 0x730   :  { %p2921_p11 = por %p2920_p10, %p2919_p9 }
 0x732   :  { %p2922_p12 = pnand %p2921_p11, %p2915_p8 }
 0x7af   :  { %v2173_v27 = vpop.xlane.xlu1 %2172 }
 0x7b0   :  { %2736 = vrcp.f32 %v2173_v27 }
 0x7ba   :  { %v2737_v2 = vpop.eup %2736 }
 0x7bb   :  { %v2175_v3 = vmul.f32 %v2737_v2, %v2173_v27 }
 0x7bd   :  { %v2176_v4 = vsub.f32 2.0, %v2175_v3 }
 0x7bf   :  { %v2177_v5 = vmul.f32 %v2737_v2, %v2176_v4 }
 0x7c1   :  { %v2178_v10 = vmul.f32 %v2735_v63, %v2177_v5 }
 0x7c3   :  { %2179 = vst [vmem:[#allocation15] sm:$0xff] %v2178_v10 }
 0x7c4   :  { %2925 = shalt.err (!%p2922_p12)
}
 0x7c5   :  { %s2926_s16 = scalar_lea.hbm %s3359_s11, 128 }
 0x7c6   :  { %p2927_p13 = scmp.ne.s32.totalorder %s3359_s11, %s2926_s16  ;;  %p2930_p0 = scmp.lt.u32.totalorder %s2926_s16, %s3359_s11 }
 0x7c8   :  { %p2932_p1 = pnand %p2930_p0, %p2927_p13 }
 0x7ca   :  { %2935 = shalt.err (!%p2932_p1)
}
 0x7cb   :  { %2189 = dma.vmem_to_hbm [thread:$0]  %s2187_s15, 128, %s3359_s11, [#allocation5]  }
 0x7cc   :  { %2944 = dma.done.wait [#allocation5], 128  }
 0x7cd   :  { %2945 = vsyncadd [#allocation5], 4294967168 }
 0x7ce   :  { %2946 = dma.done.wait [#allocation17], 128  }
 0x7cf   :  { %2947 = vsyncadd [#allocation17], 4294967168 }
 0x7d0   :  { %2206 = vsyncpa [#allocation4], 1 }
 0x7d1   :  { %2207 = vsyncpa [#allocation7], 1 }
 0x7d2   :  { %2208 = vsyncpa [#allocation10], 1 }
 0x7d3   :  { %2209 = vsyncpa [#allocation13], 1 }
 0x7d4   :  { %2210 = vsyncpa [#allocation5], 1 }
 0x7d5   :  { %2211 = vsyncpa [#allocation17], 1 }

// kernel: tpu_custom_call.1
= control target key start
LH: loop header
LB: loop body
LE: loop exit
PB: predicated region body
PF: predicated region fallthrough
CT: control target
= control target key end

     0   :  { %18 = vsyncpa [#allocation4], 0  ;;  %s3348_s0 = inlined_call_operand.hbm [shape: f32[8,128], index: 0, kind: input, shape index: {}]   ;;  %s3349_s1 = inlined_call_operand.hbm [shape: f32[8,128], index: 1, kind: input, shape index: {}]   ;;  %s3350_s2 = inlined_call_operand.hbm [shape: f32[8,8,128], index: 2, kind: input, shape index: {}]   ;;  %s3351_s3 = inlined_call_operand.hbm [shape: f32[128,384], index: 3, kind: input, shape index: {}]   ;;  %s3352_s4 = inlined_call_operand.hbm [shape: f32[128,384], index: 4, kind: input, shape index: {}]   ;;  %s3353_s5 = inlined_call_operand.vmem [shape: f32[1,384], index: 5, kind: input, shape index: {}]   ;;  %s3354_s6 = inlined_call_operand.vmem [shape: f32[1,384], index: 6, kind: input, shape index: {}]   ;;  %s3355_s7 = inlined_call_operand.hbm [shape: f32[256,128], index: 7, kind: input, shape index: {}]   ;;  %s3356_s8 = inlined_call_operand.vmem [shape: f32[1,128], index: 8, kind: input, shape index: {}]   ;;  %s3357_s9 = inlined_call_operand.hbm [shape: bf16[128,128], index: 9, kind: input, shape index: {}]   ;;  %s3358_s10 = inlined_call_operand.vmem [shape: f32[1,128], index: 10, kind: input, shape index: {}]   ;;  %s3359_s11 = inlined_call_operand.hbm [shape: f32[8,128], index: 11, kind: output, shape index: {0}]   ;;  %s3360_s12 = inlined_call_operand.hbm [shape: f32[8,128], index: 12, kind: output, shape index: {1}]  }
   0x1   :  { %19 = vsyncpa [#allocation7], 0 }
   0x2   :  { %20 = vsyncpa [#allocation10], 0 }
   0x3   :  { %21 = vsyncpa [#allocation13], 0 }
   0x4   :  { %22 = vsyncpa [#allocation5], 0 }
   0x5   :  { %23 = vsyncpa [#allocation17], 0  ;;  %s2948_s21 = smov [#allocation6]   ;;  %s2949_s23 = smov [#allocation9]  }
   0x6   :  { %s40_s22 = sshll.u32 %s2948_s21, 4  ;;  %s61_s24 = sshll.u32 %s2949_s23, 4  ;;  %s41_s22 = int_to_ptr.vmem [resolvable:$true] %s40_s22  ;;  %s3032_s24 = int_to_ptr.vmem [resolvable:$true] %s61_s24 }
   0x7   :  { %s2738_s27 = scalar_lea.hbm %s3349_s1, 128 }
   0x8   :  { %p2739_p0 = scmp.ne.s32.totalorder %s3349_s1, %s2738_s27  ;;  %p2742_p1 = scmp.lt.u32.totalorder %s2738_s27, %s3349_s1 }
   0xa   :  { %p2744_p2 = pnand %p2742_p1, %p2739_p0 }
   0xc   :  { %2747 = shalt.err (!%p2744_p2)
}
   0xd   :  { %s2748_s14 = scalar_lea.vmem %s41_s22, 128  ;;  %p2753_p4 = scmp.lt.s32.totalorder %s41_s22, %s41_s22 }
   0xe   :  { %p2749_p3 = scmp.ne.s32.totalorder %s41_s22, %s2748_s14  ;;  %p2754_p5 = scmp.lt.s32.totalorder %s2748_s14, %s2748_s14 }
  0x10   :  { %p2755_p6 = por %p2754_p5, %p2753_p4 }
  0x12   :  { %p2756_p7 = pnand %p2755_p6, %p2749_p3 }
  0x14   :  { %2759 = shalt.err (!%p2756_p7)
}
  0x15   :  { %43 = dma.hbm_to_vmem [thread:$0]  %s3349_s1, 128, %s41_s22, [#allocation7]  }
  0x16   :  { %s2760_s19 = scalar_lea.hbm %s3351_s3, 6144 }
  0x17   :  { %p2761_p8 = scmp.ne.s32.totalorder %s3351_s3, %s2760_s19  ;;  %p2764_p9 = scmp.lt.u32.totalorder %s2760_s19, %s3351_s3 }
  0x19   :  { %p2766_p10 = pnand %p2764_p9, %p2761_p8 }
  0x1b   :  { %2769 = shalt.err (!%p2766_p10)
}
  0x1c   :  { %s2770_s26 = scalar_lea.vmem %s3032_s24, 6144  ;;  %p2775_p12 = scmp.lt.s32.totalorder %s3032_s24, %s3032_s24 }
  0x1d   :  { %p2771_p11 = scmp.ne.s32.totalorder %s3032_s24, %s2770_s26  ;;  %p2776_p13 = scmp.lt.s32.totalorder %s2770_s26, %s2770_s26 }
  0x1f   :  { %p2777_p0 = por %p2776_p13, %p2775_p12 }
  0x21   :  { %p2778_p1 = pnand %p2777_p0, %p2771_p11 }
  0x23   :  { %2781 = shalt.err (!%p2778_p1)
}
  0x24   :  { %s2950_s1 = smov 384   ;;  %s2951_s22 = smov 24  }
  0x25   :  { %67 = dma.hbm_to_vmem [thread:$0]  %s3351_s3, 6144, %s3032_s24, [#allocation10], %s2950_s1, %s2950_s1, %s2951_s22  }
  0x26   :  { %s2952_s29 = smov [#allocation12]   ;;  %s2953_s13 = smov [#allocation3]  }
  0x27   :  { %s89_s30 = sshll.u32 %s2952_s29, 4  ;;  %s30_s14 = sshll.u32 %s2953_s13, 4  ;;  %s90_s30 = int_to_ptr.vmem [resolvable:$true] %s89_s30  ;;  %s31_s14 = int_to_ptr.vmem [resolvable:$true] %s30_s14 }
  0x28   :  { %s2782_s17 = scalar_lea.hbm %s3355_s7, 4096 }
  0x29   :  { %p2783_p2 = scmp.ne.s32.totalorder %s3355_s7, %s2782_s17  ;;  %p2786_p3 = scmp.lt.u32.totalorder %s2782_s17, %s3355_s7 }
  0x2b   :  { %p2788_p4 = pnand %p2786_p3, %p2783_p2 }
  0x2d   :  { %2791 = shalt.err (!%p2788_p4)
}
  0x2e   :  { %s2792_s3 = scalar_lea.vmem %s90_s30, 4096  ;;  %p2797_p6 = scmp.lt.s32.totalorder %s90_s30, %s90_s30 }
  0x2f   :  { %p2793_p5 = scmp.ne.s32.totalorder %s90_s30, %s2792_s3  ;;  %p2798_p7 = scmp.lt.s32.totalorder %s2792_s3, %s2792_s3 }
  0x31   :  { %p2799_p8 = por %p2798_p7, %p2797_p6 }
  0x33   :  { %p2800_p9 = pnand %p2799_p8, %p2793_p5 }
  0x35   :  { %2803 = shalt.err (!%p2800_p9)
}
  0x36   :  { %s2954_s24 = smov 128   ;;  %s2955_s23 = smov 8  }
  0x37   :  { %95 = dma.hbm_to_vmem [thread:$0]  %s3355_s7, 4096, %s90_s30, [#allocation13], %s2954_s24, %s2954_s24, %s2955_s23  }
  0x38   :  { %s2804_s29 = scalar_lea.hbm %s3348_s0, 128 }
  0x39   :  { %p2805_p10 = scmp.ne.s32.totalorder %s3348_s0, %s2804_s29  ;;  %p2808_p11 = scmp.lt.u32.totalorder %s2804_s29, %s3348_s0 }
  0x3b   :  { %p2810_p12 = pnand %p2808_p11, %p2805_p10 }
  0x3d   :  { %2813 = shalt.err (!%p2810_p12)
}
  0x3e   :  { %s2814_s18 = scalar_lea.vmem %s31_s14, 128  ;;  %p2819_p0 = scmp.lt.s32.totalorder %s31_s14, %s31_s14 }
  0x3f   :  { %p2815_p13 = scmp.ne.s32.totalorder %s31_s14, %s2814_s18  ;;  %p2820_p1 = scmp.lt.s32.totalorder %s2814_s18, %s2814_s18 }
  0x41   :  { %p2821_p2 = por %p2820_p1, %p2819_p0 }
  0x43   :  { %p2822_p3 = pnand %p2821_p2, %p2815_p13 }
  0x45   :  { %2825 = shalt.err (!%p2822_p3)
}
  0x46   :  { %33 = dma.hbm_to_vmem [thread:$0]  %s3348_s0, 128, %s31_s14, [#allocation4]  }
  0x47   :  { %s2956_s19 = smov [#allocation8]   ;;  %s2957_s21 = smov [#allocation11]  }
  0x48   :  { %s49_s20 = sshll.u32 %s2956_s19, 4  ;;  %s73_s3 = sshll.u32 %s2957_s21, 4  ;;  %s50_s20 = int_to_ptr.vmem [resolvable:$true] %s49_s20  ;;  %s3093_s3 = int_to_ptr.vmem [resolvable:$true] %s73_s3 }
  0x49   :  { %s2826_s27 = scalar_lea.hbm %s3350_s2, 1024 }
  0x4a   :  { %p2827_p4 = scmp.ne.s32.totalorder %s3350_s2, %s2826_s27  ;;  %p2830_p5 = scmp.lt.u32.totalorder %s2826_s27, %s3350_s2 }
  0x4c   :  { %p2832_p6 = pnand %p2830_p5, %p2827_p4 }
  0x4e   :  { %2835 = shalt.err (!%p2832_p6)
}
  0x4f   :  { %s2836_s0 = scalar_lea.vmem %s50_s20, 1024  ;;  %p2841_p8 = scmp.lt.s32.totalorder %s50_s20, %s50_s20 }
  0x50   :  { %p2837_p7 = scmp.ne.s32.totalorder %s50_s20, %s2836_s0  ;;  %p2842_p9 = scmp.lt.s32.totalorder %s2836_s0, %s2836_s0 }
  0x52   :  { %p2843_p10 = por %p2842_p9, %p2841_p8 }
  0x54   :  { %p2844_p11 = pnand %p2843_p10, %p2837_p7 }
  0x56   :  { %2847 = shalt.err (!%p2844_p11)
}
  0x57   :  { %55 = dma.hbm_to_vmem [thread:$0]  %s3350_s2, 1024, %s50_s20, [#allocation7], %s2954_s24, %s2954_s24, %s2955_s23  }
  0x58   :  { %s2848_s7 = scalar_lea.hbm %s3352_s4, 6144 }
  0x59   :  { %p2849_p12 = scmp.ne.s32.totalorder %s3352_s4, %s2848_s7  ;;  %p2852_p13 = scmp.lt.u32.totalorder %s2848_s7, %s3352_s4 }
  0x5b   :  { %p2854_p0 = pnand %p2852_p13, %p2849_p12 }
  0x5d   :  { %2857 = shalt.err (!%p2854_p0)
}
  0x5e   :  { %s2858_s26 = scalar_lea.vmem %s3093_s3, 6144  ;;  %p2863_p2 = scmp.lt.s32.totalorder %s3093_s3, %s3093_s3 }
  0x5f   :  { %p2859_p1 = scmp.ne.s32.totalorder %s3093_s3, %s2858_s26  ;;  %p2864_p3 = scmp.lt.s32.totalorder %s2858_s26, %s2858_s26 }
  0x61   :  { %p2865_p4 = por %p2864_p3, %p2863_p2 }
  0x63   :  { %p2866_p5 = pnand %p2865_p4, %p2859_p1 }
  0x65   :  { %2869 = shalt.err (!%p2866_p5)
}
  0x66   :  { %79 = dma.hbm_to_vmem [thread:$0]  %s3352_s4, 6144, %s3093_s3, [#allocation10], %s2950_s1, %s2950_s1, %s2951_s22  }
  0x67   :  { %s2958_s23 = smov [#allocation14]   ;;  %s2870_s29 = scalar_lea.hbm %s3357_s9, 1024 }
  0x68   :  { %s103_s20 = sshll.u32 %s2958_s23, 4  ;;  %p2871_p6 = scmp.ne.s32.totalorder %s3357_s9, %s2870_s29  ;;  %s104_s20 = int_to_ptr.vmem [resolvable:$true] %s103_s20 }
  0x69   :  { %p2874_p7 = scmp.lt.u32.totalorder %s2870_s29, %s3357_s9 }
  0x6b   :  { %p2876_p8 = pnand %p2874_p7, %p2871_p6 }
  0x6d   :  { %2879 = shalt.err (!%p2876_p8)
}
  0x6e   :  { %s2880_s16 = scalar_lea.vmem %s104_s20, 1024  ;;  %p2885_p10 = scmp.lt.s32.totalorder %s104_s20, %s104_s20 }
  0x6f   :  { %p2881_p9 = scmp.ne.s32.totalorder %s104_s20, %s2880_s16  ;;  %p2886_p11 = scmp.lt.s32.totalorder %s2880_s16, %s2880_s16 }
  0x71   :  { %p2887_p12 = por %p2886_p11, %p2885_p10 }
  0x73   :  { %p2888_p13 = pnand %p2887_p12, %p2881_p9 }
  0x75   :  { %2891 = shalt.err (!%p2888_p13)
}
  0x76   :  { %s2959_s4 = smov 64   ;;  %s2960_s1 = smov 4  }
  0x77   :  { %109 = dma.hbm_to_vmem [thread:$0]  %s3357_s9, 1024, %s104_s20, [#allocation13], %s2959_s4, %s2959_s4, %s2960_s1  }
  0x78   :  { %2936 = dma.done.wait [#allocation4], 128  }
  0x79   :  { %2937 = vsyncadd [#allocation4], 4294967168 }
  0x7a   :  { %2938 = dma.done.wait [#allocation7], 1152  }
  0x7b   :  { %2939 = vsyncadd [#allocation7], 4294966144 }
  0x7c   :  { %2940 = dma.done.wait [#allocation10], 12288  }
  0x7d   :  { %2941 = vsyncadd [#allocation10], 4294955008 }
  0x7e   :  { %2942 = dma.done.wait [#allocation13], 5120  }
  0x7f   :  { %2943 = vsyncadd [#allocation13], 4294962176  ;;  %v2961_v0 = vmov 0.0|0.0   ;;  %v2962_v1 = vmov 0.0   ;;  %vm2963_vm0 = vmmov 0   ;;  %v141_v2 = vld [vmem:[#allocation9 + $0x8] sm:$0xff] }
  0x80   :  { %2545 = vmatprep.subr.bf16.mxu1 %v2961_v0  ;;  %269 = vmatprep.mubr.f32.mxu0 %v2962_v1  ;;  %v144_v3 = vld [vmem:[#allocation9 + $0x20] sm:$0xff]  ;;  %v143_v6 = vld [vmem:[#allocation9 + $0x18] sm:$0xff]  ;;  %v150_v8 = vld [vmem:[#allocation9 + $0x50] sm:$0xff]  ;;  %vm1200_vm1 = vcmask 57344   ;;  %vm1313_vm2 = vcmask 64512   ;;  %vm1907_vm3 = vcmask 1041409  }
  0x81   :  { %2375 = vmatprep.mubr.msk.f32.mxu1 %vm2963_vm0, %v2962_v1  ;;  %v140_v4 = vld [vmem:[#allocation9] sm:$0xff]  ;;  %v2513_v5 = vpack.c.bf16 %v144_v3, %v141_v2  ;;  %v147_v7 = vld [vmem:[#allocation9 + $0x38] sm:$0xff]  ;;  %v146_v11 = vld [vmem:[#allocation9 + $0x30] sm:$0xff]  ;;  %vm1910_vm4 = vcmask 1042434   ;;  %vm1913_vm5 = vcmask 1043459   ;;  %vm1916_vm6 = vcmask 1044484  }
  0x82   :  { %v2515_v9 = vpack.c.bf16 %v143_v6, %v140_v4  ;;  %v2517_v10 = vpack.c.bf16 %v150_v8, %v147_v7  ;;  %v149_v12 = vld [vmem:[#allocation9 + $0x48] sm:$0xff]  ;;  %v156_v14 = vld [vmem:[#allocation9 + $0x80] sm:$0xff]  ;;  %v155_v18 = vld [vmem:[#allocation9 + $0x78] sm:$0xff]  ;;  %vm1919_vm7 = vcmask 1045509   ;;  %vm1922_vm8 = vcmask 1046534  }
  0x83   :  { %v153_v13 = vld [vmem:[#allocation9 + $0x68] sm:$0xff]  ;;  %2514 = vmatprep.subr.bf16.mxu0 %v2513_v5  ;;  %v2519_v15 = vpack.c.bf16 %v149_v12, %v146_v11  ;;  %v152_v17 = vld [vmem:[#allocation9 + $0x60] sm:$0xff]  ;;  %v159_v19 = vld [vmem:[#allocation9 + $0x98] sm:$0xff]  ;;  %vm1925_vm9 = vcmask 1047559  }
  0x84   :  { %2516 = vmatpush1.bf16.msra.mxu0 %v2515_v9  ;;  %v2521_v16 = vpack.c.bf16 %v156_v14, %v153_v13  ;;  %v162_v20 = vld [vmem:[#allocation9 + $0xb0] sm:$0xff]  ;;  %v2523_v21 = vpack.c.bf16 %v155_v18, %v152_v17  ;;  %v161_v24 = vld [vmem:[#allocation9 + $0xa8] sm:$0xff]  ;;  %v168_v28 = vld [vmem:[#allocation9 + $0xe0] sm:$0xff] }
  0x85   :  { %2518 = vmatprep.subr.bf16.mxu0 %v2517_v10  ;;  %v158_v22 = vld [vmem:[#allocation9 + $0x90] sm:$0xff]  ;;  %v2525_v23 = vpack.c.bf16 %v162_v20, %v159_v19  ;;  %v145_v26 = vld [vmem:[#allocation9 + $0x28] sm:$0xff]  ;;  %v148_v30 = vld [vmem:[#allocation9 + $0x40] sm:$0xff] }
  0x86   :  { %v142_v25 = vld [vmem:[#allocation9 + $0x10] sm:$0xff]  ;;  %v165_v27 = vld [vmem:[#allocation9 + $0xc8] sm:$0xff]  ;;  %v151_v31 = vld [vmem:[#allocation9 + $0x58] sm:$0xff]  ;;  %v2527_v32 = vpack.c.bf16 %v161_v24, %v158_v22 }
  0x87   :  { %v2546_v29 = vpack.c.bf16 %v145_v26, %v142_v25  ;;  %v2549_v33 = vpack.c.bf16 %v151_v31, %v148_v30  ;;  %v2529_v34 = vpack.c.bf16 %v168_v28, %v165_v27  ;;  %v164_v35 = vld [vmem:[#allocation9 + $0xc0] sm:$0xff]  ;;  %v167_v36 = vld [vmem:[#allocation9 + $0xd8] sm:$0xff]  ;;  %v154_v37 = vld [vmem:[#allocation9 + $0x70] sm:$0xff] }
  0x88   :  { %2520 = vmatpush1.bf16.msra.mxu0 %v2519_v15  ;;  %v171_v38 = vld [vmem:[#allocation9 + $0xf8] sm:$0xff]  ;;  %v174_v39 = vld [vmem:[#allocation9 + $0x110] sm:$0xff]  ;;  %v157_v40 = vld [vmem:[#allocation9 + $0x88] sm:$0xff]  ;;  %v2531_v41 = vpack.c.bf16 %v167_v36, %v164_v35 }
  0x89   :  { %2522 = vmatprep.subr.bf16.mxu0 %v2521_v16  ;;  %2547 = vmatpush3.bf16.msra.mxu1 %v2546_v29  ;;  %v170_v42 = vld [vmem:[#allocation9 + $0xf0] sm:$0xff]  ;;  %v2552_v43 = vpack.c.bf16 %v157_v40, %v154_v37  ;;  %v2533_v44 = vpack.c.bf16 %v174_v39, %v171_v38  ;;  %v173_v45 = vld [vmem:[#allocation9 + $0x108] sm:$0xff]  ;;  %v160_v46 = vld [vmem:[#allocation9 + $0xa0] sm:$0xff] }
  0x8a   :  { %2548 = vmatprep.subr.bf16.mxu1 %v2961_v0  ;;  %v163_v47 = vld [vmem:[#allocation9 + $0xb8] sm:$0xff]  ;;  %v177_v48 = vld [vmem:[#allocation9 + $0x128] sm:$0xff]  ;;  %v180_v49 = vld [vmem:[#allocation9 + $0x140] sm:$0xff]  ;;  %v2535_v50 = vpack.c.bf16 %v173_v45, %v170_v42 }
  0x8b   :  { %v176_v51 = vld [vmem:[#allocation9 + $0x120] sm:$0xff]  ;;  %v2555_v52 = vpack.c.bf16 %v163_v47, %v160_v46  ;;  %v2537_v53 = vpack.c.bf16 %v180_v49, %v177_v48  ;;  %v179_v54 = vld [vmem:[#allocation9 + $0x138] sm:$0xff]  ;;  %v166_v55 = vld [vmem:[#allocation9 + $0xd0] sm:$0xff] }
  0x8c   :  { %2524 = vmatpush1.bf16.msra.mxu0 %v2523_v21  ;;  %v169_v56 = vld [vmem:[#allocation9 + $0xe8] sm:$0xff]  ;;  %v183_v57 = vld [vmem:[#allocation9 + $0x158] sm:$0xff]  ;;  %v186_v58 = vld [vmem:[#allocation9 + $0x170] sm:$0xff]  ;;  %v2539_v59 = vpack.c.bf16 %v179_v54, %v176_v51 }
  0x8d   :  { %2526 = vmatprep.subr.bf16.mxu0 %v2525_v23  ;;  %2550 = vmatpush3.bf16.msra.mxu1 %v2549_v33  ;;  %v182_v60 = vld [vmem:[#allocation9 + $0x150] sm:$0xff]  ;;  %v2558_v61 = vpack.c.bf16 %v169_v56, %v166_v55  ;;  %v2541_v62 = vpack.c.bf16 %v186_v58, %v183_v57  ;;  %v185_v63 = vld [vmem:[#allocation9 + $0x168] sm:$0xff]  ;;  %v172_v2 = vld [vmem:[#allocation9 + $0x100] sm:$0xff] }
  0x8e   :  { %2551 = vmatprep.subr.bf16.mxu1 %v2961_v0  ;;  %v175_v3 = vld [vmem:[#allocation9 + $0x118] sm:$0xff]  ;;  %v347_v4 = vld [vmem:[#allocation11 + $0x8] sm:$0xff]  ;;  %v350_v5 = vld [vmem:[#allocation11 + $0x20] sm:$0xff]  ;;  %v2543_v6 = vpack.c.bf16 %v185_v63, %v182_v60 }
  0x8f   :  { %v346_v7 = vld [vmem:[#allocation11] sm:$0xff]  ;;  %v2561_v8 = vpack.c.bf16 %v175_v3, %v172_v2  ;;  %v2569_v9 = vpack.c.bf16 %v350_v5, %v347_v4  ;;  %v349_v10 = vld [vmem:[#allocation11 + $0x18] sm:$0xff]  ;;  %v178_v11 = vld [vmem:[#allocation9 + $0x130] sm:$0xff] }
  0x90   :  { %2528 = vmatpush1.bf16.msra.mxu0 %v2527_v32  ;;  %v181_v12 = vld [vmem:[#allocation9 + $0x148] sm:$0xff]  ;;  %v353_v13 = vld [vmem:[#allocation11 + $0x38] sm:$0xff]  ;;  %v356_v14 = vld [vmem:[#allocation11 + $0x50] sm:$0xff]  ;;  %v2571_v18 = vpack.c.bf16 %v349_v10, %v346_v7 }
  0x91   :  { %2530 = vmatprep.subr.bf16.mxu0 %v2529_v34  ;;  %2553 = vmatpush3.bf16.msra.mxu1 %v2552_v43  ;;  %v138_v15 = vld [vmem:[#allocation3] sm:$0xff]  ;;  %v355_v17 = vld [vmem:[#allocation11 + $0x48] sm:$0xff]  ;;  %v362_v20 = vld [vmem:[#allocation11 + $0x80] sm:$0xff]  ;;  %v2564_v21 = vpack.c.bf16 %v181_v12, %v178_v11  ;;  %v2573_v24 = vpack.c.bf16 %v356_v14, %v353_v13 }
  0x92   :  { %2554 = vmatprep.subr.bf16.mxu1 %v2961_v0  ;;  %v352_v16 = vld [vmem:[#allocation11 + $0x30] sm:$0xff]  ;;  %v359_v19 = vld [vmem:[#allocation11 + $0x68] sm:$0xff]  ;;  %v184_v22 = vld [vmem:[#allocation9 + $0x160] sm:$0xff] }
  0x93   :  { %v187_v23 = vld [vmem:[#allocation9 + $0x178] sm:$0xff]  ;;  %v358_v25 = vld [vmem:[#allocation11 + $0x60] sm:$0xff]  ;;  %v348_v27 = vld [vmem:[#allocation11 + $0x10] sm:$0xff]  ;;  %v2575_v29 = vpack.c.bf16 %v355_v17, %v352_v16  ;;  %v2577_v31 = vpack.c.bf16 %v362_v20, %v359_v19 }
  0x94   :  { %2532 = vmatpush1.bf16.msra.mxu0 %v2531_v41  ;;  %v361_v26 = vld [vmem:[#allocation11 + $0x78] sm:$0xff]  ;;  %v351_v28 = vld [vmem:[#allocation11 + $0x28] sm:$0xff]  ;;  %v2567_v30 = vpack.c.bf16 %v187_v23, %v184_v22  ;;  %v368_v33 = vld [vmem:[#allocation11 + $0xb0] sm:$0xff] }
  0x95   :  { %2534 = vmatprep.subr.bf16.mxu0 %v2533_v44  ;;  %2556 = vmatpush3.bf16.msra.mxu1 %v2555_v52  ;;  %v365_v32 = vld [vmem:[#allocation11 + $0x98] sm:$0xff]  ;;  %v2579_v34 = vpack.c.bf16 %v361_v26, %v358_v25  ;;  %v364_v35 = vld [vmem:[#allocation11 + $0x90] sm:$0xff]  ;;  %v2602_v36 = vpack.c.bf16 %v351_v28, %v348_v27  ;;  %v367_v38 = vld [vmem:[#allocation11 + $0xa8] sm:$0xff]  ;;  %v190_v27 = vlaneseq }
  0x96   :  { %2557 = vmatprep.subr.bf16.mxu1 %v2961_v0  ;;  %v2581_v37 = vpack.c.bf16 %v368_v33, %v365_v32  ;;  %v354_v39 = vld [vmem:[#allocation11 + $0x40] sm:$0xff]  ;;  %v357_v40 = vld [vmem:[#allocation11 + $0x58] sm:$0xff]  ;;  %v371_v41 = vld [vmem:[#allocation11 + $0xc8] sm:$0xff]  ;;  %v2583_v43 = vpack.c.bf16 %v367_v38, %v364_v35 }
  0x97   :  { %v374_v42 = vld [vmem:[#allocation11 + $0xe0] sm:$0xff]  ;;  %v2605_v45 = vpack.c.bf16 %v357_v40, %v354_v39  ;;  %v373_v47 = vld [vmem:[#allocation11 + $0xd8] sm:$0xff]  ;;  %v360_v48 = vld [vmem:[#allocation11 + $0x70] sm:$0xff]  ;;  %v191_v28 = vshrl.u32 %v190_v27, 7 }
  0x98   :  { %2536 = vmatpush1.bf16.msra.mxu0 %v2535_v50  ;;  %v370_v44 = vld [vmem:[#allocation11 + $0xc0] sm:$0xff]  ;;  %v2585_v46 = vpack.c.bf16 %v374_v42, %v371_v41  ;;  %v363_v49 = vld [vmem:[#allocation11 + $0x88] sm:$0xff]  ;;  %v377_v50 = vld [vmem:[#allocation11 + $0xf8] sm:$0xff] }
  0x99   :  { %2538 = vmatprep.subr.bf16.mxu0 %v2537_v53  ;;  %2559 = vmatpush3.bf16.msra.mxu1 %v2558_v61  ;;  %v380_v51 = vld [vmem:[#allocation11 + $0x110] sm:$0xff]  ;;  %v2587_v52 = vpack.c.bf16 %v373_v47, %v370_v44  ;;  %v2608_v54 = vpack.c.bf16 %v363_v49, %v360_v48  ;;  %v379_v56 = vld [vmem:[#allocation11 + $0x108] sm:$0xff]  ;;  %v366_v57 = vld [vmem:[#allocation11 + $0xa0] sm:$0xff]  ;;  %v196_v32 = vsub.s32 1, %v191_v28  ;;  %v200_v49 = vsub.s32 2, %v191_v28 }
  0x9a   :  { %2560 = vmatprep.subr.bf16.mxu1 %v2961_v0  ;;  %v376_v53 = vld [vmem:[#allocation11 + $0xf0] sm:$0xff]  ;;  %v2589_v55 = vpack.c.bf16 %v380_v51, %v377_v50  ;;  %v369_v58 = vld [vmem:[#allocation11 + $0xb8] sm:$0xff]  ;;  %v386_v60 = vld [vmem:[#allocation11 + $0x140] sm:$0xff] }
  0x9b   :  { %v2591_v61 = vpack.c.bf16 %v379_v56, %v376_v53  ;;  %v2611_v63 = vpack.c.bf16 %v369_v58, %v366_v57  ;;  %v385_v3 = vld [vmem:[#allocation11 + $0x138] sm:$0xff]  ;;  %v372_v4 = vld [vmem:[#allocation11 + $0xd0] sm:$0xff]  ;;  %v375_v5 = vld [vmem:[#allocation11 + $0xe8] sm:$0xff] }
  0x9c   :  { %2540 = vmatpush1.bf16.msra.mxu0 %v2539_v59  ;;  %v383_v59 = vld [vmem:[#allocation11 + $0x128] sm:$0xff]  ;;  %v392_v7 = vld [vmem:[#allocation11 + $0x170] sm:$0xff]  ;;  %v2614_v10 = vpack.c.bf16 %v375_v5, %v372_v4  ;;  %v378_v13 = vld [vmem:[#allocation11 + $0x100] sm:$0xff] }
  0x9d   :  { %2542 = vmatprep.subr.bf16.mxu0 %v2541_v62  ;;  %2562 = vmatpush3.bf16.msra.mxu1 %v2561_v8  ;;  %v382_v62 = vld [vmem:[#allocation11 + $0x120] sm:$0xff]  ;;  %v2593_v2 = vpack.c.bf16 %v386_v60, %v383_v59  ;;  %v391_v12 = vld [vmem:[#allocation11 + $0x168] sm:$0xff]  ;;  %v381_v14 = vld [vmem:[#allocation11 + $0x118] sm:$0xff]  ;;  %v2964_v59 = vmov 1966171168  }
  0x9e   :  { %2563 = vmatprep.subr.bf16.mxu1 %v2961_v0  ;;  %v2595_v8 = vpack.c.bf16 %v385_v3, %v382_v62  ;;  %v2617_v16 = vpack.c.bf16 %v381_v14, %v378_v13  ;;  %v384_v17 = vld [vmem:[#allocation11 + $0x130] sm:$0xff]  ;;  %v3162_v19 = vld [vmem:[#allocation6] sm:$0xff]  ;;  %v3176_v25 = vld [vmem:[#allocation8 + $0x8] sm:$0xff]  ;;  %v585_v60 = vunpack.c.l.s4 %v2964_v59 }
  0x9f   :  { %v393_v22 = vld [vmem:[#allocation11 + $0x178] sm:$0xff] }
  0xa0   :  { %2544 = vmatpush1.bf16.msra.mxu0 %v2543_v6  ;;  %v389_v6 = vld [vmem:[#allocation11 + $0x158] sm:$0xff]  ;;  %v586_v62 = vunpack.c.0.s8 %v585_v60 }
  0xa1   :  { %2570 = vmatprep.subr.bf16.mxu0 %v2569_v9  ;;  %2565 = vmatpush3.bf16.msra.mxu1 %v2564_v21  ;;  %v388_v9 = vld [vmem:[#allocation11 + $0x150] sm:$0xff]  ;;  %v2597_v11 = vpack.c.bf16 %v392_v7, %v389_v6  ;;  %v390_v21 = vld [vmem:[#allocation11 + $0x160] sm:$0xff]  ;;  %v3198_v13 = vld [vmem:[#allocation8 + $0x18] sm:$0xff] }
  0xa2   :  { %2566 = vmatprep.subr.bf16.mxu1 %v2961_v0  ;;  %v2623_v23 = vpack.c.bf16 %v393_v22, %v390_v21  ;;  %v589_v3 = vsub.s32 %v586_v62, %v191_v28  ;;  %v3216_v21 = vld [vmem:[#allocation8 + $0x30] sm:$0xff] }
  0xa3   :  { %270 = vmatmul.mubr.f32.vlgmr.msra.gmra.mrb[0].mxu0 %v138_v15 }
  0xa4   :  { %2572 = vmatpush1.bf16.msra.mxu0 %v2571_v18  ;;  %475 = vmatprep.mubr.f32.mxu0 %v2962_v1  ;;  %v387_v18 = vld [vmem:[#allocation11 + $0x148] sm:$0xff] }
  0xa5   :  { %2574 = vmatprep.subr.bf16.mxu0 %v2573_v24  ;;  %2568 = vmatpush3.bf16.msra.mxu1 %v2567_v30  ;;  %v2620_v20 = vpack.c.bf16 %v387_v18, %v384_v17  ;;  %v3174_v24 = vld [vmem:[#allocation8] sm:$0xff]  ;;  %v394_v30 = vld [vmem:[%s3354_s6] sm:$0x7]  ;;  %v3210_v18 = vld [vmem:[#allocation8 + $0x28] sm:$0xff] }
  0xa6   :  { %2601 = vmatprep.subr.bf16.mxu1 %v2961_v0  ;;  %v407_v50 = vrot.slane %v394_v30, %v200_v49 }
  0xa8   :  { %2576 = vmatpush1.bf16.msra.mxu0 %v2575_v29  ;;  %2376 = vmatmul.mubr.f32.vlgmr.msra.gmra.mrb[0].mxu1 %v138_v15  ;;  %v2599_v15 = vpack.c.bf16 %v391_v12, %v388_v9  ;;  %v192_v29 = vsub.s32 0, %v191_v28 }
  0xa9   :  { %2578 = vmatprep.subr.bf16.mxu0 %v2577_v31  ;;  %2603 = vmatpush3.bf16.msra.mxu1 %v2602_v36  ;;  %v188_v31 = vld [vmem:[%s3353_s5] sm:$0x7]  ;;  %v403_v36 = vrot.slane %v394_v30, %v196_v32 }
  0xaa   :  { %2604 = vmatprep.subr.bf16.mxu1 %v2961_v0  ;;  %2410 = vmatprep.mubr.msk.f32.mxu1 %vm2963_vm0, %v2962_v1  ;;  %v193_v33 = vrot.slane %v188_v31, %v192_v29  ;;  %v197_v35 = vrot.slane %v188_v31, %v196_v32 }
  0xac   :  { %2580 = vmatpush1.bf16.msra.mxu0 %v2579_v34  ;;  %v399_v34 = vrot.slane %v394_v30, %v192_v29  ;;  %v2659_v39 = vadd.f32 %v403_v36, %v197_v35 }
  0xad   :  { %2582 = vmatprep.subr.bf16.mxu0 %v2581_v37  ;;  %2606 = vmatpush3.bf16.msra.mxu1 %v2605_v45 }
  0xae   :  { %2607 = vmatprep.subr.bf16.mxu1 %v2961_v0  ;;  %v2657_v37 = vadd.f32 %v399_v34, %v193_v33 }
  0xb0   :  { %2584 = vmatpush1.bf16.msra.mxu0 %v2583_v43 }
  0xb1   :  { %2586 = vmatprep.subr.bf16.mxu0 %v2585_v46  ;;  %2609 = vmatpush3.bf16.msra.mxu1 %v2608_v54 }
  0xb2   :  { %2610 = vmatprep.subr.bf16.mxu1 %v2961_v0 }
  0xb4   :  { %2588 = vmatpush1.bf16.msra.mxu0 %v2587_v52  ;;  %v201_v52 = vrot.slane %v188_v31, %v200_v49 }
  0xb5   :  { %2590 = vmatprep.subr.bf16.mxu0 %v2589_v55  ;;  %2612 = vmatpush3.bf16.msra.mxu1 %v2611_v63 }
  0xb6   :  { %2613 = vmatprep.subr.bf16.mxu1 %v2961_v0 }
  0xb8   :  { %2592 = vmatpush1.bf16.msra.mxu0 %v2591_v61 }
  0xb9   :  { %2594 = vmatprep.subr.bf16.mxu0 %v2593_v2  ;;  %2615 = vmatpush3.bf16.msra.mxu1 %v2614_v10  ;;  %v3196_v10 = vld [vmem:[#allocation8 + $0x10] sm:$0xff] }
  0xba   :  { %2616 = vmatprep.subr.bf16.mxu1 %v2961_v0 }
  0xbc   :  { %2596 = vmatpush1.bf16.msra.mxu0 %v2595_v8 }
  0xbd   :  { %2598 = vmatprep.subr.bf16.mxu0 %v2597_v11  ;;  %2618 = vmatpush3.bf16.msra.mxu1 %v2617_v16  ;;  %v3204_v16 = vld [vmem:[#allocation8 + $0x20] sm:$0xff] }
  0xbe   :  { %2619 = vmatprep.subr.bf16.mxu1 %v2961_v0 }
  0xc0   :  { %2600 = vmatpush1.bf16.msra.mxu0 %v2599_v15 }
  0xc1   :  { %2413 = vmatprep.subr.mxu0 %v2962_v1  ;;  %2621 = vmatpush3.bf16.msra.mxu1 %v2620_v20 }
  0xc2   :  { %2622 = vmatprep.subr.bf16.mxu1 %v2961_v0 }
  0xc3   :  { %476 = vmatmul.mubr.f32.vlgmr.msra.gmra.mrb[0].mxu0 %v3162_v19 }
  0xc4   :  { %2415 = vmatprep.mubr.msk.f32.mxu0 %vm2963_vm0, %v2962_v1 }
  0xc5   :  { %2624 = vmatpush3.bf16.msra.mxu1 %v2623_v23  ;;  %v3222_v23 = vld [vmem:[#allocation8 + $0x38] sm:$0xff] }
  0xc6   :  { %2418 = vmatprep.subr.mxu1 %v2962_v1 }
  0xc8   :  { %2411 = vmatmul.mubr.f32.vlgmr.msra.gmra.mrb[2].mxu1 %v3162_v19 }
  0xc9   :  { %2420 = vmatprep.mubr.msk.f32.mxu1 %vm2963_vm0, %v2962_v1  ;;  %2414 = vmatpush3.xpose.msra.mxu0 %v3174_v24 }
  0xca   :  { %2423 = vmatprep.subr.mxu0 %v2962_v1 }
  0xce   :  { %2419 = vmatpush3.xpose.msra.mxu1 %v3176_v25 }
  0xcf   :  { %2428 = vmatprep.subr.mxu1 %v2962_v1 }
 0x17b   :  { %v342_v0 = vpop.f32.mrb[0].mxu1 }
 0x17c   :  { %v2377_v26 = vpop.f32.mrb[1].mxu1  ;;  %v343_v56 = vadd.f32 %v342_v0, %v201_v52 }
 0x196   :  { %v477_v38 = vpop.f32.mrb[0].mxu0 }
 0x197   :  { %v2658_v40 = vadd.f32 %v2657_v37, %v477_v38  ;;  %v479_v41 = vpop.f32.mrb[1].mxu0 }
 0x198   :  { %v2660_v43 = vadd.f32 %v2659_v39, %v479_v41 }
 0x199   :  { %v2213_v42 = vmul.f32 -1.442695, %v2658_v40 }
 0x19a   :  { %v2214_v44 = vmul.f32 -1.442695, %v2660_v43 }
 0x19b   :  { %2690 = vpow2.f32 %v2213_v42  ;;  %v548_v45 = vpop.f32.mrb[2].mxu1 }
 0x19c   :  { %v2412_v46 = vpop.f32.mrb[3].mxu1  ;;  %2692 = vpow2.f32 %v2214_v44  ;;  %v549_v54 = vadd.f32 %v548_v45, %v407_v50 }
 0x1a5   :  { %v2691_v47 = vpop.eup %2690 }
 0x1a6   :  { %v556_v48 = vadd.f32 1.0, %v2691_v47  ;;  %v2693_v51 = vpop.eup %2692 }
 0x1a7   :  { %v563_v53 = vadd.f32 1.0, %v2693_v51 }
 0x1a8   :  { %2694 = vrcp.f32 %v556_v48 }
 0x1a9   :  { %2696 = vrcp.f32 %v563_v53 }
 0x1b2   :  { %v2695_v55 = vpop.eup %2694 }
 0x1b3   :  { %v566_v57 = vmul.f32 %v2695_v55, %v549_v54  ;;  %v2697_v61 = vpop.eup %2696 }
 0x1b4   :  { %v569_v63 = vsub.f32 1.0, %v2697_v61  ;;  %v571_v4 = vmul.f32 %v2697_v61, %v3162_v19 }
 0x1b5   :  { %v567_v58 = vadd.f32 %v566_v57, %v343_v56 }
 0x1b7   :  { %2698 = vtanh.f32 %v567_v58 }
 0x1c1   :  { %v2699_v2 = vpop.eup %2698 }
 0x1c2   :  { %v570_v5 = vmul.f32 %v2699_v2, %v569_v63 }
 0x1c4   :  { %v3190_v6 = vadd.f32 %v571_v4, %v570_v5 }
 0x1c6   :  { %v590_v7 = vrot.slane %v3190_v6, %v589_v3  ;;  %573 = vst [vmem:[#allocation16] sm:$0xff] %v3190_v6  ;;  %v583_v8 = vcombine.high %v3190_v6, %v3190_v6 }
 0x1c8   :  { %v606_v9 = vrot.slane %v590_v7, %v589_v3  ;;  %v598_v11 = vcombine.high %v590_v7, %v590_v7  ;;  %v597_v14 = vrot.slane %v583_v8, %v589_v3 }
 0x1ca   :  { %2416 = vmatmul.mubr.f32.vlgmr.msra.gmra.mrb[2].mxu0 %v606_v9  ;;  %v620_v12 = vrot.slane %v598_v11, %v589_v3  ;;  %v628_v15 = vcombine.high %v606_v9, %v606_v9  ;;  %v599_v19 = vcombine.high %v597_v14, %v597_v14  ;;  %v613_v20 = vrot.slane %v597_v14, %v589_v3 }
 0x1cb   :  { %2424 = vmatpush3.xpose.msra.mxu0 %v3196_v10  ;;  %2425 = vmatprep.mubr.msk.f32.mxu0 %vm2963_vm0, %v2962_v1 }
 0x1cc   :  { %2421 = vmatmul.mubr.f32.vlgmr.msra.gmra.mrb[4].mxu1 %v620_v12  ;;  %2433 = vmatprep.subr.mxu0 %v2962_v1  ;;  %v630_v17 = vcombine.high %v620_v12, %v620_v12  ;;  %v627_v22 = vrot.slane %v599_v19, %v589_v3  ;;  %v629_v0 = vcombine.high %v613_v20, %v613_v20 }
 0x1cd   :  { %2429 = vmatpush3.xpose.msra.mxu1 %v3198_v13  ;;  %2430 = vmatprep.mubr.msk.f32.mxu1 %vm2963_vm0, %v2962_v1 }
 0x1ce   :  { %2426 = vmatmul.mubr.f32.vlgmr.msra.gmra.mrb[4].mxu0 %v628_v15  ;;  %2438 = vmatprep.subr.mxu1 %v2962_v1  ;;  %v631_v26 = vcombine.high %v627_v22, %v627_v22 }
 0x1cf   :  { %2434 = vmatpush3.xpose.msra.mxu0 %v3204_v16  ;;  %2435 = vmatprep.mubr.msk.f32.mxu0 %vm2963_vm0, %v2962_v1 }
 0x1d0   :  { %2431 = vmatmul.mubr.f32.vlgmr.msra.gmra.mrb[6].mxu1 %v630_v17  ;;  %2443 = vmatprep.subr.mxu0 %v2962_v1 }
 0x1d1   :  { %2439 = vmatpush3.xpose.msra.mxu1 %v3210_v18  ;;  %2440 = vmatprep.mubr.msk.f32.mxu1 %vm2963_vm0, %v2962_v1 }
 0x1d2   :  { %2436 = vmatmul.mubr.f32.vlgmr.msra.gmra.mrb[6].mxu0 %v613_v20  ;;  %2448 = vmatprep.subr.mxu1 %v2962_v1 }
 0x1d3   :  { %2444 = vmatpush3.xpose.msra.mxu0 %v3216_v21  ;;  %2445 = vmatprep.mubr.msk.f32.mxu0 %vm2963_vm0, %v2962_v1 }
 0x1d4   :  { %2441 = vmatmul.mubr.f32.vlgmr.msra.gmra.mrb[8].mxu1 %v627_v22  ;;  %2453 = vmatprep.subr.mxu0 %v2962_v1 }
 0x1d5   :  { %2449 = vmatpush3.xpose.msra.mxu1 %v3222_v23  ;;  %2450 = vmatprep.mubr.msk.f32.mxu1 %vm2963_vm0, %v2962_v1 }
 0x1d6   :  { %2446 = vmatmul.mubr.f32.vlgmr.msra.gmra.mrb[8].mxu0 %v629_v0  ;;  %2458 = vmatprep.subr.mxu1 %v2962_v1 }
 0x1d7   :  { %2454 = vmatpush3.msra.mxu0 %v3174_v24  ;;  %2455 = vmatprep.mubr.msk.f32.mxu0 %vm2963_vm0, %v2962_v1 }
 0x1d8   :  { %2451 = vmatmul.mubr.f32.vlgmr.msra.gmra.mrb[10].mxu1 %v631_v26  ;;  %2463 = vmatprep.subr.mxu0 %v2962_v1 }
 0x1d9   :  { %2459 = vmatpush3.msra.mxu1 %v3176_v25  ;;  %2460 = vmatprep.mubr.msk.f32.mxu1 %vm2963_vm0, %v2962_v1 }
 0x1da   :  { %2468 = vmatprep.subr.mxu1 %v2962_v1 }
 0x29d   :  { %v706_v28 = vpop.f32.mrb[2].mxu0 }
 0x29e   :  { %v2417_v29 = vpop.f32.mrb[3].mxu0  ;;  %v1201_v30 = vsel %vm1200_vm1, %v706_v28, -inf }
 0x29f   :  { %1202 = vmax.xlane.f32.xlu0 %v1201_v30  ;;  %v776_v24 = vpop.f32.mrb[4].mxu1 }
 0x2a0   :  { %v2422_v31 = vpop.f32.mrb[5].mxu1  ;;  %v1204_v35 = vsel %vm1200_vm1, %v776_v24, -inf }
 0x2a1   :  { %v846_v32 = vpop.f32.mrb[4].mxu0 }
 0x2a2   :  { %v2427_v33 = vpop.f32.mrb[5].mxu0  ;;  %v1207_v34 = vsel %vm1200_vm1, %v846_v32, -inf }
 0x2a3   :  { %1208 = vmax.xlane.f32.xlu1 %v1207_v34  ;;  %1205 = vmax.xlane.f32.xlu0 %v1204_v35  ;;  %v916_v25 = vpop.f32.mrb[6].mxu1 }
 0x2a4   :  { %v2432_v36 = vpop.f32.mrb[7].mxu1  ;;  %v1210_v39 = vsel %vm1200_vm1, %v916_v25, -inf }
 0x2a5   :  { %v986_v37 = vpop.f32.mrb[6].mxu0 }
 0x2a6   :  { %v2437_v38 = vpop.f32.mrb[7].mxu0  ;;  %v1213_v40 = vsel %vm1200_vm1, %v986_v37, -inf }
 0x2a7   :  { %1211 = vmax.xlane.f32.xlu1 %v1210_v39  ;;  %1214 = vmax.xlane.f32.xlu0 %v1213_v40  ;;  %v1056_v41 = vpop.f32.mrb[8].mxu1 }
 0x2a8   :  { %v2442_v42 = vpop.f32.mrb[9].mxu1  ;;  %v1216_v46 = vsel %vm1200_vm1, %v1056_v41, -inf }
 0x2a9   :  { %v1126_v43 = vpop.f32.mrb[8].mxu0 }
 0x2aa   :  { %v2447_v44 = vpop.f32.mrb[9].mxu0  ;;  %v1219_v45 = vsel %vm1200_vm1, %v1126_v43, -inf }
 0x2ab   :  { %1220 = vmax.xlane.f32.xlu0 %v1219_v45  ;;  %1217 = vmax.xlane.f32.xlu1 %v1216_v46  ;;  %v1196_v47 = vpop.f32.mrb[10].mxu1 }
 0x2ac   :  { %v2452_v48 = vpop.f32.mrb[11].mxu1  ;;  %v1222_v49 = vsel %vm1200_vm1, %v1196_v47, -inf }
 0x2af   :  { %1223 = vmax.xlane.f32.xlu1 %v1222_v49 }
 0x32c   :  { %v1203_v50 = vpop.xlane.xlu0 %1202 }
 0x32d   :  { %v1225_v51 = vsub.f32 %v706_v28, %v1203_v50 }
 0x32f   :  { %v1233_v52 = vmul.f32 1.442695, %v1225_v51 }
 0x330   :  { %v1209_v53 = vpop.xlane.xlu1 %1208  ;;  %v1206_v54 = vpop.xlane.xlu0 %1205 }
 0x331   :  { %2700 = vpow2.f32 %v1233_v52  ;;  %v1227_v55 = vsub.f32 %v846_v32, %v1209_v53  ;;  %v1226_v56 = vsub.f32 %v776_v24, %v1206_v54 }
 0x333   :  { %v1237_v57 = vmul.f32 1.442695, %v1227_v55  ;;  %v1235_v58 = vmul.f32 1.442695, %v1226_v56 }
 0x334   :  { %v1212_v59 = vpop.xlane.xlu1 %1211  ;;  %v1215_v60 = vpop.xlane.xlu0 %1214 }
 0x335   :  { %2702 = vpow2.f32 %v1237_v57  ;;  %v1228_v61 = vsub.f32 %v916_v25, %v1212_v59  ;;  %v1229_v62 = vsub.f32 %v986_v37, %v1215_v60 }
 0x336   :  { %2704 = vpow2.f32 %v1235_v58 }
 0x337   :  { %v1239_v63 = vmul.f32 1.442695, %v1228_v61  ;;  %v1241_v2 = vmul.f32 1.442695, %v1229_v62 }
 0x338   :  { %v1221_v3 = vpop.xlane.xlu0 %1220  ;;  %v1218_v4 = vpop.xlane.xlu1 %1217 }
 0x339   :  { %2706 = vpow2.f32 %v1239_v63  ;;  %v1231_v5 = vsub.f32 %v1126_v43, %v1221_v3  ;;  %v1230_v7 = vsub.f32 %v1056_v41, %v1218_v4 }
 0x33a   :  { %2708 = vpow2.f32 %v1241_v2 }
 0x33b   :  { %v2701_v8 = vpop.eup %2700  ;;  %v1245_v9 = vmul.f32 1.442695, %v1231_v5  ;;  %v1243_v11 = vmul.f32 1.442695, %v1230_v7 }
 0x33c   :  { %v1224_v12 = vpop.xlane.xlu1 %1223  ;;  %v1249_v14 = vsel %vm1200_vm1, %v2701_v8, 0.0 }
 0x33d   :  { %2710 = vpow2.f32 %v1245_v9  ;;  %v1232_v15 = vsub.f32 %v1196_v47, %v1224_v12  ;;  %1250 = vadd.xlane.f32.xlu0 %v1249_v14  ;;  %v1945_v9 = vld [vmem:[#allocation12 + $0x88] sm:$0xff]  ;;  %v1928_v14 = vld [vmem:[#allocation12] sm:$0xff] }
 0x33e   :  { %2712 = vpow2.f32 %v1243_v11 }
 0x33f   :  { %v2703_v17 = vpop.eup %2702  ;;  %v1247_v19 = vmul.f32 1.442695, %v1232_v15  ;;  %v1929_v15 = vld [vmem:[#allocation12 + $0x8] sm:$0xff] }
 0x340   :  { %v2705_v20 = vpop.eup %2704  ;;  %v1255_v22 = vsel %vm1200_vm1, %v2703_v17, 0.0 }
 0x341   :  { %2714 = vpow2.f32 %v1247_v19  ;;  %1256 = vadd.xlane.f32.xlu0 %v1255_v22  ;;  %v1252_v0 = vsel %vm1200_vm1, %v2705_v20, 0.0 }
 0x342   :  { %1253 = vadd.xlane.f32.xlu1 %v1252_v0  ;;  %v1946_v0 = vld [vmem:[#allocation12 + $0x90] sm:$0xff] }
 0x343   :  { %v3251_v26 = vpop.eup %2706 }
 0x344   :  { %v3253_v28 = vpop.eup %2708  ;;  %v1258_v29 = vsel %vm1200_vm1, %v3251_v26, 0.0 }
 0x345   :  { %v1261_v30 = vsel %vm1200_vm1, %v3253_v28, 0.0 }
 0x346   :  { %1262 = vadd.xlane.f32.xlu0 %v1261_v30  ;;  %1259 = vadd.xlane.f32.xlu1 %v1258_v29  ;;  %v2627_v30 = vpack.c.bf16 %v1929_v15, %v1928_v14 }
 0x347   :  { %v3259_v24 = vpop.eup %2710 }
 0x348   :  { %v3261_v31 = vpop.eup %2712  ;;  %v1267_v32 = vsel %vm1200_vm1, %v3259_v24, 0.0 }
 0x349   :  { %v1264_v33 = vsel %vm1200_vm1, %v3261_v31, 0.0 }
 0x34a   :  { %1268 = vadd.xlane.f32.xlu0 %v1267_v32  ;;  %1265 = vadd.xlane.f32.xlu1 %v1264_v33 }
 0x34b   :  { %v3267_v34 = vpop.eup %2714 }
 0x34c   :  { %v1270_v35 = vsel %vm1200_vm1, %v3267_v34, 0.0 }
 0x34e   :  { %1271 = vadd.xlane.f32.xlu1 %v1270_v35  ;;  %v1931_v35 = vld [vmem:[#allocation12 + $0x18] sm:$0xff] }
 0x3ca   :  { %v1251_v25 = vpop.xlane.xlu0 %1250 }
 0x3cb   :  { %2716 = vrcp.f32 %v1251_v25 }
 0x3ce   :  { %v1257_v36 = vpop.xlane.xlu0 %1256 }
 0x3cf   :  { %2718 = vrcp.f32 %v1257_v36  ;;  %v1254_v37 = vpop.xlane.xlu1 %1253 }
 0x3d0   :  { %2720 = vrcp.f32 %v1254_v37 }
 0x3d3   :  { %v1263_v38 = vpop.xlane.xlu0 %1262  ;;  %v1260_v39 = vpop.xlane.xlu1 %1259 }
 0x3d4   :  { %2722 = vrcp.f32 %v1263_v38 }
 0x3d5   :  { %v2717_v40 = vpop.eup %2716  ;;  %2724 = vrcp.f32 %v1260_v39 }
 0x3d6   :  { %v1281_v41 = vmul.f32 %v2717_v40, %v1251_v25 }
 0x3d7   :  { %v1269_v42 = vpop.xlane.xlu0 %1268  ;;  %v1266_v43 = vpop.xlane.xlu1 %1265 }
 0x3d8   :  { %v1289_v44 = vsub.f32 2.0, %v1281_v41  ;;  %2726 = vrcp.f32 %v1269_v42 }
 0x3d9   :  { %v2719_v45 = vpop.eup %2718  ;;  %2728 = vrcp.f32 %v1266_v43 }
 0x3da   :  { %v2721_v46 = vpop.eup %2720  ;;  %v1297_v47 = vmul.f32 %v2717_v40, %v1289_v44  ;;  %v1283_v48 = vmul.f32 %v2719_v45, %v1257_v36  ;;  %v1933_v40 = vld [vmem:[#allocation12 + $0x28] sm:$0xff]  ;;  %v1935_v44 = vld [vmem:[#allocation12 + $0x38] sm:$0xff] }
 0x3db   :  { %v1282_v49 = vmul.f32 %v2721_v46, %v1254_v37  ;;  %v1272_v50 = vpop.xlane.xlu1 %1271  ;;  %v1949_v37 = vld [vmem:[#allocation12 + $0xa8] sm:$0xff] }
 0x3dc   :  { %v1305_v51 = vmul.f32 %v2701_v8, %v1297_v47  ;;  %v1291_v52 = vsub.f32 2.0, %v1283_v48  ;;  %2730 = vrcp.f32 %v1272_v50  ;;  %v1944_v8 = vld [vmem:[#allocation12 + $0x80] sm:$0xff]  ;;  %v1953_v47 = vld [vmem:[#allocation12 + $0xc8] sm:$0xff] }
 0x3dd   :  { %v1290_v53 = vsub.f32 2.0, %v1282_v49  ;;  %v2625_v22 = vpack.c.bf16 %v1945_v9, %v1944_v8  ;;  %v1936_v49 = vld [vmem:[#allocation12 + $0x40] sm:$0xff]  ;;  %v2683_v9 = vld [vmem:[#allocation14 + $0x8] sm:$0xff]  }
 0x3de   :  { %v2723_v54 = vpop.eup %2722  ;;  %v1299_v55 = vmul.f32 %v2719_v45, %v1291_v52  ;;  %2456 = vmatmul.mubr.msk.f32.vlgmr.msra.gmra.mrb[10].mxu0 %vm1313_vm2, %v1305_v51  ;;  %v1954_v52 = vld [vmem:[#allocation12 + $0xd0] sm:$0xff]  ;;  %v2682_v8 = vld [vmem:[#allocation14] sm:$0xff]  }
 0x3df   :  { %v2725_v56 = vpop.eup %2724  ;;  %v1298_v57 = vmul.f32 %v2721_v46, %v1290_v53  ;;  %v1285_v58 = vmul.f32 %v2723_v54, %v1263_v38  ;;  %2464 = vmatpush3.msra.mxu0 %v3196_v10  ;;  %2465 = vmatprep.mubr.msk.f32.mxu0 %vm2963_vm0, %v2962_v1  ;;  %v1952_v46 = vld [vmem:[#allocation12 + $0xc0] sm:$0xff]  ;;  %v1955_v53 = vld [vmem:[#allocation12 + $0xd8] sm:$0xff] }
 0x3e0   :  { %v1307_v59 = vmul.f32 %v2703_v17, %v1299_v55  ;;  %v1284_v60 = vmul.f32 %v2725_v56, %v1260_v39  ;;  %2473 = vmatprep.subr.mxu0 %v2962_v1  ;;  %v1932_v39 = vld [vmem:[#allocation12 + $0x20] sm:$0xff]  ;;  %v2641_v48 = vpack.c.bf16 %v1953_v47, %v1952_v46  ;;  %v1938_v55 = vld [vmem:[#allocation12 + $0x50] sm:$0xff]  ;;  %v2689_v46 = vld [vmem:[#allocation14 + $0x38] sm:$0xff]  }
 0x3e1   :  { %v1306_v61 = vmul.f32 %v2705_v20, %v1298_v57  ;;  %v1293_v62 = vsub.f32 2.0, %v1285_v58  ;;  %v2635_v41 = vpack.c.bf16 %v1933_v40, %v1932_v39  ;;  %v1956_v58 = vld [vmem:[#allocation12 + $0xe0] sm:$0xff] }
 0x3e2   :  { %v2727_v63 = vpop.eup %2726  ;;  %v1292_v2 = vsub.f32 2.0, %v1284_v60  ;;  %2466 = vmatmul.mubr.msk.f32.vlgmr.msra.gmra.mrb[12].mxu0 %vm1313_vm2, %v1307_v59  ;;  %v1957_v59 = vld [vmem:[#allocation12 + $0xe8] sm:$0xff] }
 0x3e3   :  { %v2729_v3 = vpop.eup %2728  ;;  %v1301_v4 = vmul.f32 %v2723_v54, %v1293_v62  ;;  %v1287_v5 = vmul.f32 %v2727_v63, %v1269_v42  ;;  %2461 = vmatmul.mubr.msk.f32.vlgmr.msra.gmra.mrb[12].mxu1 %vm1313_vm2, %v1306_v61  ;;  %2474 = vmatpush3.msra.mxu0 %v3204_v16  ;;  %v2645_v54 = vpack.c.bf16 %v1955_v53, %v1954_v52  ;;  %v1940_v61 = vld [vmem:[#allocation12 + $0x60] sm:$0xff]  ;;  %v1941_v62 = vld [vmem:[#allocation12 + $0x68] sm:$0xff]  ;;  %v2153_v53 = vand.u32 127, %v190_v27 }
 0x3e4   :  { %v1300_v10 = vmul.f32 %v2725_v56, %v1292_v2  ;;  %v1286_v7 = vmul.f32 %v2729_v3, %v1266_v43  ;;  %2469 = vmatpush3.msra.mxu1 %v3198_v13  ;;  %2470 = vmatprep.mubr.msk.f32.mxu1 %vm2963_vm0, %v2962_v1  ;;  %v1934_v43 = vld [vmem:[#allocation12 + $0x30] sm:$0xff]  ;;  %v1939_v56 = vld [vmem:[#allocation12 + $0x58] sm:$0xff]  ;;  %v2649_v60 = vpack.c.bf16 %v1957_v59, %v1956_v58 }
 0x3e5   :  { %v1309_v11 = vmul.f32 %v3253_v28, %v1301_v4  ;;  %v1295_v12 = vsub.f32 2.0, %v1287_v5  ;;  %2475 = vmatprep.mubr.msk.f32.mxu0 %vm2963_vm0, %v2962_v1  ;;  %2478 = vmatprep.subr.mxu1 %v2962_v1  ;;  %v1947_v28 = vld [vmem:[#allocation12 + $0x98] sm:$0xff]  ;;  %v2639_v45 = vpack.c.bf16 %v1935_v44, %v1934_v43  ;;  %v2647_v57 = vpack.c.bf16 %v1939_v56, %v1938_v55  ;;  %v1958_v2 = vld [vmem:[#allocation12 + $0xf0] sm:$0xff]  ;;  %v2686_v43 = vld [vmem:[#allocation14 + $0x20] sm:$0xff]  }
 0x3e6   :  { %v2731_v16 = vpop.eup %2730  ;;  %v1308_v17 = vmul.f32 %v3251_v26, %v1300_v10  ;;  %v1294_v19 = vsub.f32 2.0, %v1286_v7  ;;  %2483 = vmatprep.subr.mxu0 %v2962_v1  ;;  %v1930_v26 = vld [vmem:[#allocation12 + $0x10] sm:$0xff]  ;;  %v2629_v36 = vpack.c.bf16 %v1947_v28, %v1946_v0  ;;  %v1943_v10 = vld [vmem:[#allocation12 + $0x78] sm:$0xff]  ;;  %v2687_v44 = vld [vmem:[#allocation14 + $0x28] sm:$0xff]   ;;  %vm2157_vm10 = vcmp.lt.s32.totalorder %v2153_v53, 64 }
 0x3e7   :  { %v1303_v13 = vmul.f32 %v2727_v63, %v1295_v12  ;;  %v1288_v20 = vmul.f32 %v2731_v16, %v1272_v50  ;;  %2476 = vmatmul.mubr.msk.f32.vlgmr.msra.gmra.mrb[14].mxu0 %vm1313_vm2, %v1309_v11  ;;  %v1937_v50 = vld [vmem:[#allocation12 + $0x48] sm:$0xff]  ;;  %v2651_v63 = vpack.c.bf16 %v1941_v62, %v1940_v61  ;;  %v1942_v5 = vld [vmem:[#allocation12 + $0x70] sm:$0xff] }
 0x3e8   :  { %v1302_v29 = vmul.f32 %v2729_v3, %v1294_v19  ;;  %2471 = vmatmul.mubr.msk.f32.vlgmr.msra.gmra.mrb[14].mxu1 %vm1313_vm2, %v1308_v17  ;;  %2484 = vmatpush3.msra.mxu0 %v3216_v21  ;;  %v1948_v21 = vld [vmem:[#allocation12 + $0xa0] sm:$0xff]  ;;  %v2643_v51 = vpack.c.bf16 %v1937_v50, %v1936_v49  ;;  %v1959_v3 = vld [vmem:[#allocation12 + $0xf8] sm:$0xff]  ;;  %v2655_v7 = vpack.c.bf16 %v1943_v10, %v1942_v5  ;;  %v2684_v11 = vld [vmem:[#allocation14 + $0x10] sm:$0xff]  }
 0x3e9   :  { %v1311_v32 = vmul.f32 %v3259_v24, %v1303_v13  ;;  %v1296_v33 = vsub.f32 2.0, %v1288_v20  ;;  %2479 = vmatpush3.msra.mxu1 %v3210_v18  ;;  %2480 = vmatprep.mubr.msk.f32.mxu1 %vm2963_vm0, %v2962_v1  ;;  %v2631_v18 = vpack.c.bf16 %v1931_v35, %v1930_v26  ;;  %v2653_v4 = vpack.c.bf16 %v1959_v3, %v1958_v2 }
 0x3ea   :  { %v1310_v25 = vmul.f32 %v3261_v31, %v1302_v29  ;;  %2485 = vmatprep.mubr.msk.f32.mxu0 %vm2963_vm0, %v2962_v1  ;;  %2488 = vmatprep.subr.mxu1 %v2962_v1  ;;  %v2633_v31 = vpack.c.bf16 %v1949_v37, %v1948_v21 }
 0x3eb   :  { %v1304_v38 = vmul.f32 %v2731_v16, %v1296_v33  ;;  %2486 = vmatmul.mubr.msk.f32.vlgmr.msra.gmra.mrb[16].mxu0 %vm1313_vm2, %v1311_v32  ;;  %2626 = vmatprep.subr.bf16.mxu0 %v2625_v22 }
 0x3ec   :  { %2481 = vmatmul.mubr.msk.f32.vlgmr.msra.gmra.mrb[16].mxu1 %vm1313_vm2, %v1310_v25  ;;  %2628 = vmatpush3.bf16.msra.mxu0 %v2627_v30 }
 0x3ed   :  { %v1312_v24 = vmul.f32 %v3267_v34, %v1304_v38  ;;  %2489 = vmatpush3.msra.mxu1 %v3222_v23  ;;  %2490 = vmatprep.mubr.msk.f32.mxu1 %vm2963_vm0, %v2962_v1  ;;  %v1950_v34 = vld [vmem:[#allocation12 + $0xb0] sm:$0xff]  ;;  %v1951_v23 = vld [vmem:[#allocation12 + $0xb8] sm:$0xff] }
 0x3ee   :  { %2630 = vmatprep.subr.bf16.mxu0 %v2629_v36  ;;  %2493 = vmatprep.subr.bf16.mxu1 %v2962_v1  ;;  %v2637_v42 = vpack.c.bf16 %v1951_v23, %v1950_v34 }
 0x3f0   :  { %2491 = vmatmul.mubr.msk.f32.vlgmr.msra.gmra.mrb[18].mxu1 %vm1313_vm2, %v1312_v24  ;;  %2632 = vmatpush3.bf16.msra.mxu0 %v2631_v18 }
 0x3f1   :  { %2634 = vmatprep.subr.bf16.mxu0 %v2633_v31  ;;  %2509 = vmatprep.mubr.msk.bf16.mxu1 %vm2963_vm0, %v2962_v1 }
 0x3f2   :  { %2494 = vmatpush3.bf16.msra.mxu1 %v2682_v8 }
 0x3f3   :  { %2495 = vmatprep.subr.bf16.mxu1 %v2962_v1 }
 0x3f4   :  { %2636 = vmatpush3.bf16.msra.mxu0 %v2635_v41 }
 0x3f5   :  { %2638 = vmatprep.subr.bf16.mxu0 %v2637_v42  ;;  %v2685_v42 = vld [vmem:[#allocation14 + $0x18] sm:$0xff]  }
 0x3f6   :  { %2496 = vmatpush3.bf16.msra.mxu1 %v2683_v9 }
 0x3f7   :  { %2497 = vmatprep.subr.bf16.mxu1 %v2962_v1 }
 0x3f8   :  { %2640 = vmatpush3.bf16.msra.mxu0 %v2639_v45  ;;  %v2688_v45 = vld [vmem:[#allocation14 + $0x30] sm:$0xff]  }
 0x3f9   :  { %2642 = vmatprep.subr.bf16.mxu0 %v2641_v48 }
 0x3fa   :  { %2498 = vmatpush3.bf16.msra.mxu1 %v2684_v11 }
 0x3fb   :  { %2499 = vmatprep.subr.bf16.mxu1 %v2962_v1 }
 0x3fc   :  { %2644 = vmatpush3.bf16.msra.mxu0 %v2643_v51 }
 0x3fd   :  { %2646 = vmatprep.subr.bf16.mxu0 %v2645_v54 }
 0x3fe   :  { %2500 = vmatpush3.bf16.msra.mxu1 %v2685_v42 }
 0x3ff   :  { %2501 = vmatprep.subr.bf16.mxu1 %v2962_v1 }
 0x400   :  { %2648 = vmatpush3.bf16.msra.mxu0 %v2647_v57 }
 0x401   :  { %2650 = vmatprep.subr.bf16.mxu0 %v2649_v60 }
 0x402   :  { %2502 = vmatpush3.bf16.msra.mxu1 %v2686_v43 }
 0x403   :  { %2503 = vmatprep.subr.bf16.mxu1 %v2962_v1 }
 0x404   :  { %2652 = vmatpush3.bf16.msra.mxu0 %v2651_v63 }
 0x405   :  { %2654 = vmatprep.subr.bf16.mxu0 %v2653_v4 }
 0x406   :  { %2504 = vmatpush3.bf16.msra.mxu1 %v2687_v44 }
 0x407   :  { %2505 = vmatprep.subr.bf16.mxu1 %v2962_v1 }
 0x408   :  { %2656 = vmatpush3.bf16.msra.mxu0 %v2655_v7 }
 0x40a   :  { %2506 = vmatpush3.bf16.msra.mxu1 %v2688_v45 }
 0x40b   :  { %2507 = vmatprep.subr.bf16.mxu1 %v2962_v1  ;;  %v2224_v1 = vld [vmem:[%s3358_s10] ss:$0 sm:$0xff] }
 0x40e   :  { %2508 = vmatpush3.bf16.msra.mxu1 %v2689_v46 }
 0x4b1   :  { %v1383_v12 = vpop.f32.mrb[10].mxu0 }
 0x4b2   :  { %v2457_v14 = vpop.f32.mrb[11].mxu0 }
 0x4b5   :  { %v1529_v15 = vpop.f32.mrb[12].mxu0 }
 0x4b6   :  { %v1456_v16 = vpop.f32.mrb[12].mxu1  ;;  %v1909_v17 = vrot.slane %v1529_v15, 6  ;;  %v2467_v19 = vpop.f32.mrb[13].mxu0 }
 0x4b7   :  { %v1906_v13 = vrot.slane %v1456_v16, 7  ;;  %v2462_v20 = vpop.f32.mrb[13].mxu1 }
 0x4b9   :  { %v1908_v22 = vsel %vm1907_vm3, %v1906_v13, %v1383_v12 }
 0x4ba   :  { %v1911_v0 = vsel %vm1910_vm4, %v1909_v17, %v1908_v22  ;;  %v1675_v28 = vpop.f32.mrb[14].mxu0 }
 0x4bb   :  { %v1602_v29 = vpop.f32.mrb[14].mxu1  ;;  %v1915_v30 = vrot.slane %v1675_v28, 4  ;;  %v2477_v32 = vpop.f32.mrb[15].mxu0 }
 0x4bc   :  { %v1912_v33 = vrot.slane %v1602_v29, 5  ;;  %v2472_v26 = vpop.f32.mrb[15].mxu1 }
 0x4be   :  { %v1914_v35 = vsel %vm1913_vm5, %v1912_v33, %v1911_v0  ;;  %v1821_v25 = vpop.f32.mrb[16].mxu0 }
 0x4bf   :  { %v1917_v36 = vsel %vm1916_vm6, %v1915_v30, %v1914_v35  ;;  %v1748_v21 = vpop.f32.mrb[16].mxu1  ;;  %v1921_v37 = vrot.slane %v1821_v25, 2  ;;  %v2487_v38 = vpop.f32.mrb[17].mxu0 }
 0x4c0   :  { %v1918_v18 = vrot.slane %v1748_v21, 3  ;;  %v2482_v24 = vpop.f32.mrb[17].mxu1 }
 0x4c2   :  { %v1920_v31 = vsel %vm1919_vm7, %v1918_v18, %v1917_v36 }
 0x4c3   :  { %v1894_v39 = vpop.f32.mrb[18].mxu1  ;;  %v1923_v40 = vsel %vm1922_vm8, %v1921_v37, %v1920_v31 }
 0x4c4   :  { %v1924_v41 = vrot.slane %v1894_v39, 1  ;;  %v2492_v34 = vpop.f32.mrb[19].mxu1 }
 0x4c6   :  { %v1926_v23 = vsel %vm1925_vm9, %v1924_v41, %v1923_v40 }
 0x4c7   :  { %2031 = vmatprep.mubr.f32.mxu0 %v1926_v23 }
 0x4c8   :  { %2032 = vmatmul.mubr.f32.vlgmr.msra.gmra.mrb[18].mxu0 %v3190_v6  ;;  %v2223_v6 = vld [vmem:[%s3356_s8] ss:$0 sm:$0xff]  ;;  %s2965_s8 = smov [#allocation16]  }
 0x4c9   :  { %s2196_s21 = sshll.u32 %s2965_s8, 4  ;;  %s2197_s21 = int_to_ptr.vmem [resolvable:$true] %s2196_s21 }
 0x4ca   :  { %s2892_s25 = scalar_lea.vmem %s2197_s21, 128  ;;  %p2897_p1 = scmp.lt.s32.totalorder %s2197_s21, %s2197_s21 }
 0x4cb   :  { %p2893_p0 = scmp.ne.s32.totalorder %s2197_s21, %s2892_s25  ;;  %p2898_p2 = scmp.lt.s32.totalorder %s2892_s25, %s2892_s25 }
 0x4cd   :  { %p2899_p3 = por %p2898_p2, %p2897_p1 }
 0x4cf   :  { %p2900_p4 = pnand %p2899_p3, %p2893_p0 }
 0x59b   :  { %v2331_v47 = vpop.f32.mrb[18].mxu0 }
 0x59c   :  { %v2332_v48 = vpop.f32.mrb[19].mxu0 }
 0x59d   :  { %v2333_v49 = vadd.f32 %v2332_v48, %v2331_v47 }
 0x59f   :  { %v2034_v50 = vadd.f32 %v2333_v49, %v2223_v6 }
 0x5a1   :  { %2732 = vtanh.f32 %v2034_v50 }
 0x5ab   :  { %v2733_v51 = vpop.eup %2732 }
 0x5ac   :  { %v2040_v52 = vpack.c.bf16 %v2733_v51, %v2733_v51 }
 0x5ae   :  { %2510 = vmatmul.mubr.bf16.vlgmr.msra.gmra.mrb[20].mxu1 %v2040_v52 }
 0x681   :  { %v2146_v54 = vpop.f32.mrb[20].mxu1 }
 0x682   :  { %v2147_v55 = vadd.f32 %v2224_v1, %v2146_v54  ;;  %v2511_v56 = vpop.f32.mrb[21].mxu1 }
 0x683   :  { %v2149_v57 = vpop.f32.mrb[22].mxu1 }
 0x684   :  { %v2158_v58 = vsel %vm2157_vm10, %v2147_v55, -1e+30  ;;  %v2512_v59 = vpop.f32.mrb[23].mxu1 }
 0x685   :  { %2167 = vmax.xlane.f32.xlu0 %v2158_v58 }
 0x712   :  { %v2168_v60 = vpop.xlane.xlu0 %2167 }
 0x713   :  { %v2169_v61 = vsub.f32 %v2158_v58, %v2168_v60 }
 0x715   :  { %v2170_v62 = vmul.f32 1.442695, %v2169_v61 }
 0x717   :  { %2734 = vpow2.f32 %v2170_v62 }
 0x721   :  { %v2735_v63 = vpop.eup %2734 }
 0x722   :  { %2172 = vadd.xlane.f32.xlu1 %v2735_v63 }
 0x723   :  { %2903 = shalt.err (!%p2900_p4)
}
 0x724   :  { %s2904_s2 = scalar_lea.hbm %s3360_s12, 128 }
 0x725   :  { %p2905_p5 = scmp.ne.s32.totalorder %s3360_s12, %s2904_s2  ;;  %p2908_p6 = scmp.lt.u32.totalorder %s2904_s2, %s3360_s12 }
 0x727   :  { %p2910_p7 = pnand %p2908_p6, %p2905_p5 }
 0x729   :  { %2913 = shalt.err (!%p2910_p7)
}
 0x72a   :  { %2199 = dma.vmem_to_hbm [thread:$0]  %s2197_s21, 128, %s3360_s12, [#allocation17]  }
 0x72b   :  { %s2966_s13 = smov [#allocation15]  }
 0x72c   :  { %s2186_s15 = sshll.u32 %s2966_s13, 4  ;;  %s2187_s15 = int_to_ptr.vmem [resolvable:$true] %s2186_s15 }
 0x72d   :  { %s2914_s0 = scalar_lea.vmem %s2187_s15, 128  ;;  %p2919_p9 = scmp.lt.s32.totalorder %s2187_s15, %s2187_s15 }
 0x72e   :  { %p2915_p8 = scmp.ne.s32.totalorder %s2187_s15, %s2914_s0  ;;  %p2920_p10 = scmp.lt.s32.totalorder %s2914_s0, %s2914_s0 }
 0x730   :  { %p2921_p11 = por %p2920_p10, %p2919_p9 }
 0x732   :  { %p2922_p12 = pnand %p2921_p11, %p2915_p8 }
 0x7af   :  { %v2173_v27 = vpop.xlane.xlu1 %2172 }
 0x7b0   :  { %2736 = vrcp.f32 %v2173_v27 }
 0x7ba   :  { %v2737_v2 = vpop.eup %2736 }
 0x7bb   :  { %v2175_v3 = vmul.f32 %v2737_v2, %v2173_v27 }
 0x7bd   :  { %v2176_v4 = vsub.f32 2.0, %v2175_v3 }
 0x7bf   :  { %v2177_v5 = vmul.f32 %v2737_v2, %v2176_v4 }
 0x7c1   :  { %v2178_v10 = vmul.f32 %v2735_v63, %v2177_v5 }
 0x7c3   :  { %2179 = vst [vmem:[#allocation15] sm:$0xff] %v2178_v10 }
 0x7c4   :  { %2925 = shalt.err (!%p2922_p12)
}
 0x7c5   :  { %s2926_s16 = scalar_lea.hbm %s3359_s11, 128 }
 0x7c6   :  { %p2927_p13 = scmp.ne.s32.totalorder %s3359_s11, %s2926_s16  ;;  %p2930_p0 = scmp.lt.u32.totalorder %s2926_s16, %s3359_s11 }
 0x7c8   :  { %p2932_p1 = pnand %p2930_p0, %p2927_p13 }
 0x7ca   :  { %2935 = shalt.err (!%p2932_p1)
}
 0x7cb   :  { %2189 = dma.vmem_to_hbm [thread:$0]  %s2187_s15, 128, %s3359_s11, [#allocation5]  }
 0x7cc   :  { %2944 = dma.done.wait [#allocation5], 128  }
 0x7cd   :  { %2945 = vsyncadd [#allocation5], 4294967168 }
 0x7ce   :  { %2946 = dma.done.wait [#allocation17], 128  }
 0x7cf   :  { %2947 = vsyncadd [#allocation17], 4294967168 }
 0x7d0   :  { %2206 = vsyncpa [#allocation4], 1 }
 0x7d1   :  { %2207 = vsyncpa [#allocation7], 1 }
 0x7d2   :  { %2208 = vsyncpa [#allocation10], 1 }
 0x7d3   :  { %2209 = vsyncpa [#allocation13], 1 }
 0x7d4   :  { %2210 = vsyncpa [#allocation5], 1 }
 0x7d5   :  { %2211 = vsyncpa [#allocation17], 1 }

</bundles_post_ra>
